<compile_context>
chip_gen: v6e
topology: v6e:2x2x1
jax: 0.10.0
libtpu: 0.0.40
codegen_flags: <defaults>
</compile_context>

<pallas_src>
import functools

import jax
import jax.numpy as jnp
from jax.experimental import pallas as pl
from jax.experimental.pallas import tpu as pltpu


def _round_up(x, m):
    return (x + m - 1) // m * m


# -----------------------------------------------------------------------------
# Fused 4-layer ResUnet kernel (shared by G1/G2 via a generator grid axis).
# Activations live as (C, Lpad) with content region [guard, guard+Lc); a 3x3
# "same" conv tap (dy, dx) is a pure static lane shift by dy*(W+2)+dx.  Outputs
# at pad-ring / Lc-extension positions are forced to exact zero with `mask`,
# which is precisely the zero padding the next conv layer needs.
# -----------------------------------------------------------------------------
def _make_fused_resunet_kernel(H, W, cin, hidden, cout, guard, L, Lc, Lpad):
    Wp = W + 2
    # lane offsets (into the guarded buffer) of the 9 taps of a 3x3 conv
    offs = tuple(guard + dy * Wp + dx for dy in (-1, 0, 1) for dx in (-1, 0, 1))

    def kernel(x_ref, mask_ref,
               w1_ref, b1_ref, w2_ref, b2_ref, w3_ref, b3_ref, w4_ref, b4_ref,
               o_ref, h_buf, r_buf):
        mask = mask_ref[...]                      # (1, Lc) f32, 1.0 on true pixels

        # Zero only the guard lanes (the content region [guard, guard+Lc) is
        # fully overwritten each layer before it is read).  Guards must stay
        # finite so masked pad-ring outputs are exact zeros, not NaN*0.
        h_buf[:, :guard] = jnp.zeros((hidden, guard), h_buf.dtype)
        h_buf[:, guard + Lc:] = jnp.zeros((hidden, Lpad - guard - Lc), h_buf.dtype)
        r_buf[:, :guard] = jnp.zeros((hidden, guard), r_buf.dtype)
        r_buf[:, guard + Lc:] = jnp.zeros((hidden, Lpad - guard - Lc), r_buf.dtype)

        def conv_acc(w_ref, buf_ref, ci, co):
            # 3x3 conv as 9 accumulating MXU dots on lane-shifted views — no
            # materialized (9*ci, Lc) tap matrix.
            acc = jnp.zeros((co, Lc), jnp.float32)
            for t, s in enumerate(offs):
                acc = acc + jnp.dot(w_ref[:, t * ci:(t + 1) * ci],
                                    buf_ref[:, s:s + Lc],
                                    preferred_element_type=jnp.float32)
            return acc

        # ---- layer 1: cin -> hidden, relu.  Single K=9*cin bf16 matmul. -----
        x_taps = jnp.concatenate([x_ref[:, s:s + Lc] for s in offs], axis=0)
        acc = jnp.dot(w1_ref[...], x_taps, preferred_element_type=jnp.float32)
        h = jnp.maximum(acc + b1_ref[...], 0.0) * mask          # f32, kept live
        h_buf[:, guard:guard + Lc] = h.astype(h_buf.dtype)

        # ---- layer 2: hidden -> hidden, relu ---------------------------------
        acc = conv_acc(w2_ref, h_buf, hidden, hidden)
        r1 = jnp.maximum(acc + b2_ref[...], 0.0) * mask
        r_buf[:, guard:guard + Lc] = r1.astype(r_buf.dtype)

        # ---- layer 3: hidden -> hidden, residual skip (f32 h), relu ----------
        acc = conv_acc(w3_ref, r_buf, hidden, hidden)
        r2 = jnp.maximum(acc + b3_ref[...] + h, 0.0) * mask
        r_buf[:, guard:guard + Lc] = r2.astype(r_buf.dtype)

        # ---- layer 4: hidden -> cout (padded), tanh ---------------------------
        acc = conv_acc(w4_ref, r_buf, hidden, cout)
        o_ref[...] = jnp.tanh(acc + b4_ref[...]).astype(o_ref.dtype)

    return kernel


# -----------------------------------------------------------------------------
# Fused DGD_cGAN.forward(): one pallas_call runs G1(Uw) and G2(AT).
# -----------------------------------------------------------------------------
def dgd_cgan_forward_pallas(g1_params, g2_params, Uw, AT, hidden):
    B, cin, H, W = Uw.shape
    assert AT.shape == Uw.shape
    Wp = W + 2
    L = (H + 2) * Wp
    Lc = _round_up(L, 128)                 # lane-dense compute/store length
    guard = _round_up(W + 3, 128)          # slack for the lane-shifted 3x3 taps
    Lpad = Lc + 2 * guard
    COUT = 6                               # G1's 3-ch head is zero-padded to 6

    # --- inputs: stack generators, channel-major flat padded-grid, bf16 -------
    x = jnp.stack([Uw, AT], axis=0).astype(jnp.float32)          # (2,B,3,H,W)
    xp = jnp.pad(x, ((0, 0), (0, 0), (0, 0), (1, 1), (1, 1)))
    xf = jnp.pad(xp.reshape(2, B, cin, L),
                 ((0, 0), (0, 0), (0, 0), (guard, Lpad - guard - L))
                 ).astype(jnp.bfloat16)                          # (2,B,3,Lpad)

    # --- mask of true pixels inside the (H+2)x(W+2) grid, padded to Lc --------
    rr = jnp.arange(H + 2)[:, None]
    cc = jnp.arange(Wp)[None, :]
    mask = (((rr >= 1) & (rr <= H) & (cc >= 1) & (cc <= W))
            .astype(jnp.float32).reshape(1, L))
    mask = jnp.pad(mask, ((0, 0), (0, Lc - L)))                  # (1, Lc)

    # --- weights: tap-major (co, 9*ci) bf16, stacked on a generator axis ------
    def flat_w(w, co_pad=None):            # (3,3,ci,co) -> (co_pad, 9*ci) bf16
        co = w.shape[3]
        m = jnp.transpose(w, (3, 0, 1, 2)).reshape(co, -1).astype(jnp.bfloat16)
        if co_pad is not None and co < co_pad:
            m = jnp.pad(m, ((0, co_pad - co), (0, 0)))
        return m

    def col_b(b, rows=None):
        v = b.reshape(-1, 1).astype(jnp.float32)
        if rows is not None and v.shape[0] < rows:
            v = jnp.pad(v, ((0, rows - v.shape[0]), (0, 0)))
        return v

    def stack2(fn, name, **kw):
        return jnp.stack([fn(g1_params[name], **kw), fn(g2_params[name], **kw)],
                         axis=0)

    w1 = stack2(flat_w, "w_in");   b1 = stack2(col_b, "b_in")
    w2 = stack2(flat_w, "w_r1");   b2 = stack2(col_b, "b_r1")
    w3 = stack2(flat_w, "w_r2");   b3 = stack2(col_b, "b_r2")
    w4 = stack2(flat_w, "w_out", co_pad=COUT)
    b4 = stack2(col_b, "b_out", rows=COUT)

    kernel = _make_fused_resunet_kernel(H, W, cin, hidden, COUT,
                                        guard, L, Lc, Lpad)

    gmap = lambda g, b: (g, 0, 0)          # generator-resident weights/biases
    out = pl.pallas_call(
        kernel,
        out_shape=jax.ShapeDtypeStruct((2, B, COUT, Lc), jnp.float32),
        grid=(2, B),
        in_specs=[
            pl.BlockSpec((None, None, cin, Lpad), lambda g, b: (g, b, 0, 0)),
            pl.BlockSpec((1, Lc), lambda g, b: (0, 0)),          # mask (resident)
            pl.BlockSpec((None, hidden, 9 * cin), gmap),          # w1
            pl.BlockSpec((None, hidden, 1), gmap),                # b1
            pl.BlockSpec((None, hidden, 9 * hidden), gmap),       # w2
            pl.BlockSpec((None, hidden, 1), gmap),                # b2
            pl.BlockSpec((None, hidden, 9 * hidden), gmap),       # w3
            pl.BlockSpec((None, hidden, 1), gmap),                # b3
            pl.BlockSpec((None, COUT, 9 * hidden), gmap),         # w4
            pl.BlockSpec((None, COUT, 1), gmap),                  # b4
        ],
        out_specs=pl.BlockSpec((None, None, COUT, Lc), lambda g, b: (g, b, 0, 0)),
        scratch_shapes=[
            pltpu.VMEM((hidden, Lpad), jnp.bfloat16),             # h (padded)
            pltpu.VMEM((hidden, Lpad), jnp.bfloat16),             # r1 / r2
        ],
        compiler_params=pltpu.CompilerParams(
            dimension_semantics=("parallel", "parallel"),
            vmem_limit_bytes=32 * 1024 * 1024,
        ),
    )(xf, mask, w1, b1, w2, b2, w3, b3, w4, b4)

    # Slice the true HxW region back out of the lane-dense slab (already NCHW).
    out = out[..., :L].reshape(2, B, COUT, H + 2, Wp)[:, :, :, 1:H + 1, 1:W + 1]
    fake_dewater = out[0, :, :3]           # G1(Uw)
    fake_G2 = out[1, :, :6]                # G2(AT)
    return fake_dewater, fake_G2


# -----------------------------------------------------------------------------
# Parameters
# -----------------------------------------------------------------------------
def make_resunet_params(key, cin, cout, hidden):
    ks = jax.random.split(key, 4)

    def wconv(k, ci, co):
        # GAN-style init_weights: N(0, 0.02)
        return 0.02 * jax.random.normal(k, (3, 3, ci, co), jnp.float32)

    return {
        "w_in": wconv(ks[0], cin, hidden), "b_in": jnp.zeros((hidden,), jnp.float32),
        "w_r1": wconv(ks[1], hidden, hidden), "b_r1": jnp.zeros((hidden,), jnp.float32),
        "w_r2": wconv(ks[2], hidden, hidden), "b_r2": jnp.zeros((hidden,), jnp.float32),
        "w_out": wconv(ks[3], hidden, cout), "b_out": jnp.zeros((cout,), jnp.float32),
    }


# -----------------------------------------------------------------------------
# Pure-JAX f32 reference (loose bf16-tolerance correctness check).
# -----------------------------------------------------------------------------
def _conv3x3_ref(x, w, b):
    wt = jnp.transpose(w, (3, 2, 0, 1))              # (Cout, Cin, 3, 3)
    y = jax.lax.conv_general_dilated(
        x, wt, window_strides=(1, 1), padding="SAME",
        dimension_numbers=("NCHW", "OIHW", "NCHW"))
    return y + b.reshape(1, -1, 1, 1)


def resunet_forward_ref(params, x):
    h = jax.nn.relu(_conv3x3_ref(x, params["w_in"], params["b_in"]))
    r = jax.nn.relu(_conv3x3_ref(h, params["w_r1"], params["b_r1"]))
    r = jax.nn.relu(_conv3x3_ref(r, params["w_r2"], params["b_r2"]) + h)
    return jnp.tanh(_conv3x3_ref(r, params["w_out"], params["b_out"]))


# -----------------------------------------------------------------------------
if __name__ == "__main__":
    key = jax.random.PRNGKey(0)
    k_uw, k_at, k_g1, k_g2 = jax.random.split(key, 4)

    B, C, H, W = 2, 3, 16, 16
    HIDDEN = 32

    Uw = jax.random.normal(k_uw, (B, C, H, W), jnp.float32)
    AT = jax.random.normal(k_at, (B, C, H, W), jnp.float32)

    g1_params = make_resunet_params(k_g1, cin=3, cout=3, hidden=HIDDEN)
    g2_params = make_resunet_params(k_g2, cin=3, cout=6, hidden=HIDDEN)

    fwd = jax.jit(functools.partial(dgd_cgan_forward_pallas, g1_params, g2_params,
                                    hidden=HIDDEN))
    fake_dewater, fake_G2 = fwd(Uw, AT)
    jax.block_until_ready((fake_dewater, fake_G2))

    assert fake_dewater.shape == (B, 3, H, W), fake_dewater.shape
    assert fake_G2.shape == (B, 6, H, W), fake_G2.shape
    assert bool(jnp.all(jnp.isfinite(fake_dewater)))
    assert bool(jnp.all(jnp.isfinite(fake_G2)))

    # Correctness vs f32 XLA reference (loose tolerance for bf16 matmuls).
    ref_dewater = resunet_forward_ref(g1_params, Uw)
    ref_G2 = resunet_forward_ref(g2_params, AT)
    assert bool(jnp.allclose(fake_dewater, ref_dewater, atol=2e-2, rtol=2e-2)), \
        float(jnp.max(jnp.abs(fake_dewater - ref_dewater)))
    assert bool(jnp.allclose(fake_G2, ref_G2, atol=2e-2, rtol=2e-2)), \
        float(jnp.max(jnp.abs(fake_G2 - ref_G2)))

    print("KERNEL_OK")
</pallas_src>

<mosaic_0001>
module attributes {stable_mosaic.version = 11 : i64} {
  func.func @kernel(%arg0: i32, %arg1: i32, %arg2: memref<1x1x3x640xbf16, #tpu.memory_space<vmem>>, %arg3: memref<1x384xf32, #tpu.memory_space<vmem>>, %arg4: memref<1x32x27xbf16, #tpu.memory_space<vmem>>, %arg5: memref<1x32x1xf32, #tpu.memory_space<vmem>>, %arg6: memref<1x32x288xbf16, #tpu.memory_space<vmem>>, %arg7: memref<1x32x1xf32, #tpu.memory_space<vmem>>, %arg8: memref<1x32x288xbf16, #tpu.memory_space<vmem>>, %arg9: memref<1x32x1xf32, #tpu.memory_space<vmem>>, %arg10: memref<1x6x288xbf16, #tpu.memory_space<vmem>>, %arg11: memref<1x6x1xf32, #tpu.memory_space<vmem>>, %arg12: memref<1x1x6x384xf32, #tpu.memory_space<vmem>>, %arg13: memref<32x640xbf16, #tpu.memory_space<vmem>>, %arg14: memref<32x640xbf16, #tpu.memory_space<vmem>>) attributes {dimension_semantics = [#tpu.dimension_semantics<parallel>, #tpu.dimension_semantics<parallel>], iteration_bounds = array<i64: 2, 2>, scalar_prefetch = 0 : i64, scratch_operands = 2 : i64, tpu.core_type = #tpu.core_type<tc>, window_params = [{transform_indices = @transform_0, window_bounds = array<i64: 1, 1, 3, 640>}, {pipeline_mode = #tpu.pipeline_mode<synchronous>, transform_indices = @transform_1, window_bounds = array<i64: 1, 384>}, {transform_indices = @transform_2, window_bounds = array<i64: 1, 32, 27>}, {transform_indices = @transform_3, window_bounds = array<i64: 1, 32, 1>}, {transform_indices = @transform_4, window_bounds = array<i64: 1, 32, 288>}, {transform_indices = @transform_5, window_bounds = array<i64: 1, 32, 1>}, {transform_indices = @transform_6, window_bounds = array<i64: 1, 32, 288>}, {transform_indices = @transform_7, window_bounds = array<i64: 1, 32, 1>}, {transform_indices = @transform_8, window_bounds = array<i64: 1, 6, 288>}, {transform_indices = @transform_9, window_bounds = array<i64: 1, 6, 1>}, {transform_indices = @transform_10, window_bounds = array<i64: 1, 1, 6, 384>}]} {
    %c0 = arith.constant 0 : index
    %c0_0 = arith.constant 0 : index
    %0 = vector.load %arg3[%c0, %c0_0] : memref<1x384xf32, #tpu.memory_space<vmem>>, vector<1x384xf32>
    %cst = arith.constant 0.000000e+00 : bf16
    %1 = vector.broadcast %cst : bf16 to vector<32x128xbf16>
    %c0_1 = arith.constant 0 : index
    %c0_2 = arith.constant 0 : index
    %2 = vector.load %arg13[%c0_1, %c0_2] : memref<32x640xbf16, #tpu.memory_space<vmem>>, vector<32x128xbf16>
    tpu.vector_store %arg13[%c0_1, %c0_2], %1 {strides = array<i32>} : memref<32x640xbf16, #tpu.memory_space<vmem>>, vector<32x128xbf16>,
    %cst_3 = arith.constant 0.000000e+00 : bf16
    %3 = vector.broadcast %cst_3 : bf16 to vector<32x128xbf16>
    %c0_4 = arith.constant 0 : index
    %c512 = arith.constant 512 : index
    %4 = vector.load %arg13[%c0_4, %c512] : memref<32x640xbf16, #tpu.memory_space<vmem>>, vector<32x128xbf16>
    tpu.vector_store %arg13[%c0_4, %c512], %3 {strides = array<i32>} : memref<32x640xbf16, #tpu.memory_space<vmem>>, vector<32x128xbf16>,
    %cst_5 = arith.constant 0.000000e+00 : bf16
    %5 = vector.broadcast %cst_5 : bf16 to vector<32x128xbf16>
    %c0_6 = arith.constant 0 : index
    %c0_7 = arith.constant 0 : index
    %6 = vector.load %arg14[%c0_6, %c0_7] : memref<32x640xbf16, #tpu.memory_space<vmem>>, vector<32x128xbf16>
    tpu.vector_store %arg14[%c0_6, %c0_7], %5 {strides = array<i32>} : memref<32x640xbf16, #tpu.memory_space<vmem>>, vector<32x128xbf16>,
    %cst_8 = arith.constant 0.000000e+00 : bf16
    %7 = vector.broadcast %cst_8 : bf16 to vector<32x128xbf16>
    %c0_9 = arith.constant 0 : index
    %c512_10 = arith.constant 512 : index
    %8 = vector.load %arg14[%c0_9, %c512_10] : memref<32x640xbf16, #tpu.memory_space<vmem>>, vector<32x128xbf16>
    tpu.vector_store %arg14[%c0_9, %c512_10], %7 {strides = array<i32>} : memref<32x640xbf16, #tpu.memory_space<vmem>>, vector<32x128xbf16>,
    %c0_11 = arith.constant 0 : index
    %c0_12 = arith.constant 0 : index
    %c0_13 = arith.constant 0 : index
    %c109 = arith.constant 109 : index
    %9 = vector.load %arg2[%c0_11, %c0_12, %c0_13, %c109] : memref<1x1x3x640xbf16, #tpu.memory_space<vmem>>, vector<1x1x3x384xbf16>
    %10 = vector.shape_cast %9 : vector<1x1x3x384xbf16> to vector<3x384xbf16>
    %c0_14 = arith.constant 0 : index
    %c0_15 = arith.constant 0 : index
    %c0_16 = arith.constant 0 : index
    %c110 = arith.constant 110 : index
    %11 = vector.load %arg2[%c0_14, %c0_15, %c0_16, %c110] : memref<1x1x3x640xbf16, #tpu.memory_space<vmem>>, vector<1x1x3x384xbf16>
    %12 = vector.shape_cast %11 : vector<1x1x3x384xbf16> to vector<3x384xbf16>
    %c0_17 = arith.constant 0 : index
    %c0_18 = arith.constant 0 : index
    %c0_19 = arith.constant 0 : index
    %c111 = arith.constant 111 : index
    %13 = vector.load %arg2[%c0_17, %c0_18, %c0_19, %c111] : memref<1x1x3x640xbf16, #tpu.memory_space<vmem>>, vector<1x1x3x384xbf16>
    %14 = vector.shape_cast %13 : vector<1x1x3x384xbf16> to vector<3x384xbf16>
    %c0_20 = arith.constant 0 : index
    %c0_21 = arith.constant 0 : index
    %c0_22 = arith.constant 0 : index
    %c127 = arith.constant 127 : index
    %15 = vector.load %arg2[%c0_20, %c0_21, %c0_22, %c127] : memref<1x1x3x640xbf16, #tpu.memory_space<vmem>>, vector<1x1x3x384xbf16>
    %16 = vector.shape_cast %15 : vector<1x1x3x384xbf16> to vector<3x384xbf16>
    %c0_23 = arith.constant 0 : index
    %c0_24 = arith.constant 0 : index
    %c0_25 = arith.constant 0 : index
    %c128 = arith.constant 128 : index
    %17 = vector.load %arg2[%c0_23, %c0_24, %c0_25, %c128] : memref<1x1x3x640xbf16, #tpu.memory_space<vmem>>, vector<1x1x3x384xbf16>
    %18 = vector.shape_cast %17 : vector<1x1x3x384xbf16> to vector<3x384xbf16>
    %c0_26 = arith.constant 0 : index
    %c0_27 = arith.constant 0 : index
    %c0_28 = arith.constant 0 : index
    %c129 = arith.constant 129 : index
    %19 = vector.load %arg2[%c0_26, %c0_27, %c0_28, %c129] : memref<1x1x3x640xbf16, #tpu.memory_space<vmem>>, vector<1x1x3x384xbf16>
    %20 = vector.shape_cast %19 : vector<1x1x3x384xbf16> to vector<3x384xbf16>
    %c0_29 = arith.constant 0 : index
    %c0_30 = arith.constant 0 : index
    %c0_31 = arith.constant 0 : index
    %c145 = arith.constant 145 : index
    %21 = vector.load %arg2[%c0_29, %c0_30, %c0_31, %c145] : memref<1x1x3x640xbf16, #tpu.memory_space<vmem>>, vector<1x1x3x384xbf16>
    %22 = vector.shape_cast %21 : vector<1x1x3x384xbf16> to vector<3x384xbf16>
    %c0_32 = arith.constant 0 : index
    %c0_33 = arith.constant 0 : index
    %c0_34 = arith.constant 0 : index
    %c146 = arith.constant 146 : index
    %23 = vector.load %arg2[%c0_32, %c0_33, %c0_34, %c146] : memref<1x1x3x640xbf16, #tpu.memory_space<vmem>>, vector<1x1x3x384xbf16>
    %24 = vector.shape_cast %23 : vector<1x1x3x384xbf16> to vector<3x384xbf16>
    %c0_35 = arith.constant 0 : index
    %c0_36 = arith.constant 0 : index
    %c0_37 = arith.constant 0 : index
    %c147 = arith.constant 147 : index
    %25 = vector.load %arg2[%c0_35, %c0_36, %c0_37, %c147] : memref<1x1x3x640xbf16, #tpu.memory_space<vmem>>, vector<1x1x3x384xbf16>
    %26 = vector.shape_cast %25 : vector<1x1x3x384xbf16> to vector<3x384xbf16>
    %27 = tpu.concatenate %10, %12, %14, %16, %18, %20, %22, %24, %26 in 0 : vector<3x384xbf16>, vector<3x384xbf16>, vector<3x384xbf16>, vector<3x384xbf16>, vector<3x384xbf16>, vector<3x384xbf16>, vector<3x384xbf16>, vector<3x384xbf16>, vector<3x384xbf16> -> vector<27x384xbf16>
    %c0_38 = arith.constant 0 : index
    %c0_39 = arith.constant 0 : index
    %c0_40 = arith.constant 0 : index
    %28 = vector.load %arg4[%c0_38, %c0_39, %c0_40] : memref<1x32x27xbf16, #tpu.memory_space<vmem>>, vector<1x32x27xbf16>
    %29 = vector.shape_cast %28 : vector<1x32x27xbf16> to vector<32x27xbf16>
    %cst_41 = arith.constant dense<0.000000e+00> : vector<32x384xf32>
    %30 = tpu.matmul %29, %27, %cst_41 {dimension_numbers = #tpu.dot_dimension_numbers<[1], [0], [0], [1], [0, 0, 1, 1], [], []>} : vector<32x27xbf16>, vector<27x384xbf16>, vector<32x384xf32> -> vector<32x384xf32>
    %c0_42 = arith.constant 0 : index
    %c0_43 = arith.constant 0 : index
    %c0_44 = arith.constant 0 : index
    %31 = vector.load %arg5[%c0_42, %c0_43, %c0_44] : memref<1x32x1xf32, #tpu.memory_space<vmem>>, vector<1x32x1xf32>
    %32 = vector.shape_cast %31 : vector<1x32x1xf32> to vector<32x1xf32>
    %33 = vector.broadcast %32 : vector<32x1xf32> to vector<32x384xf32>
    %34 = arith.addf %30, %33 : vector<32x384xf32>
    %cst_45 = arith.constant 0.000000e+00 : f32
    %35 = vector.broadcast %cst_45 : f32 to vector<32x384xf32>
    %36 = arith.maximumf %34, %35 : vector<32x384xf32>
    %37 = vector.broadcast %0 : vector<1x384xf32> to vector<32x384xf32>
    %38 = arith.mulf %36, %37 : vector<32x384xf32>
    %39 = arith.truncf %38 : vector<32x384xf32> to vector<32x384xbf16>
    %c0_46 = arith.constant 0 : index
    %c128_47 = arith.constant 128 : index
    %40 = vector.load %arg13[%c0_46, %c128_47] : memref<32x640xbf16, #tpu.memory_space<vmem>>, vector<32x384xbf16>
    tpu.vector_store %arg13[%c0_46, %c128_47], %39 {strides = array<i32>} : memref<32x640xbf16, #tpu.memory_space<vmem>>, vector<32x384xbf16>,
    %cst_48 = arith.constant 0.000000e+00 : f32
    %41 = vector.broadcast %cst_48 : f32 to vector<32x384xf32>
    %c0_49 = arith.constant 0 : index
    %c0_50 = arith.constant 0 : index
    %c0_51 = arith.constant 0 : index
    %42 = vector.load %arg6[%c0_49, %c0_50, %c0_51] : memref<1x32x288xbf16, #tpu.memory_space<vmem>>, vector<1x32x32xbf16>
    %43 = vector.shape_cast %42 : vector<1x32x32xbf16> to vector<32x32xbf16>
    %c0_52 = arith.constant 0 : index
    %c109_53 = arith.constant 109 : index
    %44 = vector.load %arg13[%c0_52, %c109_53] : memref<32x640xbf16, #tpu.memory_space<vmem>>, vector<32x384xbf16>
    %cst_54 = arith.constant dense<0.000000e+00> : vector<32x384xf32>
    %45 = tpu.matmul %43, %44, %cst_54 {dimension_numbers = #tpu.dot_dimension_numbers<[1], [0], [0], [1], [0, 0, 1, 1], [], []>} : vector<32x32xbf16>, vector<32x384xbf16>, vector<32x384xf32> -> vector<32x384xf32>
    %46 = arith.addf %41, %45 : vector<32x384xf32>
    %c0_55 = arith.constant 0 : index
    %c0_56 = arith.constant 0 : index
    %c32 = arith.constant 32 : index
    %47 = vector.load %arg6[%c0_55, %c0_56, %c32] : memref<1x32x288xbf16, #tpu.memory_space<vmem>>, vector<1x32x32xbf16>
    %48 = vector.shape_cast %47 : vector<1x32x32xbf16> to vector<32x32xbf16>
    %c0_57 = arith.constant 0 : index
    %c110_58 = arith.constant 110 : index
    %49 = vector.load %arg13[%c0_57, %c110_58] : memref<32x640xbf16, #tpu.memory_space<vmem>>, vector<32x384xbf16>
    %cst_59 = arith.constant dense<0.000000e+00> : vector<32x384xf32>
    %50 = tpu.matmul %48, %49, %cst_59 {dimension_numbers = #tpu.dot_dimension_numbers<[1], [0], [0], [1], [0, 0, 1, 1], [], []>} : vector<32x32xbf16>, vector<32x384xbf16>, vector<32x384xf32> -> vector<32x384xf32>
    %51 = arith.addf %46, %50 : vector<32x384xf32>
    %c0_60 = arith.constant 0 : index
    %c0_61 = arith.constant 0 : index
    %c64 = arith.constant 64 : index
    %52 = vector.load %arg6[%c0_60, %c0_61, %c64] : memref<1x32x288xbf16, #tpu.memory_space<vmem>>, vector<1x32x32xbf16>
    %53 = vector.shape_cast %52 : vector<1x32x32xbf16> to vector<32x32xbf16>
    %c0_62 = arith.constant 0 : index
    %c111_63 = arith.constant 111 : index
    %54 = vector.load %arg13[%c0_62, %c111_63] : memref<32x640xbf16, #tpu.memory_space<vmem>>, vector<32x384xbf16>
    %cst_64 = arith.constant dense<0.000000e+00> : vector<32x384xf32>
    %55 = tpu.matmul %53, %54, %cst_64 {dimension_numbers = #tpu.dot_dimension_numbers<[1], [0], [0], [1], [0, 0, 1, 1], [], []>} : vector<32x32xbf16>, vector<32x384xbf16>, vector<32x384xf32> -> vector<32x384xf32>
    %56 = arith.addf %51, %55 : vector<32x384xf32>
    %c0_65 = arith.constant 0 : index
    %c0_66 = arith.constant 0 : index
    %c96 = arith.constant 96 : index
    %57 = vector.load %arg6[%c0_65, %c0_66, %c96] : memref<1x32x288xbf16, #tpu.memory_space<vmem>>, vector<1x32x32xbf16>
    %58 = vector.shape_cast %57 : vector<1x32x32xbf16> to vector<32x32xbf16>
    %c0_67 = arith.constant 0 : index
    %c127_68 = arith.constant 127 : index
    %59 = vector.load %arg13[%c0_67, %c127_68] : memref<32x640xbf16, #tpu.memory_space<vmem>>, vector<32x384xbf16>
    %cst_69 = arith.constant dense<0.000000e+00> : vector<32x384xf32>
    %60 = tpu.matmul %58, %59, %cst_69 {dimension_numbers = #tpu.dot_dimension_numbers<[1], [0], [0], [1], [0, 0, 1, 1], [], []>} : vector<32x32xbf16>, vector<32x384xbf16>, vector<32x384xf32> -> vector<32x384xf32>
    %61 = arith.addf %56, %60 : vector<32x384xf32>
    %c0_70 = arith.constant 0 : index
    %c0_71 = arith.constant 0 : index
    %c128_72 = arith.constant 128 : index
    %62 = vector.load %arg6[%c0_70, %c0_71, %c128_72] : memref<1x32x288xbf16, #tpu.memory_space<vmem>>, vector<1x32x32xbf16>
    %63 = vector.shape_cast %62 : vector<1x32x32xbf16> to vector<32x32xbf16>
    %c0_73 = arith.constant 0 : index
    %c128_74 = arith.constant 128 : index
    %64 = vector.load %arg13[%c0_73, %c128_74] : memref<32x640xbf16, #tpu.memory_space<vmem>>, vector<32x384xbf16>
    %cst_75 = arith.constant dense<0.000000e+00> : vector<32x384xf32>
    %65 = tpu.matmul %63, %64, %cst_75 {dimension_numbers = #tpu.dot_dimension_numbers<[1], [0], [0], [1], [0, 0, 1, 1], [], []>} : vector<32x32xbf16>, vector<32x384xbf16>, vector<32x384xf32> -> vector<32x384xf32>
    %66 = arith.addf %61, %65 : vector<32x384xf32>
    %c0_76 = arith.constant 0 : index
    %c0_77 = arith.constant 0 : index
    %c160 = arith.constant 160 : index
    %67 = vector.load %arg6[%c0_76, %c0_77, %c160] : memref<1x32x288xbf16, #tpu.memory_space<vmem>>, vector<1x32x32xbf16>
    %68 = vector.shape_cast %67 : vector<1x32x32xbf16> to vector<32x32xbf16>
    %c0_78 = arith.constant 0 : index
    %c129_79 = arith.constant 129 : index
    %69 = vector.load %arg13[%c0_78, %c129_79] : memref<32x640xbf16, #tpu.memory_space<vmem>>, vector<32x384xbf16>
    %cst_80 = arith.constant dense<0.000000e+00> : vector<32x384xf32>
    %70 = tpu.matmul %68, %69, %cst_80 {dimension_numbers = #tpu.dot_dimension_numbers<[1], [0], [0], [1], [0, 0, 1, 1], [], []>} : vector<32x32xbf16>, vector<32x384xbf16>, vector<32x384xf32> -> vector<32x384xf32>
    %71 = arith.addf %66, %70 : vector<32x384xf32>
    %c0_81 = arith.constant 0 : index
    %c0_82 = arith.constant 0 : index
    %c192 = arith.constant 192 : index
    %72 = vector.load %arg6[%c0_81, %c0_82, %c192] : memref<1x32x288xbf16, #tpu.memory_space<vmem>>, vector<1x32x32xbf16>
    %73 = vector.shape_cast %72 : vector<1x32x32xbf16> to vector<32x32xbf16>
    %c0_83 = arith.constant 0 : index
    %c145_84 = arith.constant 145 : index
    %74 = vector.load %arg13[%c0_83, %c145_84] : memref<32x640xbf16, #tpu.memory_space<vmem>>, vector<32x384xbf16>
    %cst_85 = arith.constant dense<0.000000e+00> : vector<32x384xf32>
    %75 = tpu.matmul %73, %74, %cst_85 {dimension_numbers = #tpu.dot_dimension_numbers<[1], [0], [0], [1], [0, 0, 1, 1], [], []>} : vector<32x32xbf16>, vector<32x384xbf16>, vector<32x384xf32> -> vector<32x384xf32>
    %76 = arith.addf %71, %75 : vector<32x384xf32>
    %c0_86 = arith.constant 0 : index
    %c0_87 = arith.constant 0 : index
    %c224 = arith.constant 224 : index
    %77 = vector.load %arg6[%c0_86, %c0_87, %c224] : memref<1x32x288xbf16, #tpu.memory_space<vmem>>, vector<1x32x32xbf16>
    %78 = vector.shape_cast %77 : vector<1x32x32xbf16> to vector<32x32xbf16>
    %c0_88 = arith.constant 0 : index
    %c146_89 = arith.constant 146 : index
    %79 = vector.load %arg13[%c0_88, %c146_89] : memref<32x640xbf16, #tpu.memory_space<vmem>>, vector<32x384xbf16>
    %cst_90 = arith.constant dense<0.000000e+00> : vector<32x384xf32>
    %80 = tpu.matmul %78, %79, %cst_90 {dimension_numbers = #tpu.dot_dimension_numbers<[1], [0], [0], [1], [0, 0, 1, 1], [], []>} : vector<32x32xbf16>, vector<32x384xbf16>, vector<32x384xf32> -> vector<32x384xf32>
    %81 = arith.addf %76, %80 : vector<32x384xf32>
    %c0_91 = arith.constant 0 : index
    %c0_92 = arith.constant 0 : index
    %c256 = arith.constant 256 : index
    %82 = vector.load %arg6[%c0_91, %c0_92, %c256] : memref<1x32x288xbf16, #tpu.memory_space<vmem>>, vector<1x32x32xbf16>
    %83 = vector.shape_cast %82 : vector<1x32x32xbf16> to vector<32x32xbf16>
    %c0_93 = arith.constant 0 : index
    %c147_94 = arith.constant 147 : index
    %84 = vector.load %arg13[%c0_93, %c147_94] : memref<32x640xbf16, #tpu.memory_space<vmem>>, vector<32x384xbf16>
    %cst_95 = arith.constant dense<0.000000e+00> : vector<32x384xf32>
    %85 = tpu.matmul %83, %84, %cst_95 {dimension_numbers = #tpu.dot_dimension_numbers<[1], [0], [0], [1], [0, 0, 1, 1], [], []>} : vector<32x32xbf16>, vector<32x384xbf16>, vector<32x384xf32> -> vector<32x384xf32>
    %86 = arith.addf %81, %85 : vector<32x384xf32>
    %c0_96 = arith.constant 0 : index
    %c0_97 = arith.constant 0 : index
    %c0_98 = arith.constant 0 : index
    %87 = vector.load %arg7[%c0_96, %c0_97, %c0_98] : memref<1x32x1xf32, #tpu.memory_space<vmem>>, vector<1x32x1xf32>
    %88 = vector.shape_cast %87 : vector<1x32x1xf32> to vector<32x1xf32>
    %89 = vector.broadcast %88 : vector<32x1xf32> to vector<32x384xf32>
    %90 = arith.addf %86, %89 : vector<32x384xf32>
    %cst_99 = arith.constant 0.000000e+00 : f32
    %91 = vector.broadcast %cst_99 : f32 to vector<32x384xf32>
    %92 = arith.maximumf %90, %91 : vector<32x384xf32>
    %93 = vector.broadcast %0 : vector<1x384xf32> to vector<32x384xf32>
    %94 = arith.mulf %92, %93 : vector<32x384xf32>
    %95 = arith.truncf %94 : vector<32x384xf32> to vector<32x384xbf16>
    %c0_100 = arith.constant 0 : index
    %c128_101 = arith.constant 128 : index
    %96 = vector.load %arg14[%c0_100, %c128_101] : memref<32x640xbf16, #tpu.memory_space<vmem>>, vector<32x384xbf16>
    tpu.vector_store %arg14[%c0_100, %c128_101], %95 {strides = array<i32>} : memref<32x640xbf16, #tpu.memory_space<vmem>>, vector<32x384xbf16>,
    %cst_102 = arith.constant 0.000000e+00 : f32
    %97 = vector.broadcast %cst_102 : f32 to vector<32x384xf32>
    %c0_103 = arith.constant 0 : index
    %c0_104 = arith.constant 0 : index
    %c0_105 = arith.constant 0 : index
    %98 = vector.load %arg8[%c0_103, %c0_104, %c0_105] : memref<1x32x288xbf16, #tpu.memory_space<vmem>>, vector<1x32x32xbf16>
    %99 = vector.shape_cast %98 : vector<1x32x32xbf16> to vector<32x32xbf16>
    %c0_106 = arith.constant 0 : index
    %c109_107 = arith.constant 109 : index
    %100 = vector.load %arg14[%c0_106, %c109_107] : memref<32x640xbf16, #tpu.memory_space<vmem>>, vector<32x384xbf16>
    %cst_108 = arith.constant dense<0.000000e+00> : vector<32x384xf32>
    %101 = tpu.matmul %99, %100, %cst_108 {dimension_numbers = #tpu.dot_dimension_numbers<[1], [0], [0], [1], [0, 0, 1, 1], [], []>} : vector<32x32xbf16>, vector<32x384xbf16>, vector<32x384xf32> -> vector<32x384xf32>
    %102 = arith.addf %97, %101 : vector<32x384xf32>
    %c0_109 = arith.constant 0 : index
    %c0_110 = arith.constant 0 : index
    %c32_111 = arith.constant 32 : index
    %103 = vector.load %arg8[%c0_109, %c0_110, %c32_111] : memref<1x32x288xbf16, #tpu.memory_space<vmem>>, vector<1x32x32xbf16>
    %104 = vector.shape_cast %103 : vector<1x32x32xbf16> to vector<32x32xbf16>
    %c0_112 = arith.constant 0 : index
    %c110_113 = arith.constant 110 : index
    %105 = vector.load %arg14[%c0_112, %c110_113] : memref<32x640xbf16, #tpu.memory_space<vmem>>, vector<32x384xbf16>
    %cst_114 = arith.constant dense<0.000000e+00> : vector<32x384xf32>
    %106 = tpu.matmul %104, %105, %cst_114 {dimension_numbers = #tpu.dot_dimension_numbers<[1], [0], [0], [1], [0, 0, 1, 1], [], []>} : vector<32x32xbf16>, vector<32x384xbf16>, vector<32x384xf32> -> vector<32x384xf32>
    %107 = arith.addf %102, %106 : vector<32x384xf32>
    %c0_115 = arith.constant 0 : index
    %c0_116 = arith.constant 0 : index
    %c64_117 = arith.constant 64 : index
    %108 = vector.load %arg8[%c0_115, %c0_116, %c64_117] : memref<1x32x288xbf16, #tpu.memory_space<vmem>>, vector<1x32x32xbf16>
    %109 = vector.shape_cast %108 : vector<1x32x32xbf16> to vector<32x32xbf16>
    %c0_118 = arith.constant 0 : index
    %c111_119 = arith.constant 111 : index
    %110 = vector.load %arg14[%c0_118, %c111_119] : memref<32x640xbf16, #tpu.memory_space<vmem>>, vector<32x384xbf16>
    %cst_120 = arith.constant dense<0.000000e+00> : vector<32x384xf32>
    %111 = tpu.matmul %109, %110, %cst_120 {dimension_numbers = #tpu.dot_dimension_numbers<[1], [0], [0], [1], [0, 0, 1, 1], [], []>} : vector<32x32xbf16>, vector<32x384xbf16>, vector<32x384xf32> -> vector<32x384xf32>
    %112 = arith.addf %107, %111 : vector<32x384xf32>
    %c0_121 = arith.constant 0 : index
    %c0_122 = arith.constant 0 : index
    %c96_123 = arith.constant 96 : index
    %113 = vector.load %arg8[%c0_121, %c0_122, %c96_123] : memref<1x32x288xbf16, #tpu.memory_space<vmem>>, vector<1x32x32xbf16>
    %114 = vector.shape_cast %113 : vector<1x32x32xbf16> to vector<32x32xbf16>
    %c0_124 = arith.constant 0 : index
    %c127_125 = arith.constant 127 : index
    %115 = vector.load %arg14[%c0_124, %c127_125] : memref<32x640xbf16, #tpu.memory_space<vmem>>, vector<32x384xbf16>
    %cst_126 = arith.constant dense<0.000000e+00> : vector<32x384xf32>
    %116 = tpu.matmul %114, %115, %cst_126 {dimension_numbers = #tpu.dot_dimension_numbers<[1], [0], [0], [1], [0, 0, 1, 1], [], []>} : vector<32x32xbf16>, vector<32x384xbf16>, vector<32x384xf32> -> vector<32x384xf32>
    %117 = arith.addf %112, %116 : vector<32x384xf32>
    %c0_127 = arith.constant 0 : index
    %c0_128 = arith.constant 0 : index
    %c128_129 = arith.constant 128 : index
    %118 = vector.load %arg8[%c0_127, %c0_128, %c128_129] : memref<1x32x288xbf16, #tpu.memory_space<vmem>>, vector<1x32x32xbf16>
    %119 = vector.shape_cast %118 : vector<1x32x32xbf16> to vector<32x32xbf16>
    %c0_130 = arith.constant 0 : index
    %c128_131 = arith.constant 128 : index
    %120 = vector.load %arg14[%c0_130, %c128_131] : memref<32x640xbf16, #tpu.memory_space<vmem>>, vector<32x384xbf16>
    %cst_132 = arith.constant dense<0.000000e+00> : vector<32x384xf32>
    %121 = tpu.matmul %119, %120, %cst_132 {dimension_numbers = #tpu.dot_dimension_numbers<[1], [0], [0], [1], [0, 0, 1, 1], [], []>} : vector<32x32xbf16>, vector<32x384xbf16>, vector<32x384xf32> -> vector<32x384xf32>
    %122 = arith.addf %117, %121 : vector<32x384xf32>
    %c0_133 = arith.constant 0 : index
    %c0_134 = arith.constant 0 : index
    %c160_135 = arith.constant 160 : index
    %123 = vector.load %arg8[%c0_133, %c0_134, %c160_135] : memref<1x32x288xbf16, #tpu.memory_space<vmem>>, vector<1x32x32xbf16>
    %124 = vector.shape_cast %123 : vector<1x32x32xbf16> to vector<32x32xbf16>
    %c0_136 = arith.constant 0 : index
    %c129_137 = arith.constant 129 : index
    %125 = vector.load %arg14[%c0_136, %c129_137] : memref<32x640xbf16, #tpu.memory_space<vmem>>, vector<32x384xbf16>
    %cst_138 = arith.constant dense<0.000000e+00> : vector<32x384xf32>
    %126 = tpu.matmul %124, %125, %cst_138 {dimension_numbers = #tpu.dot_dimension_numbers<[1], [0], [0], [1], [0, 0, 1, 1], [], []>} : vector<32x32xbf16>, vector<32x384xbf16>, vector<32x384xf32> -> vector<32x384xf32>
    %127 = arith.addf %122, %126 : vector<32x384xf32>
    %c0_139 = arith.constant 0 : index
    %c0_140 = arith.constant 0 : index
    %c192_141 = arith.constant 192 : index
    %128 = vector.load %arg8[%c0_139, %c0_140, %c192_141] : memref<1x32x288xbf16, #tpu.memory_space<vmem>>, vector<1x32x32xbf16>
    %129 = vector.shape_cast %128 : vector<1x32x32xbf16> to vector<32x32xbf16>
    %c0_142 = arith.constant 0 : index
    %c145_143 = arith.constant 145 : index
    %130 = vector.load %arg14[%c0_142, %c145_143] : memref<32x640xbf16, #tpu.memory_space<vmem>>, vector<32x384xbf16>
    %cst_144 = arith.constant dense<0.000000e+00> : vector<32x384xf32>
    %131 = tpu.matmul %129, %130, %cst_144 {dimension_numbers = #tpu.dot_dimension_numbers<[1], [0], [0], [1], [0, 0, 1, 1], [], []>} : vector<32x32xbf16>, vector<32x384xbf16>, vector<32x384xf32> -> vector<32x384xf32>
    %132 = arith.addf %127, %131 : vector<32x384xf32>
    %c0_145 = arith.constant 0 : index
    %c0_146 = arith.constant 0 : index
    %c224_147 = arith.constant 224 : index
    %133 = vector.load %arg8[%c0_145, %c0_146, %c224_147] : memref<1x32x288xbf16, #tpu.memory_space<vmem>>, vector<1x32x32xbf16>
    %134 = vector.shape_cast %133 : vector<1x32x32xbf16> to vector<32x32xbf16>
    %c0_148 = arith.constant 0 : index
    %c146_149 = arith.constant 146 : index
    %135 = vector.load %arg14[%c0_148, %c146_149] : memref<32x640xbf16, #tpu.memory_space<vmem>>, vector<32x384xbf16>
    %cst_150 = arith.constant dense<0.000000e+00> : vector<32x384xf32>
    %136 = tpu.matmul %134, %135, %cst_150 {dimension_numbers = #tpu.dot_dimension_numbers<[1], [0], [0], [1], [0, 0, 1, 1], [], []>} : vector<32x32xbf16>, vector<32x384xbf16>, vector<32x384xf32> -> vector<32x384xf32>
    %137 = arith.addf %132, %136 : vector<32x384xf32>
    %c0_151 = arith.constant 0 : index
    %c0_152 = arith.constant 0 : index
    %c256_153 = arith.constant 256 : index
    %138 = vector.load %arg8[%c0_151, %c0_152, %c256_153] : memref<1x32x288xbf16, #tpu.memory_space<vmem>>, vector<1x32x32xbf16>
    %139 = vector.shape_cast %138 : vector<1x32x32xbf16> to vector<32x32xbf16>
    %c0_154 = arith.constant 0 : index
    %c147_155 = arith.constant 147 : index
    %140 = vector.load %arg14[%c0_154, %c147_155] : memref<32x640xbf16, #tpu.memory_space<vmem>>, vector<32x384xbf16>
    %cst_156 = arith.constant dense<0.000000e+00> : vector<32x384xf32>
    %141 = tpu.matmul %139, %140, %cst_156 {dimension_numbers = #tpu.dot_dimension_numbers<[1], [0], [0], [1], [0, 0, 1, 1], [], []>} : vector<32x32xbf16>, vector<32x384xbf16>, vector<32x384xf32> -> vector<32x384xf32>
    %142 = arith.addf %137, %141 : vector<32x384xf32>
    %c0_157 = arith.constant 0 : index
    %c0_158 = arith.constant 0 : index
    %c0_159 = arith.constant 0 : index
    %143 = vector.load %arg9[%c0_157, %c0_158, %c0_159] : memref<1x32x1xf32, #tpu.memory_space<vmem>>, vector<1x32x1xf32>
    %144 = vector.shape_cast %143 : vector<1x32x1xf32> to vector<32x1xf32>
    %145 = vector.broadcast %144 : vector<32x1xf32> to vector<32x384xf32>
    %146 = arith.addf %142, %145 : vector<32x384xf32>
    %147 = arith.addf %146, %38 : vector<32x384xf32>
    %cst_160 = arith.constant 0.000000e+00 : f32
    %148 = vector.broadcast %cst_160 : f32 to vector<32x384xf32>
    %149 = arith.maximumf %147, %148 : vector<32x384xf32>
    %150 = vector.broadcast %0 : vector<1x384xf32> to vector<32x384xf32>
    %151 = arith.mulf %149, %150 : vector<32x384xf32>
    %152 = arith.truncf %151 : vector<32x384xf32> to vector<32x384xbf16>
    %c0_161 = arith.constant 0 : index
    %c128_162 = arith.constant 128 : index
    %153 = vector.load %arg14[%c0_161, %c128_162] : memref<32x640xbf16, #tpu.memory_space<vmem>>, vector<32x384xbf16>
    tpu.vector_store %arg14[%c0_161, %c128_162], %152 {strides = array<i32>} : memref<32x640xbf16, #tpu.memory_space<vmem>>, vector<32x384xbf16>,
    %cst_163 = arith.constant 0.000000e+00 : f32
    %154 = vector.broadcast %cst_163 : f32 to vector<6x384xf32>
    %c0_164 = arith.constant 0 : index
    %c0_165 = arith.constant 0 : index
    %c0_166 = arith.constant 0 : index
    %155 = vector.load %arg10[%c0_164, %c0_165, %c0_166] : memref<1x6x288xbf16, #tpu.memory_space<vmem>>, vector<1x6x32xbf16>
    %156 = vector.shape_cast %155 : vector<1x6x32xbf16> to vector<6x32xbf16>
    %c0_167 = arith.constant 0 : index
    %c109_168 = arith.constant 109 : index
    %157 = vector.load %arg14[%c0_167, %c109_168] : memref<32x640xbf16, #tpu.memory_space<vmem>>, vector<32x384xbf16>
    %cst_169 = arith.constant dense<0.000000e+00> : vector<6x384xf32>
    %158 = tpu.matmul %156, %157, %cst_169 {dimension_numbers = #tpu.dot_dimension_numbers<[1], [0], [0], [1], [0, 0, 1, 1], [], []>} : vector<6x32xbf16>, vector<32x384xbf16>, vector<6x384xf32> -> vector<6x384xf32>
    %159 = arith.addf %154, %158 : vector<6x384xf32>
    %c0_170 = arith.constant 0 : index
    %c0_171 = arith.constant 0 : index
    %c32_172 = arith.constant 32 : index
    %160 = vector.load %arg10[%c0_170, %c0_171, %c32_172] : memref<1x6x288xbf16, #tpu.memory_space<vmem>>, vector<1x6x32xbf16>
    %161 = vector.shape_cast %160 : vector<1x6x32xbf16> to vector<6x32xbf16>
    %c0_173 = arith.constant 0 : index
    %c110_174 = arith.constant 110 : index
    %162 = vector.load %arg14[%c0_173, %c110_174] : memref<32x640xbf16, #tpu.memory_space<vmem>>, vector<32x384xbf16>
    %cst_175 = arith.constant dense<0.000000e+00> : vector<6x384xf32>
    %163 = tpu.matmul %161, %162, %cst_175 {dimension_numbers = #tpu.dot_dimension_numbers<[1], [0], [0], [1], [0, 0, 1, 1], [], []>} : vector<6x32xbf16>, vector<32x384xbf16>, vector<6x384xf32> -> vector<6x384xf32>
    %164 = arith.addf %159, %163 : vector<6x384xf32>
    %c0_176 = arith.constant 0 : index
    %c0_177 = arith.constant 0 : index
    %c64_178 = arith.constant 64 : index
    %165 = vector.load %arg10[%c0_176, %c0_177, %c64_178] : memref<1x6x288xbf16, #tpu.memory_space<vmem>>, vector<1x6x32xbf16>
    %166 = vector.shape_cast %165 : vector<1x6x32xbf16> to vector<6x32xbf16>
    %c0_179 = arith.constant 0 : index
    %c111_180 = arith.constant 111 : index
    %167 = vector.load %arg14[%c0_179, %c111_180] : memref<32x640xbf16, #tpu.memory_space<vmem>>, vector<32x384xbf16>
    %cst_181 = arith.constant dense<0.000000e+00> : vector<6x384xf32>
    %168 = tpu.matmul %166, %167, %cst_181 {dimension_numbers = #tpu.dot_dimension_numbers<[1], [0], [0], [1], [0, 0, 1, 1], [], []>} : vector<6x32xbf16>, vector<32x384xbf16>, vector<6x384xf32> -> vector<6x384xf32>
    %169 = arith.addf %164, %168 : vector<6x384xf32>
    %c0_182 = arith.constant 0 : index
    %c0_183 = arith.constant 0 : index
    %c96_184 = arith.constant 96 : index
    %170 = vector.load %arg10[%c0_182, %c0_183, %c96_184] : memref<1x6x288xbf16, #tpu.memory_space<vmem>>, vector<1x6x32xbf16>
    %171 = vector.shape_cast %170 : vector<1x6x32xbf16> to vector<6x32xbf16>
    %c0_185 = arith.constant 0 : index
    %c127_186 = arith.constant 127 : index
    %172 = vector.load %arg14[%c0_185, %c127_186] : memref<32x640xbf16, #tpu.memory_space<vmem>>, vector<32x384xbf16>
    %cst_187 = arith.constant dense<0.000000e+00> : vector<6x384xf32>
    %173 = tpu.matmul %171, %172, %cst_187 {dimension_numbers = #tpu.dot_dimension_numbers<[1], [0], [0], [1], [0, 0, 1, 1], [], []>} : vector<6x32xbf16>, vector<32x384xbf16>, vector<6x384xf32> -> vector<6x384xf32>
    %174 = arith.addf %169, %173 : vector<6x384xf32>
    %c0_188 = arith.constant 0 : index
    %c0_189 = arith.constant 0 : index
    %c128_190 = arith.constant 128 : index
    %175 = vector.load %arg10[%c0_188, %c0_189, %c128_190] : memref<1x6x288xbf16, #tpu.memory_space<vmem>>, vector<1x6x32xbf16>
    %176 = vector.shape_cast %175 : vector<1x6x32xbf16> to vector<6x32xbf16>
    %c0_191 = arith.constant 0 : index
    %c128_192 = arith.constant 128 : index
    %177 = vector.load %arg14[%c0_191, %c128_192] : memref<32x640xbf16, #tpu.memory_space<vmem>>, vector<32x384xbf16>
    %cst_193 = arith.constant dense<0.000000e+00> : vector<6x384xf32>
    %178 = tpu.matmul %176, %177, %cst_193 {dimension_numbers = #tpu.dot_dimension_numbers<[1], [0], [0], [1], [0, 0, 1, 1], [], []>} : vector<6x32xbf16>, vector<32x384xbf16>, vector<6x384xf32> -> vector<6x384xf32>
    %179 = arith.addf %174, %178 : vector<6x384xf32>
    %c0_194 = arith.constant 0 : index
    %c0_195 = arith.constant 0 : index
    %c160_196 = arith.constant 160 : index
    %180 = vector.load %arg10[%c0_194, %c0_195, %c160_196] : memref<1x6x288xbf16, #tpu.memory_space<vmem>>, vector<1x6x32xbf16>
    %181 = vector.shape_cast %180 : vector<1x6x32xbf16> to vector<6x32xbf16>
    %c0_197 = arith.constant 0 : index
    %c129_198 = arith.constant 129 : index
    %182 = vector.load %arg14[%c0_197, %c129_198] : memref<32x640xbf16, #tpu.memory_space<vmem>>, vector<32x384xbf16>
    %cst_199 = arith.constant dense<0.000000e+00> : vector<6x384xf32>
    %183 = tpu.matmul %181, %182, %cst_199 {dimension_numbers = #tpu.dot_dimension_numbers<[1], [0], [0], [1], [0, 0, 1, 1], [], []>} : vector<6x32xbf16>, vector<32x384xbf16>, vector<6x384xf32> -> vector<6x384xf32>
    %184 = arith.addf %179, %183 : vector<6x384xf32>
    %c0_200 = arith.constant 0 : index
    %c0_201 = arith.constant 0 : index
    %c192_202 = arith.constant 192 : index
    %185 = vector.load %arg10[%c0_200, %c0_201, %c192_202] : memref<1x6x288xbf16, #tpu.memory_space<vmem>>, vector<1x6x32xbf16>
    %186 = vector.shape_cast %185 : vector<1x6x32xbf16> to vector<6x32xbf16>
    %c0_203 = arith.constant 0 : index
    %c145_204 = arith.constant 145 : index
    %187 = vector.load %arg14[%c0_203, %c145_204] : memref<32x640xbf16, #tpu.memory_space<vmem>>, vector<32x384xbf16>
    %cst_205 = arith.constant dense<0.000000e+00> : vector<6x384xf32>
    %188 = tpu.matmul %186, %187, %cst_205 {dimension_numbers = #tpu.dot_dimension_numbers<[1], [0], [0], [1], [0, 0, 1, 1], [], []>} : vector<6x32xbf16>, vector<32x384xbf16>, vector<6x384xf32> -> vector<6x384xf32>
    %189 = arith.addf %184, %188 : vector<6x384xf32>
    %c0_206 = arith.constant 0 : index
    %c0_207 = arith.constant 0 : index
    %c224_208 = arith.constant 224 : index
    %190 = vector.load %arg10[%c0_206, %c0_207, %c224_208] : memref<1x6x288xbf16, #tpu.memory_space<vmem>>, vector<1x6x32xbf16>
    %191 = vector.shape_cast %190 : vector<1x6x32xbf16> to vector<6x32xbf16>
    %c0_209 = arith.constant 0 : index
    %c146_210 = arith.constant 146 : index
    %192 = vector.load %arg14[%c0_209, %c146_210] : memref<32x640xbf16, #tpu.memory_space<vmem>>, vector<32x384xbf16>
    %cst_211 = arith.constant dense<0.000000e+00> : vector<6x384xf32>
    %193 = tpu.matmul %191, %192, %cst_211 {dimension_numbers = #tpu.dot_dimension_numbers<[1], [0], [0], [1], [0, 0, 1, 1], [], []>} : vector<6x32xbf16>, vector<32x384xbf16>, vector<6x384xf32> -> vector<6x384xf32>
    %194 = arith.addf %189, %193 : vector<6x384xf32>
    %c0_212 = arith.constant 0 : index
    %c0_213 = arith.constant 0 : index
    %c256_214 = arith.constant 256 : index
    %195 = vector.load %arg10[%c0_212, %c0_213, %c256_214] : memref<1x6x288xbf16, #tpu.memory_space<vmem>>, vector<1x6x32xbf16>
    %196 = vector.shape_cast %195 : vector<1x6x32xbf16> to vector<6x32xbf16>
    %c0_215 = arith.constant 0 : index
    %c147_216 = arith.constant 147 : index
    %197 = vector.load %arg14[%c0_215, %c147_216] : memref<32x640xbf16, #tpu.memory_space<vmem>>, vector<32x384xbf16>
    %cst_217 = arith.constant dense<0.000000e+00> : vector<6x384xf32>
    %198 = tpu.matmul %196, %197, %cst_217 {dimension_numbers = #tpu.dot_dimension_numbers<[1], [0], [0], [1], [0, 0, 1, 1], [], []>} : vector<6x32xbf16>, vector<32x384xbf16>, vector<6x384xf32> -> vector<6x384xf32>
    %199 = arith.addf %194, %198 : vector<6x384xf32>
    %c0_218 = arith.constant 0 : index
    %c0_219 = arith.constant 0 : index
    %c0_220 = arith.constant 0 : index
    %200 = vector.load %arg11[%c0_218, %c0_219, %c0_220] : memref<1x6x1xf32, #tpu.memory_space<vmem>>, vector<1x6x1xf32>
    %201 = vector.shape_cast %200 : vector<1x6x1xf32> to vector<6x1xf32>
    %202 = vector.broadcast %201 : vector<6x1xf32> to vector<6x384xf32>
    %203 = arith.addf %199, %202 : vector<6x384xf32>
    %204 = math.tanh %203 : vector<6x384xf32>
    %c0_221 = arith.constant 0 : index
    %c0_222 = arith.constant 0 : index
    %c0_223 = arith.constant 0 : index
    %c0_224 = arith.constant 0 : index
    %205 = vector.load %arg12[%c0_221, %c0_222, %c0_223, %c0_224] : memref<1x1x6x384xf32, #tpu.memory_space<vmem>>, vector<1x1x6x384xf32>
    %206 = vector.shape_cast %205 : vector<1x1x6x384xf32> to vector<6x384xf32>
    %207 = vector.shape_cast %204 : vector<6x384xf32> to vector<1x1x6x384xf32>
    tpu.vector_store %arg12[%c0_221, %c0_222, %c0_223, %c0_224], %207 {strides = array<i32>} : memref<1x1x6x384xf32, #tpu.memory_space<vmem>>, vector<1x1x6x384xf32>,
    return
  }
  func.func @transform_0(%arg0: i32, %arg1: i32) -> (i32, i32, i32, i32) {
    %c0_i32 = arith.constant 0 : i32
    %c0_i32_0 = arith.constant 0 : i32
    %c0_i32_1 = arith.constant 0 : i32
    return %arg0, %arg1, %c0_i32, %c0_i32_0 : i32, i32, i32, i32
  }
  func.func @transform_1(%arg0: i32, %arg1: i32) -> (i32, i32) {
    %c0_i32 = arith.constant 0 : i32
    %c0_i32_0 = arith.constant 0 : i32
    %c0_i32_1 = arith.constant 0 : i32
    return %c0_i32, %c0_i32_0 : i32, i32
  }
  func.func @transform_2(%arg0: i32, %arg1: i32) -> (i32, i32, i32) {
    %c0_i32 = arith.constant 0 : i32
    %c0_i32_0 = arith.constant 0 : i32
    %c0_i32_1 = arith.constant 0 : i32
    return %arg0, %c0_i32, %c0_i32_0 : i32, i32, i32
  }
  func.func @transform_3(%arg0: i32, %arg1: i32) -> (i32, i32, i32) {
    %c0_i32 = arith.constant 0 : i32
    %c0_i32_0 = arith.constant 0 : i32
    %c0_i32_1 = arith.constant 0 : i32
    return %arg0, %c0_i32, %c0_i32_0 : i32, i32, i32
  }
  func.func @transform_4(%arg0: i32, %arg1: i32) -> (i32, i32, i32) {
    %c0_i32 = arith.constant 0 : i32
    %c0_i32_0 = arith.constant 0 : i32
    %c0_i32_1 = arith.constant 0 : i32
    return %arg0, %c0_i32, %c0_i32_0 : i32, i32, i32
  }
  func.func @transform_5(%arg0: i32, %arg1: i32) -> (i32, i32, i32) {
    %c0_i32 = arith.constant 0 : i32
    %c0_i32_0 = arith.constant 0 : i32
    %c0_i32_1 = arith.constant 0 : i32
    return %arg0, %c0_i32, %c0_i32_0 : i32, i32, i32
  }
  func.func @transform_6(%arg0: i32, %arg1: i32) -> (i32, i32, i32) {
    %c0_i32 = arith.constant 0 : i32
    %c0_i32_0 = arith.constant 0 : i32
    %c0_i32_1 = arith.constant 0 : i32
    return %arg0, %c0_i32, %c0_i32_0 : i32, i32, i32
  }
  func.func @transform_7(%arg0: i32, %arg1: i32) -> (i32, i32, i32) {
    %c0_i32 = arith.constant 0 : i32
    %c0_i32_0 = arith.constant 0 : i32
    %c0_i32_1 = arith.constant 0 : i32
    return %arg0, %c0_i32, %c0_i32_0 : i32, i32, i32
  }
  func.func @transform_8(%arg0: i32, %arg1: i32) -> (i32, i32, i32) {
    %c0_i32 = arith.constant 0 : i32
    %c0_i32_0 = arith.constant 0 : i32
    %c0_i32_1 = arith.constant 0 : i32
    return %arg0, %c0_i32, %c0_i32_0 : i32, i32, i32
  }
  func.func @transform_9(%arg0: i32, %arg1: i32) -> (i32, i32, i32) {
    %c0_i32 = arith.constant 0 : i32
    %c0_i32_0 = arith.constant 0 : i32
    %c0_i32_1 = arith.constant 0 : i32
    return %arg0, %c0_i32, %c0_i32_0 : i32, i32, i32
  }
  func.func @transform_10(%arg0: i32, %arg1: i32) -> (i32, i32, i32, i32) {
    %c0_i32 = arith.constant 0 : i32
    %c0_i32_0 = arith.constant 0 : i32
    %c0_i32_1 = arith.constant 0 : i32
    return %arg0, %arg1, %c0_i32, %c0_i32_0 : i32, i32, i32, i32
  }
}

</mosaic_0001>

<bundles_post_ra>
// kernel: dgd_cgan_forward_pallas.1
= control target key start
LH: loop header
LB: loop body
LE: loop exit
PB: predicated region body
PF: predicated region fallthrough
CT: control target
= control target key end

     0   :  { %s6596_s13 = smov 0   ;;  %s6598_s14 = smov 0   ;;  %s8535_s0 = inlined_call_operand.vmem [shape: bf16[2,2,3,640], index: 0, kind: input, shape index: {}]   ;;  %s8536_s1 = inlined_call_operand.vmem [shape: f32[1,384], index: 1, kind: input, shape index: {}]   ;;  %s8537_s2 = inlined_call_operand.vmem [shape: bf16[2,32,27], index: 2, kind: input, shape index: {}]   ;;  %s8538_s3 = inlined_call_operand.vmem [shape: f32[2,32,1], index: 3, kind: input, shape index: {}, may-alias: {3,5,7}]   ;;  %s8539_s4 = inlined_call_operand.vmem [shape: bf16[2,32,288], index: 4, kind: input, shape index: {}]   ;;  %s8540_s5 = inlined_call_operand.vmem [shape: f32[2,32,1], index: 5, kind: input, shape index: {}, may-alias: {3,5,7}]   ;;  %s8541_s6 = inlined_call_operand.vmem [shape: bf16[2,32,288], index: 6, kind: input, shape index: {}]   ;;  %s8542_s7 = inlined_call_operand.vmem [shape: f32[2,32,1], index: 7, kind: input, shape index: {}, may-alias: {3,5,7}]   ;;  %s8543_s8 = inlined_call_operand.vmem [shape: bf16[2,6,288], index: 8, kind: input, shape index: {}]   ;;  %s8544_s9 = inlined_call_operand.vmem [shape: f32[2,6,1], index: 9, kind: input, shape index: {}]   ;;  %s8545_s10 = inlined_call_operand.vmem [shape: f32[2,2,6,384], index: 10, kind: output, shape index: {}]  }
   0x1   :  { %s6600_s15 = smov 0   ;;  %s6602_s16 = smov 0  }
   0x2   :  { %s6604_s17 = smov 0  }
   0x3 LB: > { %s29_s18 = sadd.s32 1, %s6510_s15  ;;  %s32_s19 = sadd.s32 1, %s6514_s16  ;;  %s6518_s17 = sphi %s6604_s17, %s20_s17   ;;  %s6514_s16 = sphi %s6602_s16, %s8741_s16   ;;  %s6510_s15 = sphi %s6600_s15, %s8740_s15   ;;  %s6506_s14 = sphi %s6598_s14, %s8739_s14   ;;  %s6502_s13 = sphi %s6596_s13, %s8738_s13  }
   0x4   : > { %p30_p0 = scmp.ge.s32.totalorder %s29_s18, 2  ;;  %p5736_p1 = scmp.ge.s32.totalorder %s6518_s17, 1 }
   0x5   : > { %p411_p2 = scmp.lt.s32.totalorder %s6518_s17, 5 }
   0x6   : > { %s8743_s18 = smov (%p30_p0, %s29_s18), 0  ;;  %s8745_s19 = smov (!%p30_p0, %s32_s19), %s6514_s16 }
   0x7   : > { %p412_p3 = pnand %p5736_p1, %p411_p2  ;;  %p34_p4 = scmp.ge.s32.totalorder %s8745_s19, 2 }
   0x9   : > { %s8747_s19 = smov (%p34_p4, %s8745_s19), 0  ;;  %415 = sbr.rel (%p412_p3) target bundleno = 1960 (0x7a8), region = 60 }
   0xe   : > { %p496_p5 = scmp.lt.s32.totalorder %s6506_s14, 1  ;;  %p498_p6 = scmp.lt.s32.totalorder %s6502_s13, 1  ;;  %v579_v0 = vlaneseq  ;;  %v6520_v1 = vmov 1983009808   ;;  %vm777_vm0 = vcmask 883712   ;;  %vm800_vm1 = vcmask 752640  }
   0xf   : > { %v577_v2 = vunpack.c.l.s4 %v6520_v1  ;;  %s6521_s27 = smov 90   ;;  %s6522_s28 = smov 92   ;;  %vm853_vm2 = vcmask 1042432   ;;  %vm919_vm3 = vsmask.f32 2304  ;;  %vm824_vm4 = vcmask 744448  }
  0x10   : > { %s8749_s14 = smov (!%p496_p5, %s6506_s14), 1  ;;  %s8751_s13 = smov (!%p498_p6, %s6502_s13), 1  ;;  %v6630_v4 = vshrl.u32 %v579_v0, 7  ;;  %vm8547_vm5 = vcmask 736256   ;;  %vm901_vm6 = vcmask 1040384   ;;  %vm8546_vm7 = vcmask 1043456   ;;  %vm6742_vm8 = vmand %vm853_vm2, %vm919_vm3 }
  0x11   : > { %v578_v3 = vunpack.c.0.s8 %v577_v2  ;;  %s6309_s20 = smul.u32 10, %s8749_s14  ;;  %s6523_s29 = smov 108   ;;  %vm8548_vm9 = vcmask 1039360   ;;  %vm846_vm10 = vcmask 1041408   ;;  %vm847_vm11 = vsmask.f32 1280 }
  0x12   : > { %s6308_s21 = smul.u32 5, %s8751_s13  ;;  %s6524_s30 = smov 91   ;;  %vm656_vm12 = vcmask 1031168   ;;  %vm6775_vm13 = vmand %vm846_vm10, %vm847_vm11  ;;  %vm680_vm14 = vcmask 900096   ;;  %vm870_vm15 = vcmask 1044480   ;;  %vm894_vm10 = vcmask 1047552  }
  0x13   : > { %v6635_v5 = vsub.s32 %v578_v3, %v6630_v4  ;;  %s8555_s11 = smov 127   ;;  %s6526_s12 = smov 126   ;;  %vm871_vm3 = vsmask.f32 4352 }
  0x14   : > { %s502_s22 = sadd.s32 %s6309_s20, %s6308_s21  ;;  %s8551_s20 = smov 110   ;;  %vm6824_vm11 = vmand %vm870_vm15, %vm871_vm3  ;;  %vm877_vm3 = vcmask 1045504  }
  0x15   : > { %s5737_s23 = sshll.u32 %s502_s22, 1  ;;  %s6528_s21 = smov 109  }
  0x16   : > { %s6640_s26 = scalar_lea.vmem %s8535_s0, %s5737_s23  ;;  %s8583_s22 = smov 19  }
  0x17   : > { %v573_v6 = vld [vmem:[%s6640_s26 + $0x2] sm:$0xff]  ;;  %s5953_s23 = sshll.u32 %s8749_s14, 4  ;;  %s8581_s24 = smov 1  }
  0x18   : > { %v723_v7 = vrot.slane %v573_v6, %v6635_v5  ;;  %v716_v8 = vcombine.high %v573_v6, %v573_v6  ;;  %v571_v9 = vld [vmem:[%s6640_s26] sm:$0xff] }
  0x19   : > { %v6651_v17 = vrot.slane %v571_v9, %v6635_v5  ;;  %v575_v22 = vcombine.high %v571_v9, %v571_v9  ;;  %v572_v6 = vld [vmem:[%s6640_s26 + $0x2] sm:$0x3f]  ;;  %s6788_s26 = scalar_lea.vmem %s8537_s2, %s5953_s23  ;;  %s8585_s23 = smov 18  }
  0x1a   : > { %836 = vrot.lane.b32.xlu0 %v723_v7, %s6521_s27  ;;  %v788_v10 = vrot.slane %v723_v7, 7  ;;  %v731_v11 = vcombine.high %v723_v7, %v723_v7  ;;  %v734_v12 = vshll.u32 %v723_v7, 16  ;;  %v749_v13 = vshrl.u32 %v723_v7, 16 }
  0x1b   : > { %v6647_v14 = vrot.slane %v716_v8, %v6635_v5  ;;  %v832_v16 = vcombine.low %v723_v7, %v723_v7  ;;  %v6664_v28 = vcombine.high %v6651_v17, %v6651_v17  ;;  %v6669_v31 = vrot.slane %v575_v22, %v6635_v5 }
  0x1c   : > { %792 = vrot.lane.b32.xlu1 %v788_v10, %s6522_s28  ;;  %v789_v15 = vrot.slane %v731_v11, 7  ;;  %v6653_v18 = vrot.slane %v734_v12, 1  ;;  %v738_v19 = vshll.u32 %v731_v11, 16  ;;  %v804_v20 = vrot.slane %v749_v13, 5 }
  0x1d   : > { %v805_v21 = vrot.slane %v734_v12, 6  ;;  %v790_v24 = vrot.slane %v6647_v14, 7  ;;  %v742_v25 = vshll.u32 %v6647_v14, 16  ;;  %v752_v27 = vshrl.u32 %v731_v11, 16 }
  0x1e   : > { %794 = vrot.lane.b32.xlu0 %v789_v15, %s6522_s28  ;;  %v751_v23 = vor.u32 %v749_v13, %v6653_v18  ;;  %v6660_v26 = vrot.slane %v738_v19, 1  ;;  %v755_v30 = vshrl.u32 %v6647_v14, 16  ;;  %v833_v32 = vcombine.low %v6647_v14, %v6647_v14 }
  0x1f   : > { %v806_v29 = vor.u32 %v805_v21, %v804_v20  ;;  %v6674_v33 = vrot.slane %v742_v25, 1  ;;  %v605_v35 = vshrl.u32 %v6664_v28, 16  ;;  %v811_v37 = vrot.slane %v742_v25, 6 }
  0x20   : > { %834 = vrot.lane.b32.xlu1 %v832_v16, %s6521_s27  ;;  %v754_v34 = vor.u32 %v752_v27, %v6660_v26  ;;  %v810_v36 = vrot.slane %v755_v30, 5  ;;  %v608_v38 = vshll.u32 %v6664_v28, 16  ;;  %v6682_v39 = vcombine.high %v6669_v31, %v6669_v31 }
  0x21   : > { %v807_v40 = vrot.slane %v752_v27, 5  ;;  %v808_v41 = vrot.slane %v738_v19, 6  ;;  %v757_v42 = vor.u32 %v755_v30, %v6674_v33  ;;  %v613_v43 = vshrl.u32 %v6669_v31, 16 }
  0x22   : > { %769 = vrot.lane.b32.xlu0 %v751_v23, %s6523_s29  ;;  %v616_v44 = vshll.u32 %v6669_v31, 16  ;;  %v607_v45 = vrot.slane %v605_v35, 6  ;;  %v812_v46 = vor.u32 %v811_v37, %v810_v36  ;;  %v610_v47 = vrot.slane %v608_v38, 7 }
  0x23   : > { %v621_v48 = vshrl.u32 %v6682_v39, 16  ;;  %v624_v49 = vshll.u32 %v6682_v39, 16  ;;  %v809_v50 = vor.u32 %v808_v41, %v807_v40  ;;  %v615_v51 = vrot.slane %v613_v43, 6 }
  0x24   : > { %796 = vrot.lane.b32.xlu1 %v790_v24, %s6522_s28  ;;  %v618_v52 = vrot.slane %v616_v44, 7  ;;  %v597_v53 = vshrl.u32 %v6651_v17, 16  ;;  %v600_v54 = vshll.u32 %v6651_v17, 16  ;;  %v611_v55 = vor.u32 %v610_v47, %v607_v45 }
  0x25   : > { %v623_v56 = vrot.slane %v621_v48, 6  ;;  %v626_v57 = vrot.slane %v624_v49, 7  ;;  %v645_v63 = vrot.slane %v6664_v28, 5  ;;  %v646_v0 = vrot.slane %v6669_v31, 5 }
  0x26   : > { %816 = vrot.lane.b32.xlu0 %v806_v29, %s6524_s30  ;;  %v619_v58 = vor.u32 %v618_v52, %v615_v51  ;;  %v599_v59 = vrot.slane %v597_v53, 6  ;;  %v602_v60 = vrot.slane %v600_v54, 7  ;;  %v647_v1 = vrot.slane %v6682_v39, 5 }
  0x27   : > { %v627_v61 = vor.u32 %v626_v57, %v623_v56  ;;  %v663_v2 = vrot.slane %v605_v35, 3  ;;  %v664_v3 = vrot.slane %v608_v38, 4  ;;  %v644_v7 = vrot.slane %v6651_v17, 5 }
  0x28   : > { %838 = vrot.lane.b32.xlu1 %v833_v32, %s6521_s27  ;;  %v603_v62 = vor.u32 %v602_v60, %v599_v59  ;;  %v666_v8 = vrot.slane %v613_v43, 3  ;;  %v667_v9 = vrot.slane %v616_v44, 4  ;;  %v669_v11 = vrot.slane %v621_v48, 3 }
  0x29   : > { %v665_v10 = vor.u32 %v664_v3, %v663_v2  ;;  %v670_v12 = vrot.slane %v624_v49, 4  ;;  %v689_v13 = vcombine.low %v572_v6, %v572_v6  ;;  %v660_v16 = vrot.slane %v597_v53, 3 }
  0x2a   : > { %771 = vrot.lane.b32.xlu0 %v754_v34, %s6523_s29  ;;  %v668_v15 = vor.u32 %v667_v9, %v666_v8  ;;  %v661_v19 = vrot.slane %v600_v54, 4  ;;  %v732_v23 = vcombine.high %v6647_v14, %v6647_v14  ;;  %v703_v25 = vrot.slane %v572_v6, %v6635_v5 }
  0x2b   : > { %v671_v20 = vor.u32 %v670_v12, %v669_v11  ;;  %v696_v21 = vrot.slane %v689_v13, %v6635_v5  ;;  %v6375_v30 = vpack.i.bf16 %v6660_v26, %v6653_v18 }
  0x2c   : > { %773 = vrot.lane.b32.xlu1 %v757_v42, %s6523_s29  ;;  %v662_v22 = vor.u32 %v661_v19, %v660_v16  ;;  %v746_v27 = vshll.u32 %v732_v23, 16  ;;  %v705_v29 = vcombine.low %v703_v25, %v703_v25  ;;  %v758_v34 = vshrl.u32 %v732_v23, 16 }
  0x2d   : > { %v704_v24 = vcombine.low %v696_v21, %v696_v21  ;;  %v791_v37 = vrot.slane %v732_v23, 7 }
  0x2e   : > { %820 = vrot.lane.b32.xlu0 %v812_v46, %s6524_s30  ;;  %v748_v32 = vrot.slane %v746_v27, 1  ;;  %v813_v5 = vrot.slane %v758_v34, 5  ;;  %v814_v36 = vrot.slane %v746_v27, 6 }
  0x30   : > { %818 = vrot.lane.b32.xlu1 %v809_v50, %s6524_s30  ;;  %v760_v35 = vor.u32 %v758_v34, %v748_v32  ;;  %v815_v38 = vor.u32 %v814_v36, %v813_v5  ;;  %v8557_v34 = vmov 0  }
  0x31   : > { %1061 = vmatprep.mubr.bf16.mxu0 %v8557_v34  ;;  %555 = vst [vmem:[#allocation2] sm:$0xf] %v8557_v34  ;;  %556 = vst [vmem:[#allocation2 + $0x14] sm:$0xf] %v8557_v34  ;;  %6381 = vset.pattern.permute.xlu1 %v8557_v34 }
  0x32   : > { %630 = vrot.lane.b32.xlu0 %v611_v55, %s8555_s11  ;;  %557 = vst [vmem:[#allocation2 + $0x28] sm:$0xf] %v8557_v34  ;;  %558 = vst [vmem:[#allocation2 + $0x3c] sm:$0xf] %v8557_v34 }
  0x33   : > { %559 = vst [vmem:[#allocation2 + $0x10] sm:$0xf] %v8557_v34  ;;  %560 = vst [vmem:[#allocation2 + $0x24] sm:$0xf] %v8557_v34  ;;  %6380 = vset.pattern.permute.xlu0 %v8557_v34 }
  0x34   : > { %632 = vrot.lane.b32.xlu1 %v619_v58, %s8555_s11  ;;  %561 = vst [vmem:[#allocation2 + $0x38] sm:$0xf] %v8557_v34  ;;  %562 = vst [vmem:[#allocation2 + $0x4c] sm:$0xf] %v8557_v34 }
  0x35   : > { %563 = vst [vmem:[#allocation3] sm:$0xf] %v8557_v34  ;;  %564 = vst [vmem:[#allocation3 + $0x14] sm:$0xf] %v8557_v34 }
  0x36   : > { %634 = vrot.lane.b32.xlu0 %v627_v61, %s8555_s11  ;;  %565 = vst [vmem:[#allocation3 + $0x28] sm:$0xf] %v8557_v34  ;;  %566 = vst [vmem:[#allocation3 + $0x3c] sm:$0xf] %v8557_v34 }
  0x37   : > { %567 = vst [vmem:[#allocation3 + $0x10] sm:$0xf] %v8557_v34  ;;  %568 = vst [vmem:[#allocation3 + $0x24] sm:$0xf] %v8557_v34 }
  0x38   : > { %628 = vrot.lane.b32.xlu1 %v603_v62, %s8555_s11  ;;  %569 = vst [vmem:[#allocation3 + $0x38] sm:$0xf] %v8557_v34  ;;  %570 = vst [vmem:[#allocation3 + $0x4c] sm:$0xf] %v8557_v34 }
  0x3a   : > { %650 = vrot.lane.b32.xlu0 %v645_v63, %s6526_s12 }
  0x3c   : > { %652 = vrot.lane.b32.xlu1 %v646_v0, %s6526_s12 }
  0x3e   : > { %654 = vrot.lane.b32.xlu0 %v647_v1, %s6526_s12 }
  0x40   : > { %648 = vrot.lane.b32.xlu1 %v644_v7, %s6526_s12  ;;  %s6310_s12 = smul.u32 48, %s8749_s14 }
  0x42   : > { %674 = vrot.lane.b32.xlu0 %v665_v10, %s8551_s20  ;;  %s6928_s25 = scalar_lea.vmem %s8539_s4, %s6310_s12 }
  0x44   : > { %676 = vrot.lane.b32.xlu1 %v668_v15, %s8551_s20 }
  0x46   : > { %678 = vrot.lane.b32.xlu0 %v671_v20, %s8551_s20 }
  0x48   : > { %672 = vrot.lane.b32.xlu1 %v662_v22, %s8551_s20 }
  0x4a   : > { %706 = vrot.lane.b32.xlu0 %v704_v24, %s6528_s21 }
  0x4c   : > { %708 = vrot.lane.b32.xlu1 %v696_v21, %s6528_s21 }
  0x4e   : > { %710 = vrot.lane.b32.xlu0 %v705_v29, %s6528_s21 }
  0x50   : > { %6376 = vrot.lane.b32.xlu1 %v6375_v30, %s6523_s29 }
  0x52   : > { %765 = vrot.lane.b32.xlu0 %v6674_v33, %s6523_s29 }
  0x54   : > { %775 = vrot.lane.b32.xlu1 %v760_v35, %s6523_s29 }
  0x56   : > { %798 = vrot.lane.b32.xlu0 %v791_v37, %s6522_s28  ;;  %s6533_s28 = smov 64  }
  0x58   : > { %822 = vrot.lane.b32.xlu1 %v815_v38, %s6524_s30 }
  0x5a   : > { %840 = vrot.lane.b32.xlu0 %v6647_v14, %s6521_s27  ;;  %s6890_s27 = sshll.u32 %s8749_s14, 5 }
  0x5b   : > { %s514_s30 = scalar_lea.vmem %s8538_s3, %s6890_s27 }
  0x5c   : > { %767 = vrot.lane.b32.xlu1 %v748_v32, %s6523_s29  ;;  %s8549_s29 = smov 17  }
  0x8c   : > { %v837_v18 = vpop.permute.xlu0 %836 }
  0x8e   : > { %v793_v26 = vpop.permute.xlu1 %792 }
  0x90   : > { %v795_v40 = vpop.permute.xlu0 %794 }
  0x91   : > { %v801_v49 = vsel %vm800_vm1, %v793_v26, %v795_v40 }
  0x92   : > { %v835_v41 = vpop.permute.xlu1 %834 }
  0x93   : > { %v843_v57 = vsel %vm8547_vm5, %v835_v41, %v837_v18 }
  0x94   : > { %v770_v42 = vpop.permute.xlu0 %769 }
  0x95   : > { %v904_v62 = vsel %vm901_vm6, %v770_v42, %v793_v26 }
  0x96   : > { %v6727_v43 = vpop.permute.xlu1 %796 }
  0x97   : > { %v802_v50 = vsel %vm800_vm1, %v795_v40, %v6727_v43 }
  0x98   : > { %v817_v33 = vpop.permute.xlu0 %816 }
  0x99   : > { %v921_v1 = vsel %vm6742_vm8, %v904_v62, %v817_v33 }
  0x9a   : > { %v6729_v44 = vpop.permute.xlu1 %838  ;;  %v928_v6 = vsel %vm8546_vm7, %v921_v1, %v835_v41 }
  0x9b   : > { %v844_v58 = vsel %vm8547_vm5, %v837_v18, %v6729_v44  ;;  %vm895_vm5 = vsmask.f32 7424 }
  0x9c   : > { %v772_v45 = vpop.permute.xlu0 %771 }
  0x9d   : > { %v781_v14 = vsel %vm777_vm0, %v770_v42, %v772_v45 }
  0x9e   : > { %v6731_v46 = vpop.permute.xlu1 %773  ;;  %v908_v53 = vsel %vm901_vm6, %v781_v14, %v801_v49 }
  0x9f   : > { %v782_v47 = vsel %vm777_vm0, %v772_v45, %v6731_v46 }
  0xa0   : > { %v6736_v48 = vpop.permute.xlu0 %820  ;;  %v912_v54 = vsel %vm901_vm6, %v782_v47, %v802_v50 }
  0xa2   : > { %v819_v51 = vpop.permute.xlu1 %818 }
  0xa3   : > { %v825_v55 = vsel %vm824_vm4, %v817_v33, %v819_v51  ;;  %v826_v56 = vsel %vm824_vm4, %v819_v51, %v6736_v48 }
  0xa4   : > { %v631_v59 = vpop.permute.xlu0 %630  ;;  %v923_v60 = vsel %vm6742_vm8, %v912_v54, %v826_v56  ;;  %v922_v61 = vsel %vm6742_vm8, %v908_v53, %v825_v55 }
  0xa5   : > { %v934_v63 = vsel %vm8546_vm7, %v923_v60, %v844_v58  ;;  %v931_v0 = vsel %vm8546_vm7, %v922_v61, %v843_v57  ;;  %vm712_vm7 = vcmask 891904  }
  0xa6   : > { %996 = vrot.lane.b32.xlu1 %v934_v63, %s8583_s22  ;;  %v633_v2 = vpop.permute.xlu1 %632  ;;  %994 = vrot.lane.b32.xlu0 %v931_v0, %s8583_s22 }
  0xa7   : > { %v638_v21 = vsel %vm8548_vm9, %v631_v59, %v633_v2 }
  0xa8   : > { %v6765_v3 = vpop.permute.xlu0 %634  ;;  %v850_v27 = vsel %vm6775_vm13, %v6664_v28, %v638_v21  ;;  %v6818_v28 = vld [vmem:[%s6788_s26] sm:$0xff]  }
  0xa9   : > { %v639_v22 = vsel %vm8548_vm9, %v633_v2, %v6765_v3 }
  0xaa   : > { %v629_v7 = vpop.permute.xlu1 %628  ;;  %992 = vrot.lane.b32.xlu0 %v928_v6, %s8583_s22  ;;  %v851_v29 = vsel %vm6775_vm13, %v6669_v31, %v639_v22 }
  0xab   : > { %v637_v24 = vsel %vm8548_vm9, %v629_v7, %v631_v59  ;;  %vm1010_vm9 = vcmask 220160   ;;  %v852_v7 = vsel %vm6775_vm13, %v6682_v39, %v6765_v3 }
  0xac   : > { %v651_v8 = vpop.permute.xlu0 %650  ;;  %v849_v37 = vsel %vm6775_vm13, %v6651_v17, %v637_v24  ;;  %6088 = vmatprep.mubr.msk.bf16.mxu1 %vm1010_vm9, %v6818_v28  ;;  %v554_v17 = vld [vmem:[%s8536_s1] sm:$0x7] }
  0xae   : > { %v653_v9 = vpop.permute.xlu1 %652 }
  0xaf   : > { %v658_v25 = vsel %vm656_vm12, %v651_v8, %v653_v9 }
  0xb0   : > { %v6769_v10 = vpop.permute.xlu0 %654  ;;  %v860_v38 = vsel %vm853_vm2, %v850_v27, %v658_v25 }
  0xb1   : > { %v659_v30 = vsel %vm656_vm12, %v653_v9, %v6769_v10 }
  0xb2   : > { %v649_v11 = vpop.permute.xlu1 %648  ;;  %v864_v41 = vsel %vm853_vm2, %v851_v29, %v659_v30 }
  0xb3   : > { %v657_v31 = vsel %vm656_vm12, %v649_v11, %v651_v8  ;;  %vm6846_vm12 = vmand %vm894_vm10, %vm895_vm5  ;;  %v868_v8 = vsel %vm853_vm2, %v852_v7, %v6769_v10  ;;  %v944_v10 = vld [vmem:[%s514_s30 + $0x10] sm:$0xff]  ;;  %vm1293_vm5 = vcmask 146432  }
  0xb4   : > { %v675_v12 = vpop.permute.xlu0 %674  ;;  %v856_v14 = vsel %vm853_vm2, %v849_v37, %v657_v31  ;;  %vm1000_vm2 = vcmask 154624  }
  0xb6   : > { %v677_v13 = vpop.permute.xlu1 %676 }
  0xb7   : > { %v682_v5 = vsel %vm680_vm14, %v675_v12, %v677_v13 }
  0xb8   : > { %v6771_v15 = vpop.permute.xlu0 %678  ;;  %v874_v47 = vsel %vm6824_vm11, %v860_v38, %v682_v5 }
  0xb9   : > { %v683_v36 = vsel %vm680_vm14, %v677_v13, %v6771_v15  ;;  %v943_v13 = vld [vmem:[%s514_s30 + $0x8] sm:$0xff] }
  0xba   : > { %v673_v16 = vpop.permute.xlu1 %672  ;;  %v875_v49 = vsel %vm6824_vm11, %v864_v41, %v683_v36  ;;  %v6936_v41 = vld [vmem:[%s6928_s25 + $0x18] ss:$12 sps:$4 sm:$0xff]  }
  0xbb   : > { %v681_v42 = vsel %vm680_vm14, %v673_v16, %v675_v12  ;;  %v945_v12 = vld [vmem:[%s514_s30 + $0x18] sm:$0xff]  ;;  %v6531_v16 = vmov 65535  }
  0xbc   : > { %v6773_v19 = vpop.permute.xlu0 %706  ;;  %v873_v56 = vsel %vm6824_vm11, %v856_v14, %v681_v42 }
  0xbd   : > { %v880_v61 = vsel %vm877_vm3, %v873_v56, %v6773_v19 }
  0xbe   : > { %v709_v23 = vpop.permute.xlu1 %708 }
  0xbf   : > { %v713_v18 = vsel %vm712_vm7, %v6773_v19, %v709_v23  ;;  %v1018_v19 = vsel %vm870_vm15, 4294967295, %v6531_v16  ;;  %vm2243_vm15 = vcmask 908288  }
  0xc0   : > { %v6798_v32 = vpop.permute.xlu0 %710  ;;  %v884_v54 = vsel %vm877_vm3, %v874_v47, %v713_v18  ;;  %v1019_v20 = vsel %vm877_vm3, %v1018_v19, 0  ;;  %v1150_v47 = vsub.s32 1, %v6630_v4 }
  0xc1   : > { %v714_v26 = vsel %vm712_vm7, %v709_v23, %v6798_v32 }
  0xc2   : > { %v6377_v40 = vpop.permute.xlu1 %6376  ;;  %v888_v55 = vsel %vm877_vm3, %v875_v49, %v714_v26 }
  0xc3   : > { %v6379_v33 = vunpack.i.h.bf16 %v6377_v40  ;;  %v6378_v45 = vunpack.i.l.bf16 %v6377_v40  ;;  %v6386_v40 = vld [vmem:[%s6788_s26 + $0x8] sm:$0xff]   ;;  %s6532_s26 = smov 96  }
  0xc4   : > { %v766_v50 = vpop.permute.xlu0 %765 }
  0xc5   : > { %v779_v51 = vsel %vm777_vm0, %v6379_v33, %v766_v50  ;;  %v778_v53 = vsel %vm777_vm0, %v6378_v45, %v6379_v33  ;;  %v897_v2 = vsel %vm6846_vm12, %v880_v61, %v6378_v45  ;;  %v1146_v45 = vsub.s32 0, %v6630_v4 }
  0xc6   : > { %v776_v57 = vpop.permute.xlu1 %775  ;;  %v898_v58 = vsel %vm6846_vm12, %v884_v54, %v778_v53  ;;  %v899_v59 = vsel %vm6846_vm12, %v888_v55, %v779_v51  ;;  %v6951_v55 = vrot.slane %v554_v17, %v1150_v47 }
  0xc7   : > { %986 = vrot.lane.b32.xlu1 %v898_v58, %s8583_s22  ;;  %988 = vrot.lane.b32.xlu0 %v899_v59, %s8583_s22  ;;  %v783_v62 = vsel %vm777_vm0, %v6731_v46, %v776_v57 }
  0xc8   : > { %v799_v60 = vpop.permute.xlu0 %798  ;;  %8606 = vst [vmem:[#allocation5_spill] sm:$0xff] %v6951_v55 }
  0xc9   : > { %v803_v63 = vsel %vm800_vm1, %v6727_v43, %v799_v60  ;;  %vm8603_vm1 = vcmask 736256  }
  0xca   : > { %v916_v0 = vsel %vm901_vm6, %v783_v62, %v803_v63  ;;  %v823_v1 = vpop.permute.xlu1 %822  ;;  %vm1571_vm6 = vcmask 138240  }
  0xcb   : > { %v827_v6 = vsel %vm824_vm4, %v6736_v48, %v823_v1  ;;  %984 = vrot.lane.b32.xlu1 %v897_v2, %s8583_s22  ;;  %v876_v48 = vsel %vm6824_vm11, %v868_v8, %v6771_v15  ;;  %vm8604_vm4 = vcmask 1043456   ;;  %v942_v15 = vld [vmem:[%s514_s30] sm:$0xff]  ;;  %s6537_s30 = smov 32  }
  0xcc   : > { %v841_v46 = vpop.permute.xlu0 %840  ;;  %v924_v43 = vsel %vm6742_vm8, %v916_v0, %v827_v6  ;;  %v892_v52 = vsel %vm877_vm3, %v876_v48, %v6798_v32  ;;  %v1154_v6 = vsub.s32 2, %v6630_v4  ;;  %vm1724_vm8 = vcmask 7168  }
  0xcd   : > { %v845_v9 = vsel %vm8603_vm1, %v6729_v44, %v841_v46 }
  0xce   : > { %v768_v11 = vpop.permute.xlu1 %767  ;;  %v937_v39 = vsel %vm8604_vm4, %v924_v43, %v845_v9 }
  0xcf   : > { %v780_v3 = vsel %vm777_vm0, %v766_v50, %v768_v11  ;;  %998 = vrot.lane.b32.xlu0 %v937_v39, %s8583_s22  ;;  %v6949_v50 = vrot.slane %v554_v17, %v1146_v45  ;;  %vm1306_vm0 = vcmask 261120  }
  0xd0   : > { %v900_v44 = vsel %vm6846_vm12, %v892_v52, %v780_v3 }
  0xd1   : > { %990 = vrot.lane.b32.xlu1 %v900_v44, %s8583_s22  ;;  %8605 = vst [vmem:[#allocation4_spill] sm:$0xff] %v6949_v50  ;;  %v6972_v44 = vrot.slane %v554_v17, %v1154_v6  ;;  %v7048_v6 = vld [vmem:[#allocation2 + $0x38] ss:$20 sps:$4 sm:$0xff]  }
  0xd3   : > { %958 = vperm.xlu0 %6380, %v944_v10   ;;  %8611 = vst [vmem:[#allocation10_spill] sm:$0xff] %v6972_v44 }
  0xd5   : > { %963 = vperm.xlu1 %6381, %v945_v12  }
  0xd7   : > { %953 = vperm.xlu0 %6380, %v943_v13  }
  0xd9   : > { %948 = vperm.xlu1 %6381, %v942_v15  }
  0xdb   : > { %1243 = vrot.lane.b32.xlu0 %v6936_v41, %s6532_s26 }
  0xdf   : > { %1553 = vrot.lane.b32.xlu0 %v6936_v41, %s6533_s28 }
 0x118   : > { %v997_v21 = vpop.permute.xlu1 %996  ;;  %v995_v22 = vpop.permute.xlu0 %994 }
 0x119   : > { %v1005_v23 = vsel %vm1000_vm2, %v995_v22, %v997_v21 }
 0x11a   : > { %v1024_v24 = vand.u32 %v1019_v20, %v1005_v23 }
 0x11c   : > { %1041 = vmatprep.subr.bf16.mxu0 %v1024_v24  ;;  %v993_v25 = vpop.permute.xlu0 %992 }
 0x11d   : > { %v1004_v27 = vsel %vm1000_vm2, %v993_v25, %v995_v22 }
 0x11e   : > { %v1021_v29 = vand.u32 %v1019_v20, %v1004_v27 }
 0x120   : > { %1042 = vmatpush1.bf16.msra.mxu0 %v1021_v29 }
 0x139   : > { %v987_v30 = vpop.permute.xlu1 %986  ;;  %v989_v32 = vpop.permute.xlu0 %988 }
 0x13a   : > { %v1002_v31 = vsel %vm1000_vm2, %v987_v30, %v989_v32 }
 0x13b   : > { %1043 = vmatprep.subr.bf16.mxu0 %v1002_v31 }
 0x13d   : > { %v985_v35 = vpop.permute.xlu1 %984 }
 0x13e   : > { %v1001_v5 = vsel %vm1000_vm2, %v985_v35, %v987_v30 }
 0x13f   : > { %1044 = vmatpush1.bf16.msra.mxu0 %v1001_v5 }
 0x141   : > { %v999_v36 = vpop.permute.xlu0 %998 }
 0x142   : > { %v1006_v37 = vsel %vm1000_vm2, %v997_v21, %v999_v36  ;;  %5753 = vmatmul.mubr.msk.bf16.vlgmr.msra.gmra.mxu0 %vm1010_vm9, %v6818_v28  ;;  %v6931_v28 = vld [vmem:[%s6928_s25] ss:$12 sps:$4 sm:$0xff]  }
 0x143   : > { %v991_v38 = vpop.permute.xlu1 %990  ;;  %v1027_v18 = vand.u32 %v1019_v20, %v1006_v37  ;;  %1071 = vmatprep.mubr.bf16.mxu0 %v8557_v34  ;;  %1241 = vrot.lane.b32.xlu1 %v6931_v28, %s6532_s26 }
 0x144   : > { %v1003_v26 = vsel %vm1000_vm2, %v989_v32, %v991_v38 }
 0x145   : > { %6084 = vmatprep.subr.bf16.mxu1 %v1027_v18 }
 0x146   : > { %6085 = vmatpush3.bf16.msra.mxu1 %v1027_v18 }
 0x147   : > { %6086 = vmatprep.subr.bf16.mxu1 %v1003_v26  ;;  %1551 = vrot.lane.b32.xlu1 %v6931_v28, %s6533_s28 }
 0x14a   : > { %5754 = vmatmul.mubr.msk.bf16.gmra.mxu0 %vm1010_vm9, %v6386_v40  ;;  %6087 = vmatpush3.bf16.msra.mxu1 %v1003_v26 }
 0x14d   : > { %6089 = vmatmul.mubr.msk.bf16.vlgmr.msra.gmra.mxu1 %vm1010_vm9, %v6386_v40  ;;  %vm8620_vm9 = vcmask 1039360  }
 0x14e   : > { %1345 = vmatprep.mubr.bf16.mxu1 %v8557_v34  ;;  %v959_v33 = vpop.permute.xlu0 %958  ;;  %vm8621_vm13 = vmmov %vm8620_vm9 }
 0x14f   : > { %vm8622_vm10 = vmmov %vm8620_vm9 }
 0x150   : > { %v964_v42 = vpop.permute.xlu1 %963  ;;  %vm8623_vm11 = vmmov %vm8620_vm9 }
 0x151   : > { %vm8624_vm12 = vmmov %vm8620_vm9 }
 0x152   : > { %v954_v54 = vpop.permute.xlu0 %953  ;;  %vm8625_vm3 = vmmov %vm8620_vm9 }
 0x153   : > { %vm8672_vm1 = vmmov %vm8625_vm3 }
 0x154   : > { %v949_v14 = vpop.permute.xlu1 %948  ;;  %vm8673_vm4 = vmmov %vm8672_vm1 }
 0x1b5   : > { %v6953_v59 = vpop.permute.xlu1 %1241 }
 0x1b6   : > { %6096 = vmatprep.mubr.msk.bf16.mxu0 %vm1306_vm0, %v6953_v59 }
 0x202   : > { %v1063_v49 = vpop.f32.mrf.mxu0 }
 0x203   : > { %v1064_v51 = vadd.f32 %v1063_v49, %v949_v14 }
 0x204   : > { %v1065_v53 = vpop.f32.mrf.mxu0 }
 0x205   : > { %v1066_v56 = vadd.f32 %v1065_v53, %v949_v14  ;;  %v1131_v57 = vmax.f32 %v1064_v51, 0.0 }
 0x206   : > { %v1067_v58 = vpop.f32.mrf.mxu0 }
 0x207   : > { %v1132_v60 = vmax.f32 %v1066_v56, 0.0  ;;  %v6956_v61 = vmul.f32 %v6949_v50, %v1131_v57  ;;  %v1068_v62 = vadd.f32 %v1067_v58, %v954_v54  ;;  %v6391_v58 = vld [vmem:[#allocation2] ss:$20 sps:$4 sm:$0xff]  }
 0x208   : > { %v1069_v63 = vpop.f32.mrf.mxu0 }
 0x209   : > { %8607 = vst [vmem:[#allocation6_spill] sm:$0xff] %v6956_v61  ;;  %v6961_v0 = vmul.f32 %v6951_v55, %v1132_v60  ;;  %v1134_v1 = vmax.f32 %v1068_v62, 0.0  ;;  %v1070_v2 = vadd.f32 %v1069_v63, %v954_v54 }
 0x20a   : > { %v1073_v7 = vpop.f32.mrf.mxu0 }
 0x20b   : > { %8608 = vst [vmem:[#allocation7_spill] sm:$0xff] %v6961_v0  ;;  %v5957_v46 = vpack.c.bf16 %v6961_v0, %v6956_v61  ;;  %v1135_v43 = vmax.f32 %v1070_v2, 0.0  ;;  %v1074_v8 = vadd.f32 %v1073_v7, %v959_v33  ;;  %v6967_v48 = vmul.f32 %v6949_v50, %v1134_v1  ;;  %v6399_v2 = vld [vmem:[#allocation2 + $0x28] ss:$20 sps:$4 sm:$0xff]  }
 0x20c   : > { %v1075_v9 = vpop.f32.mrf.mxu0 }
 0x20d   : > { %1211 = vst [vmem:[#allocation2 + $0x4] sm:$0xff] %v5957_v46  ;;  %8609 = vst [vmem:[#allocation8_spill] sm:$0xff] %v6967_v48  ;;  %v6970_v11 = vmul.f32 %v6951_v55, %v1135_v43  ;;  %v1137_v39 = vmax.f32 %v1074_v8, 0.0  ;;  %v1076_v52 = vadd.f32 %v1075_v9, %v959_v33  ;;  %v6090_v3 = vpop.f32.mrf.mxu1  ;;  %v6984_v29 = vpack.c.bf16 %v6967_v48, %v6956_v61  ;;  %v6404_v43 = vld [vmem:[#allocation2 + $0x10] ss:$20 sps:$4 sm:$0xff]  }
 0x20e   : > { %v1125_v4 = vadd.f32 %v6090_v3, %v959_v33  ;;  %v1077_v10 = vpop.f32.mrf.mxu0  ;;  %v7075_v9 = vld [vmem:[%s6928_s25 + $0x1c] ss:$12 sps:$4 sm:$0xff]  }
 0x20f   : > { %8610 = vst [vmem:[#allocation9_spill] sm:$0xff] %v6970_v11  ;;  %v5959_v12 = vpack.c.bf16 %v6970_v11, %v6967_v48  ;;  %v1138_v13 = vmax.f32 %v1076_v52, 0.0  ;;  %v1078_v15 = vadd.f32 %v1077_v10, %v964_v42  ;;  %v1116_v16 = vpop.f32.mrf.mxu1  ;;  %v6977_v19 = vmul.f32 %v6949_v50, %v1137_v39  ;;  %v7079_v39 = vld [vmem:[%s6928_s25 + $0x4] ss:$12 sps:$4 sm:$0xff]   ;;  %v7099_v52 = vpop.permute.xlu0 %1243 }
 0x210   : > { %v1139_v20 = vmax.f32 %v1125_v4, 0.0  ;;  %v1117_v21 = vadd.f32 %v1116_v16, %v949_v14  ;;  %v1079_v22 = vpop.f32.mrf.mxu0  ;;  %v6991_v35 = vpack.c.bf16 %v6970_v11, %v6961_v0  ;;  %v7111_v4 = vpop.permute.xlu1 %1551 }
 0x211   : > { %8612 = vst [vmem:[#allocation11_spill] sm:$0xff] %v6977_v19  ;;  %1213 = vst [vmem:[#allocation2 + $0x18] sm:$0xff] %v5959_v12  ;;  %v6980_v23 = vmul.f32 %v6951_v55, %v1138_v13  ;;  %v1140_v24 = vmax.f32 %v1078_v15, 0.0  ;;  %v1080_v25 = vadd.f32 %v1079_v22, %v964_v42  ;;  %v6091_v27 = vpop.f32.mrf.mxu1 }
 0x212   : > { %v6987_v30 = vmul.f32 %v6972_v44, %v1139_v20  ;;  %v1133_v32 = vmax.f32 %v1117_v21, 0.0  ;;  %v1128_v31 = vadd.f32 %v6091_v27, %v964_v42 }
 0x213   : > { %8613 = vst [vmem:[#allocation12_spill] sm:$0xff] %v6980_v23  ;;  %v5961_v5 = vpack.c.bf16 %v6980_v23, %v6977_v19  ;;  %v1141_v36 = vmax.f32 %v1080_v25, 0.0  ;;  %v1119_v37 = vpop.f32.mrf.mxu1  ;;  %v7001_v42 = vmul.f32 %v6949_v50, %v1140_v24  ;;  %v7109_v3 = vpop.permute.xlu0 %1553 }
 0x214   : > { %8614 = vst [vmem:[#allocation13_spill] sm:$0xff] %v6987_v30  ;;  %v5962_v38 = vpack.c.bf16 %v6987_v30, %v6987_v30  ;;  %v6998_v18 = vmul.f32 %v6972_v44, %v1133_v32  ;;  %v1142_v26 = vmax.f32 %v1128_v31, 0.0  ;;  %v1120_v40 = vadd.f32 %v1119_v37, %v954_v54 }
 0x215   : > { %1215 = vst [vmem:[#allocation2 + $0x2c] sm:$0xff] %v5961_v5  ;;  %8616 = vst [vmem:[#allocation15_spill] sm:$0xff] %v7001_v42  ;;  %v7004_v33 = vmul.f32 %v6951_v55, %v1141_v36  ;;  %v7020_v54 = vpack.c.bf16 %v7001_v42, %v6977_v19 }
 0x216   : > { %8615 = vst [vmem:[#allocation14_spill] sm:$0xff] %v6998_v18  ;;  %1216 = vst [vmem:[#allocation2 + $0x34] sm:$0xf] %v5962_v38  ;;  %v5958_v45 = vpack.c.bf16 %v6998_v18, %v6998_v18  ;;  %v7009_v17 = vmul.f32 %v6972_v44, %v1142_v26  ;;  %v1136_v14 = vmax.f32 %v1120_v40, 0.0 }
 0x217   : > { %8617 = vst [vmem:[#allocation16_spill] sm:$0xff] %v7004_v33  ;;  %v5963_v47 = vpack.c.bf16 %v7004_v33, %v7001_v42  ;;  %v7024_v56 = vpack.c.bf16 %v7004_v33, %v6980_v23 }
 0x218   : > { %8618 = vst [vmem:[#allocation17_spill] sm:$0xff] %v7009_v17  ;;  %1212 = vst [vmem:[#allocation2 + $0xc] sm:$0xf] %v5958_v45  ;;  %v5964_v49 = vpack.c.bf16 %v7009_v17, %v7009_v17  ;;  %v7016_v51 = vmul.f32 %v6972_v44, %v1136_v14  ;;  %v6389_v53 = vld [vmem:[#allocation2 + $0x4] ss:$20 sps:$4 sm:$0xff]  }
 0x219   : > { %1217 = vst [vmem:[#allocation2 + $0x40] sm:$0xff] %v5963_v47  ;;  %1417 = vrot.lane.b32.xlu1 %v6389_v53, %s8583_s22  ;;  %1279 = vrot.lane.b32.xlu0 %v6389_v53, %s8585_s23  ;;  %v6392_v60 = vld [vmem:[#allocation2 + $0x8] ss:$20 sps:$4 sm:$0xff]  }
 0x21a   : > { %8619 = vst [vmem:[#allocation18_spill] sm:$0xff] %v7016_v51  ;;  %1218 = vst [vmem:[#allocation2 + $0x48] sm:$0xf] %v5964_v49  ;;  %v5960_v57 = vpack.c.bf16 %v7016_v51, %v7016_v51 }
 0x21c   : > { %1214 = vst [vmem:[#allocation2 + $0x20] sm:$0xf] %v5960_v57 }
 0x21d   : > { %1710 = vrot.lane.b32.xlu1 %v6389_v53, %s8581_s24  ;;  %1277 = vrot.lane.b32.xlu0 %v6391_v58, %s8585_s23 }
 0x220   : > { %v6395_v63 = vld [vmem:[#allocation2 + $0x30] ss:$20 sps:$4 sm:$0xff]   ;;  %v6397_v1 = vld [vmem:[#allocation2 + $0x2c] ss:$20 sps:$4 sm:$0xff]  }
 0x221   : > { %1415 = vrot.lane.b32.xlu0 %v6391_v58, %s8583_s22  ;;  %1281 = vrot.lane.b32.xlu1 %v6392_v60, %s8585_s23  ;;  %v6402_v7 = vld [vmem:[#allocation2 + $0x34] ss:$20 sps:$4 sm:$0xff]  }
 0x222   : > { %v6403_v46 = vld [vmem:[#allocation2 + $0x34] ss:$20 sps:$4 sm:$0xff]  }
 0x223   : > { %v6394_v62 = vld [vmem:[#allocation2 + $0xc] ss:$20 sps:$4 sm:$0xff]  }
 0x224   : > { %v6406_v8 = vld [vmem:[#allocation2 + $0xc] ss:$20 sps:$4 sm:$0xff]  }
 0x225   : > { %1557 = vrot.lane.b32.xlu0 %v6389_v53, %s8549_s29  ;;  %1283 = vrot.lane.b32.xlu1 %v6394_v62, %s8585_s23 }
 0x229   : > { %1555 = vrot.lane.b32.xlu0 %v6391_v58, %s8549_s29  ;;  %1419 = vrot.lane.b32.xlu1 %v6392_v60, %s8583_s22 }
 0x22d   : > { %1708 = vrot.lane.b32.xlu0 %v6391_v58, %s8581_s24  ;;  %1559 = vrot.lane.b32.xlu1 %v6392_v60, %s8549_s29 }
 0x231   : > { %1421 = vrot.lane.b32.xlu0 %v6394_v62, %s8583_s22  ;;  %1561 = vrot.lane.b32.xlu1 %v6394_v62, %s8549_s29 }
 0x235   : > { %1714 = vrot.lane.b32.xlu0 %v6394_v62, %s8581_s24  ;;  %1712 = vrot.lane.b32.xlu1 %v6392_v60, %s8581_s24 }
 0x239   : > { %1289 = vrot.lane.b32.xlu0 %v6395_v63, %s8585_s23  ;;  %1287 = vrot.lane.b32.xlu1 %v6397_v1, %s8585_s23 }
 0x23d   : > { %1706 = vrot.lane.b32.xlu0 %v6936_v41, %s6537_s30  ;;  %1285 = vrot.lane.b32.xlu1 %v6399_v2, %s8585_s23 }
 0x241   : > { %2089 = vrot.lane.b32.xlu0 %v7048_v6, %s8555_s11  ;;  %1704 = vrot.lane.b32.xlu1 %v6931_v28, %s6537_s30 }
 0x245   : > { %1291 = vrot.lane.b32.xlu0 %v6402_v7, %s8585_s23  ;;  %2087 = vrot.lane.b32.xlu1 %v6403_v46, %s8555_s11 }
 0x249   : > { %1427 = vrot.lane.b32.xlu0 %v6395_v63, %s8583_s22  ;;  %1429 = vrot.lane.b32.xlu1 %v6402_v7, %s8583_s22 }
 0x24d   : > { %1423 = vrot.lane.b32.xlu0 %v6399_v2, %s8583_s22  ;;  %1425 = vrot.lane.b32.xlu1 %v6397_v1, %s8583_s22 }
 0x251   : > { %1567 = vrot.lane.b32.xlu0 %v6395_v63, %s8549_s29  ;;  %1565 = vrot.lane.b32.xlu1 %v6397_v1, %s8549_s29 }
 0x255   : > { %2081 = vrot.lane.b32.xlu0 %v6404_v43, %s8555_s11  ;;  %1563 = vrot.lane.b32.xlu1 %v6399_v2, %s8549_s29 }
 0x259   : > { %2075 = vrot.lane.b32.xlu0 %v6984_v29, %s8555_s11  ;;  %2079 = vrot.lane.b32.xlu1 %v6406_v8, %s8555_s11 }
 0x25d   : > { %1569 = vrot.lane.b32.xlu0 %v6402_v7, %s8549_s29  ;;  %2077 = vrot.lane.b32.xlu1 %v6991_v35, %s8555_s11  ;;  %s8553_s29 = smov 111  }
 0x261   : > { %1720 = vrot.lane.b32.xlu0 %v6395_v63, %s8581_s24  ;;  %1722 = vrot.lane.b32.xlu1 %v6402_v7, %s8581_s24 }
 0x265   : > { %1716 = vrot.lane.b32.xlu0 %v6399_v2, %s8581_s24  ;;  %1718 = vrot.lane.b32.xlu1 %v6397_v1, %s8581_s24 }
 0x269   : > { %2041 = vrot.lane.b32.xlu0 %v7075_v9, %s6532_s26  ;;  %2039 = vrot.lane.b32.xlu1 %v7079_v39, %s6532_s26 }
 0x26d   : > { %2229 = vrot.lane.b32.xlu0 %v6991_v35, %s8553_s29  ;;  %2239 = vrot.lane.b32.xlu1 %v6403_v46, %s8553_s29 }
 0x271   : > { %2227 = vrot.lane.b32.xlu0 %v6984_v29, %s8553_s29  ;;  %2231 = vrot.lane.b32.xlu1 %v6406_v8, %s8553_s29 }
 0x275   : > { %2241 = vrot.lane.b32.xlu0 %v7048_v6, %s8553_s29  ;;  %2223 = vrot.lane.b32.xlu1 %v7079_v39, %s6533_s28 }
 0x279   : > { %2392 = vrot.lane.b32.xlu0 %v6403_v46, %s8551_s20  ;;  %2233 = vrot.lane.b32.xlu1 %v6404_v43, %s8553_s29 }
 0x27d   : > { %2083 = vrot.lane.b32.xlu0 %v7020_v54, %s8555_s11  ;;  %2085 = vrot.lane.b32.xlu1 %v7024_v56, %s8555_s11  ;;  %s524_s11 = scalar_lea.vmem %s8540_s5, %s6890_s27 }
 0x27e   : > { %v2693_v36 = vld [vmem:[%s524_s11 + $0x18] sm:$0xff]  ;;  %v2692_v38 = vld [vmem:[%s524_s11 + $0x10] sm:$0xff]  ;;  %v2691_v40 = vld [vmem:[%s524_s11 + $0x8] sm:$0xff] }
 0x27f   : > { %v2690_v14 = vld [vmem:[%s524_s11] sm:$0xff]  ;;  %s8669_s11 = smov 111  }
 0x281   : > { %2237 = vrot.lane.b32.xlu0 %v7024_v56, %s8553_s29  ;;  %2394 = vrot.lane.b32.xlu1 %v7048_v6, %s8551_s20 }
 0x285   : > { %2225 = vrot.lane.b32.xlu0 %v7075_v9, %s6533_s28  ;;  %2235 = vrot.lane.b32.xlu1 %v7020_v54, %s8553_s29  ;;  %s7357_s29 = scalar_lea.vmem %s8541_s6, %s6310_s12  ;;  %s8665_s12 = smov 17  }
 0x289   : > { %2386 = vrot.lane.b32.xlu0 %v6404_v43, %s8551_s20  ;;  %2384 = vrot.lane.b32.xlu1 %v6406_v8, %s8551_s20 }
 0x28b   : > { %v1280_v10 = vpop.permute.xlu0 %1279  ;;  %v7116_v12 = vpop.permute.xlu1 %1417 }
 0x28d   : > { %2380 = vrot.lane.b32.xlu0 %v6984_v29, %s8551_s20  ;;  %2382 = vrot.lane.b32.xlu1 %v6991_v35, %s8551_s20 }
 0x28f   : > { %v1278_v13 = vpop.permute.xlu0 %1277  ;;  %v7125_v15 = vpop.permute.xlu1 %1710 }
 0x290   : > { %v1294_v1 = vsel %vm1293_vm5, %v1278_v13, %v1280_v10 }
 0x291   : > { %2378 = vrot.lane.b32.xlu0 %v7075_v9, %s6537_s30  ;;  %2376 = vrot.lane.b32.xlu1 %v7079_v39, %s6537_s30 }
 0x293   : > { %v7127_v16 = vpop.permute.xlu0 %1415  ;;  %v1282_v20 = vpop.permute.xlu1 %1281 }
 0x294   : > { %v1295_v62 = vsel %vm1293_vm5, %v1280_v10, %v1282_v20 }
 0x295   : > { %2388 = vrot.lane.b32.xlu0 %v7020_v54, %s8551_s20  ;;  %2390 = vrot.lane.b32.xlu1 %v7024_v56, %s8551_s20  ;;  %s8670_s20 = smov 110  }
 0x297   : > { %v7133_v21 = vpop.permute.xlu0 %1557  ;;  %v1284_v22 = vpop.permute.xlu1 %1283 }
 0x299   : > { %2552 = vrot.lane.b32.xlu0 %v7024_v56, %s6528_s21  ;;  %2554 = vrot.lane.b32.xlu1 %v6403_v46, %s6528_s21  ;;  %v1296_v46 = vsel %vm1293_vm5, %v1282_v20, %v1284_v22 }
 0x29b   : > { %v7139_v24 = vpop.permute.xlu0 %1555  ;;  %v7144_v25 = vpop.permute.xlu1 %1419 }
 0x29d   : > { %2544 = vrot.lane.b32.xlu0 %v6991_v35, %s6528_s21  ;;  %2550 = vrot.lane.b32.xlu1 %v7020_v54, %s6528_s21 }
 0x29f   : > { %v7146_v27 = vpop.permute.xlu0 %1708  ;;  %v7152_v32 = vpop.permute.xlu1 %1559 }
 0x2a1   : > { %2542 = vrot.lane.b32.xlu0 %v6984_v29, %s6528_s21  ;;  %2546 = vrot.lane.b32.xlu1 %v6406_v8, %s6528_s21 }
 0x2a3   : > { %v1422_v31 = vpop.permute.xlu0 %1421  ;;  %v7160_v5 = vpop.permute.xlu1 %1561 }
 0x2a4   : > { %v1433_v20 = vsel %vm1000_vm2, %v7144_v25, %v1422_v31  ;;  %v1432_v31 = vsel %vm1000_vm2, %v7116_v12, %v7144_v25 }
 0x2a5   : > { %2548 = vrot.lane.b32.xlu0 %v6404_v43, %s6528_s21  ;;  %2556 = vrot.lane.b32.xlu1 %v7048_v6, %s6528_s21 }
 0x2a7   : > { %v7162_v37 = vpop.permute.xlu0 %1714  ;;  %v7166_v26 = vpop.permute.xlu1 %1712 }
 0x2a9   : > { %2711 = vperm.xlu0 %6380, %v2693_v36   ;;  %2706 = vperm.xlu1 %6381, %v2692_v38  }
 0x2ab   : > { %v1290_v45 = vpop.permute.xlu0 %1289  ;;  %v1288_v47 = vpop.permute.xlu1 %1287 }
 0x2ac   : > { %v1298_v53 = vsel %vm1293_vm5, %v1288_v47, %v1290_v45 }
 0x2ad   : > { %2701 = vperm.xlu0 %6380, %v2691_v40   ;;  %2696 = vperm.xlu1 %6381, %v2690_v14   ;;  %v1431_v14 = vsel %vm1000_vm2, %v7127_v16, %v7116_v12  ;;  %v1572_v16 = vsel %vm1571_vm6, %v7139_v24, %v7133_v21 }
 0x2ae   : > { %1325 = vmatprep.subr.bf16.mxu1 %v1298_v53 }
 0x2af   : > { %v7168_v49 = vpop.permute.xlu0 %1706  ;;  %v1286_v57 = vpop.permute.xlu1 %1285 }
 0x2b0   : > { %v1297_v58 = vsel %vm1293_vm5, %v1286_v57, %v1288_v47  ;;  %v1573_v57 = vsel %vm1571_vm6, %v7133_v21, %v7152_v32 }
 0x2b1   : > { %1326 = vmatpush1.bf16.msra.mxu1 %v1297_v58 }
 0x2b2   : > { %1327 = vmatprep.subr.bf16.mxu1 %v1295_v62 }
 0x2b3   : > { %v7172_v60 = vpop.permute.xlu0 %2089  ;;  %v7175_v63 = vpop.permute.xlu1 %1704 }
 0x2b5   : > { %1328 = vmatpush1.bf16.msra.mxu1 %v1294_v1  ;;  %v1574_v1 = vsel %vm1571_vm6, %v7152_v32, %v7160_v5  ;;  %v1727_v32 = vsel %vm1724_vm8, %v7166_v26, %v7162_v37  ;;  %v1726_v37 = vsel %vm1724_vm8, %v7125_v15, %v7166_v26 }
 0x2b7   : > { %v1292_v2 = vpop.permute.xlu0 %1291  ;;  %v7179_v7 = vpop.permute.xlu1 %2087 }
 0x2b8   : > { %v1299_v6 = vsel %vm1293_vm5, %v1290_v45, %v1292_v2  ;;  %5775 = vmatmul.mubr.msk.bf16.vlgmr.msra.gmra.mxu1 %vm1306_vm0, %v6953_v59 }
 0x2b9   : > { %6092 = vmatprep.subr.bf16.mxu0 %v1299_v6  ;;  %1355 = vmatprep.mubr.bf16.mxu1 %v8557_v34 }
 0x2ba   : > { %6093 = vmatpush3.bf16.msra.mxu0 %v1299_v6 }
 0x2bb   : > { %6094 = vmatprep.subr.bf16.mxu0 %v1296_v46  ;;  %v1428_v43 = vpop.permute.xlu0 %1427  ;;  %v1430_v8 = vpop.permute.xlu1 %1429 }
 0x2bc   : > { %v1436_v13 = vsel %vm1000_vm2, %v1428_v43, %v1430_v8 }
 0x2bd   : > { %6100 = vmatprep.subr.bf16.mxu1 %v1436_v13 }
 0x2be   : > { %6095 = vmatpush3.bf16.msra.mxu0 %v1296_v46  ;;  %6101 = vmatpush3.bf16.msra.mxu1 %v1436_v13 }
 0x2bf   : > { %v1424_v10 = vpop.permute.xlu0 %1423  ;;  %v1426_v22 = vpop.permute.xlu1 %1425  ;;  %6102 = vmatprep.subr.bf16.mxu1 %v1433_v20 }
 0x2c0   : > { %5776 = vmatmul.mubr.msk.bf16.gmra.mxu1 %vm1306_vm0, %v7099_v52  ;;  %v1435_v36 = vsel %vm1000_vm2, %v1426_v22, %v1428_v43  ;;  %v1434_v38 = vsel %vm1000_vm2, %v1424_v10, %v1426_v22  ;;  %v6409_v10 = vld [vmem:[#allocation2 + $0x34] ss:$20 sps:$4 sm:$0xff]  }
 0x2c1   : > { %6097 = vmatmul.mubr.msk.bf16.vlgmr.msra.gmra.mxu0 %vm1306_vm0, %v7099_v52  ;;  %1461 = vmatprep.subr.bf16.mxu0 %v1435_v36 }
 0x2c2   : > { %1481 = vmatprep.mubr.bf16.mxu0 %v8557_v34  ;;  %6104 = vmatprep.mubr.msk.bf16.mxu1 %vm1306_vm0, %v6931_v28 }
 0x2c3   : > { %v1568_v59 = vpop.permute.xlu0 %1567  ;;  %1462 = vmatpush1.bf16.msra.mxu0 %v1434_v38  ;;  %6103 = vmatpush3.bf16.msra.mxu1 %v1433_v20  ;;  %v1566_v40 = vpop.permute.xlu1 %1565 }
 0x2c4   : > { %1463 = vmatprep.subr.bf16.mxu0 %v1432_v31  ;;  %v1576_v52 = vsel %vm1571_vm6, %v1566_v40, %v1568_v59 }
 0x2c5   : > { %1602 = vmatprep.subr.bf16.mxu1 %v1576_v52 }
 0x2c7   : > { %v7200_v45 = vpop.permute.xlu0 %2081  ;;  %1464 = vmatpush1.bf16.msra.mxu0 %v1431_v14  ;;  %v1564_v47 = vpop.permute.xlu1 %1563 }
 0x2c8   : > { %v1575_v53 = vsel %vm1571_vm6, %v1564_v47, %v1566_v40  ;;  %6105 = vmatmul.mubr.msk.bf16.vlgmr.msra.gmra.mxu1 %vm1306_vm0, %v6936_v41 }
 0x2c9   : > { %1603 = vmatpush1.bf16.msra.mxu1 %v1575_v53  ;;  %1622 = vmatprep.mubr.bf16.mxu1 %v8557_v34 }
 0x2ca   : > { %5779 = vmatmul.mubr.msk.bf16.vlgmr.msra.gmra.mxu0 %vm1306_vm0, %v6931_v28  ;;  %1604 = vmatprep.subr.bf16.mxu1 %v1573_v57 }
 0x2cb   : > { %v7209_v25 = vpop.permute.xlu0 %2075  ;;  %v7217_v12 = vpop.permute.xlu1 %2079  ;;  %1491 = vmatprep.mubr.bf16.mxu0 %v8557_v34 }
 0x2cd   : > { %1605 = vmatpush1.bf16.msra.mxu1 %v1572_v16 }
 0x2cf   : > { %v1570_v58 = vpop.permute.xlu0 %1569  ;;  %v7224_v62 = vpop.permute.xlu1 %2077 }
 0x2d0   : > { %v1577_v28 = vsel %vm1571_vm6, %v1568_v59, %v1570_v58  ;;  %5783 = vmatmul.mubr.msk.bf16.vlgmr.msra.gmra.mxu1 %vm1306_vm0, %v7111_v4 }
 0x2d1   : > { %6108 = vmatprep.subr.bf16.mxu0 %v1577_v28  ;;  %1632 = vmatprep.mubr.bf16.mxu1 %v8557_v34 }
 0x2d2   : > { %6109 = vmatpush3.bf16.msra.mxu0 %v1577_v28 }
 0x2d3   : > { %6110 = vmatprep.subr.bf16.mxu0 %v1574_v1  ;;  %v1721_v2 = vpop.permute.xlu0 %1720  ;;  %5780 = vmatmul.mubr.msk.bf16.gmra.mxu0 %vm1306_vm0, %v6936_v41  ;;  %v1723_v21 = vpop.permute.xlu1 %1722 }
 0x2d4   : > { %6112 = vmatprep.mubr.msk.bf16.mxu0 %vm1306_vm0, %v7111_v4  ;;  %v1730_v6 = vsel %vm1724_vm8, %v1721_v2, %v1723_v21 }
 0x2d5   : > { %6116 = vmatprep.subr.bf16.mxu1 %v1730_v6 }
 0x2d6   : > { %6111 = vmatpush3.bf16.msra.mxu0 %v1574_v1  ;;  %6117 = vmatpush3.bf16.msra.mxu1 %v1730_v6 }
 0x2d7   : > { %v1717_v24 = vpop.permute.xlu0 %1716  ;;  %v1719_v5 = vpop.permute.xlu1 %1718  ;;  %6118 = vmatprep.subr.bf16.mxu1 %v1727_v32 }
 0x2d8   : > { %5784 = vmatmul.mubr.msk.bf16.gmra.mxu1 %vm1306_vm0, %v7109_v3  ;;  %v1729_v4 = vsel %vm1724_vm8, %v1719_v5, %v1721_v2  ;;  %v1728_v46 = vsel %vm1724_vm8, %v1717_v24, %v1719_v5 }
 0x2d9   : > { %1755 = vmatprep.subr.bf16.mxu0 %v1729_v4  ;;  %6120 = vmatprep.mubr.msk.bf16.mxu1 %vm1306_vm0, %v7175_v63 }
 0x2da   : > { %6119 = vmatpush3.bf16.msra.mxu1 %v1727_v32 }
 0x2db   : > { %v7242_v41 = vpop.permute.xlu0 %2041  ;;  %6113 = vmatmul.mubr.msk.bf16.vlgmr.msra.gmra.mxu0 %vm1306_vm0, %v7109_v3  ;;  %v7253_v43 = vpop.permute.xlu1 %2039  ;;  %1929 = vmatprep.subr.bf16.mxu1 %v7024_v56  ;;  %v1725_v3 = vsel %vm1724_vm8, %v7146_v27, %v7125_v15  ;;  %v6410_v56 = vld [vmem:[#allocation2 + $0xc] ss:$20 sps:$4 sm:$0xff]  }
 0x2dc   : > { %1756 = vmatpush1.bf16.msra.mxu0 %v1728_v46  ;;  %1775 = vmatprep.mubr.bf16.mxu0 %v8557_v34 }
 0x2dd   : > { %1757 = vmatprep.subr.bf16.mxu0 %v1726_v37 }
 0x2df   : > { %v7256_v8 = vpop.permute.xlu0 %2229  ;;  %v2240_v13 = vpop.permute.xlu1 %2239 }
 0x2e0   : > { %1758 = vmatpush1.bf16.msra.mxu0 %v1725_v3  ;;  %6121 = vmatmul.mubr.msk.bf16.vlgmr.msra.gmra.mxu1 %vm1306_vm0, %v7168_v49 }
 0x2e1   : > { %6124 = vmatprep.subr.bf16.mxu0 %v6409_v10  ;;  %1930 = vmatpush1.bf16.msra.mxu1 %v7020_v54  ;;  %v2096_v54 = vsel %vm8620_vm9, %v7179_v7, %v7172_v60  ;;  %vm8674_vm9 = vmmov %vm8672_vm1 }
 0x2e2   : > { %1931 = vmatprep.subr.bf16.mxu1 %v6991_v35  ;;  %1949 = vmatprep.mubr.bf16.mxu1 %v8557_v34 }
 0x2e3   : > { %v2228_v26 = vpop.permute.xlu0 %2227  ;;  %5787 = vmatmul.mubr.msk.bf16.vlgmr.msra.gmra.mxu0 %vm1306_vm0, %v7175_v63  ;;  %v2232_v20 = vpop.permute.xlu1 %2231 }
 0x2e4   : > { %6125 = vmatpush3.bf16.msra.mxu0 %v6409_v10  ;;  %1785 = vmatprep.mubr.bf16.mxu0 %v8557_v34  ;;  %v2245_v47 = vsel %vm2243_vm15, %v7256_v8, %v2232_v20  ;;  %v2244_v57 = vsel %vm2243_vm15, %v2228_v26, %v7256_v8 }
 0x2e5   : > { %6126 = vmatprep.subr.bf16.mxu0 %v6410_v56  ;;  %1932 = vmatpush1.bf16.msra.mxu1 %v6984_v29  ;;  %v2093_v29 = vsel %vm8621_vm13, %v7217_v12, %v7200_v45  ;;  %vm8675_vm13 = vmmov %vm8672_vm1 }
 0x2e6   : > { %6132 = vmatprep.subr.bf16.mxu1 %v2096_v54 }
 0x2e7   : > { %v2242_v15 = vpop.permute.xlu0 %2241  ;;  %v2224_v27 = vpop.permute.xlu1 %2223 }
 0x2e8   : > { %6127 = vmatpush3.bf16.msra.mxu0 %v6410_v56  ;;  %5799 = vmatmul.mubr.msk.bf16.vlgmr.msra.gmra.mxu1 %vm1306_vm0, %v7079_v39  ;;  %v2249_v40 = vsel %vm2243_vm15, %v2240_v13, %v2242_v15  ;;  %v6411_v56 = vld [vmem:[%s6928_s25 + $0x8] ss:$12 sps:$4 sm:$0xff]  }
 0x2e9   : > { %6133 = vmatpush3.bf16.msra.mxu1 %v2096_v54  ;;  %1959 = vmatprep.mubr.bf16.mxu1 %v8557_v34 }
 0x2ea   : > { %6134 = vmatprep.subr.bf16.mxu1 %v2093_v29 }
 0x2eb   : > { %v7276_v35 = vpop.permute.xlu0 %2392  ;;  %5788 = vmatmul.mubr.msk.bf16.gmra.mxu0 %vm1306_vm0, %v7168_v49  ;;  %v2234_v60 = vpop.permute.xlu1 %2233 }
 0x2ec   : > { %6128 = vmatprep.mubr.msk.bf16.mxu0 %vm1306_vm0, %v7079_v39  ;;  %v2092_v39 = vsel %vm8624_vm12, %v7224_v62, %v7217_v12  ;;  %v2246_v53 = vsel %vm2243_vm15, %v2232_v20, %v2234_v60  ;;  %v7367_v60 = vld [vmem:[%s7357_s29] ss:$12 sps:$4 sm:$0xff]   ;;  %vm6540_vm12 = vmmov 0  }
 0x2ed   : > { %6135 = vmatpush3.bf16.msra.mxu1 %v2093_v29  ;;  %v7360_v29 = vld [vmem:[%s7357_s29 + $0x18] ss:$12 sps:$4 sm:$0xff]   ;;  %8627 = vst [vmem:[#allocation20_spill] sm:$0xff] %v7367_v60  ;;  %2820 = vrot.lane.b32.xlu1 %v7367_v60, %s6532_s26 }
 0x2ee   : > { %8626 = vst [vmem:[#allocation19_spill] sm:$0xff] %v7360_v29  ;;  %2822 = vrot.lane.b32.xlu0 %v7360_v29, %s6532_s26 }
 0x2ef   : > { %v2084_v63 = vpop.permute.xlu0 %2083  ;;  %v2086_v22 = vpop.permute.xlu1 %2085 }
 0x2f0   : > { %5800 = vmatmul.mubr.msk.bf16.gmra.mxu1 %vm1306_vm0, %v7075_v9  ;;  %v2095_v49 = vsel %vm8622_vm10, %v2086_v22, %v7179_v7  ;;  %v2094_v36 = vsel %vm8623_vm11, %v2084_v63, %v2086_v22  ;;  %vm8676_vm10 = vmmov %vm8672_vm1 }
 0x2f1   : > { %2121 = vmatprep.subr.bf16.mxu0 %v2095_v49  ;;  %6136 = vmatprep.mubr.msk.bf16.mxu1 %vm1306_vm0, %v7253_v43  ;;  %vm8677_vm11 = vmmov %vm8672_vm1 }
 0x2f2   : > { %3130 = vrot.lane.b32.xlu0 %v7360_v29, %s6533_s28  ;;  %3128 = vrot.lane.b32.xlu1 %v7367_v60, %s6533_s28 }
 0x2f3   : > { %v2238_v59 = vpop.permute.xlu0 %2237  ;;  %6129 = vmatmul.mubr.msk.bf16.vlgmr.msra.gmra.mxu0 %vm1306_vm0, %v7075_v9  ;;  %v2395_v31 = vpop.permute.xlu1 %2394  ;;  %v2091_v9 = vsel %vm8625_vm3, %v7209_v25, %v7224_v62  ;;  %vm8731_vm3 = vmmov %vm8672_vm1 }
 0x2f4   : > { %v2248_v38 = vsel %vm2243_vm15, %v2238_v59, %v2240_v13  ;;  %2122 = vmatpush1.bf16.msra.mxu0 %v2094_v36  ;;  %2141 = vmatprep.mubr.bf16.mxu0 %v8557_v34  ;;  %v2401_v16 = vsel %vm680_vm14, %v7276_v35, %v2395_v31 }
 0x2f5   : > { %2274 = vmatprep.subr.bf16.mxu1 %v2248_v38  ;;  %2123 = vmatprep.subr.bf16.mxu0 %v2092_v39 }
 0x2f7   : > { %v2226_v7 = vpop.permute.xlu0 %2225  ;;  %v2236_v45 = vpop.permute.xlu1 %2235 }
 0x2f8   : > { %2124 = vmatpush1.bf16.msra.mxu0 %v2091_v9  ;;  %v2247_v52 = vsel %vm2243_vm15, %v2236_v45, %v2238_v59  ;;  %6137 = vmatmul.mubr.msk.bf16.vlgmr.msra.gmra.mxu1 %vm1306_vm0, %v7242_v41 }
 0x2f9   : > { %6140 = vmatprep.subr.bf16.mxu0 %v2249_v40  ;;  %2275 = vmatpush1.bf16.msra.mxu1 %v2247_v52 }
 0x2fa   : > { %2276 = vmatprep.subr.bf16.mxu1 %v2245_v47  ;;  %2294 = vmatprep.mubr.bf16.mxu1 %v8557_v34 }
 0x2fb   : > { %v2387_v14 = vpop.permute.xlu0 %2386  ;;  %5811 = vmatmul.mubr.msk.bf16.vlgmr.msra.gmra.mxu0 %vm1306_vm0, %v7253_v43  ;;  %v2385_v25 = vpop.permute.xlu1 %2384 }
 0x2fc   : > { %6141 = vmatpush3.bf16.msra.mxu0 %v2249_v40  ;;  %2151 = vmatprep.mubr.bf16.mxu0 %v8557_v34  ;;  %v2398_v62 = vsel %vm680_vm14, %v2385_v25, %v2387_v14 }
 0x2fd   : > { %6142 = vmatprep.subr.bf16.mxu0 %v2246_v53  ;;  %2277 = vmatpush1.bf16.msra.mxu1 %v2244_v57 }
 0x2fe   : > { %6148 = vmatprep.subr.bf16.mxu1 %v2401_v16 }
 0x2ff   : > { %v2381_v12 = vpop.permute.xlu0 %2380  ;;  %v2383_v58 = vpop.permute.xlu1 %2382 }
 0x300   : > { %6143 = vmatpush3.bf16.msra.mxu0 %v2246_v53  ;;  %5815 = vmatmul.mubr.msk.bf16.vlgmr.msra.gmra.mxu1 %vm1306_vm0, %v2224_v27  ;;  %v2397_v5 = vsel %vm680_vm14, %v2383_v58, %v2385_v25  ;;  %v2396_v37 = vsel %vm680_vm14, %v2381_v12, %v2383_v58 }
 0x301   : > { %6149 = vmatpush3.bf16.msra.mxu1 %v2401_v16  ;;  %2304 = vmatprep.mubr.bf16.mxu1 %v8557_v34 }
 0x302   : > { %6150 = vmatprep.subr.bf16.mxu1 %v2398_v62 }
 0x303   : > { %v2379_v28 = vpop.permute.xlu0 %2378  ;;  %5812 = vmatmul.mubr.msk.bf16.gmra.mxu0 %vm1306_vm0, %v7242_v41  ;;  %v2377_v1 = vpop.permute.xlu1 %2376 }
 0x304   : > { %6144 = vmatprep.mubr.msk.bf16.mxu0 %vm1306_vm0, %v2224_v27 }
 0x305   : > { %6151 = vmatpush3.bf16.msra.mxu1 %v2398_v62 }
 0x307   : > { %v2389_v2 = vpop.permute.xlu0 %2388  ;;  %v2391_v21 = vpop.permute.xlu1 %2390 }
 0x308   : > { %5816 = vmatmul.mubr.msk.bf16.gmra.mxu1 %vm1306_vm0, %v2226_v7  ;;  %v2400_v6 = vsel %vm680_vm14, %v2391_v21, %v7276_v35  ;;  %v2399_v32 = vsel %vm680_vm14, %v2389_v2, %v2391_v21  ;;  %v6412_v35 = vld [vmem:[%s6928_s25 + $0x20] ss:$12 sps:$4 sm:$0xff]   ;;  %s8667_s25 = smov 127  }
 0x309   : > { %2426 = vmatprep.subr.bf16.mxu0 %v2400_v6  ;;  %6152 = vmatprep.mubr.msk.bf16.mxu1 %vm1306_vm0, %v2377_v1 }
 0x30b   : > { %v2553_v24 = vpop.permute.xlu0 %2552  ;;  %6145 = vmatmul.mubr.msk.bf16.vlgmr.msra.gmra.mxu0 %vm1306_vm0, %v2226_v7  ;;  %v2555_v41 = vpop.permute.xlu1 %2554 }
 0x30c   : > { %2427 = vmatpush1.bf16.msra.mxu0 %v2399_v32  ;;  %2446 = vmatprep.mubr.bf16.mxu0 %v8557_v34  ;;  %v2562_v46 = vsel %vm712_vm7, %v2553_v24, %v2555_v41 }
 0x30d   : > { %2428 = vmatprep.subr.bf16.mxu0 %v2397_v5  ;;  %2588 = vmatprep.subr.bf16.mxu1 %v2562_v46 }
 0x30f   : > { %v2545_v4 = vpop.permute.xlu0 %2544  ;;  %v2551_v43 = vpop.permute.xlu1 %2550 }
 0x310   : > { %2429 = vmatpush1.bf16.msra.mxu0 %v2396_v37  ;;  %v2561_v8 = vsel %vm712_vm7, %v2551_v43, %v2553_v24  ;;  %6153 = vmatmul.mubr.msk.bf16.vlgmr.msra.gmra.mxu1 %vm1306_vm0, %v2379_v28 }
 0x311   : > { %2589 = vmatpush1.bf16.msra.mxu1 %v2561_v8  ;;  %2608 = vmatprep.mubr.bf16.mxu1 %v8557_v34 }
 0x313   : > { %5819 = vmatmul.mubr.msk.bf16.vlgmr.msra.gmra.mxu0 %vm1306_vm0, %v2377_v1  ;;  %v2543_v3 = vpop.permute.xlu0 %2542  ;;  %v2547_v10 = vpop.permute.xlu1 %2546 }
 0x314   : > { %2456 = vmatprep.mubr.bf16.mxu0 %v8557_v34  ;;  %v2559_v13 = vsel %vm712_vm7, %v2545_v4, %v2547_v10  ;;  %v2558_v26 = vsel %vm712_vm7, %v2543_v3, %v2545_v4 }
 0x315   : > { %2590 = vmatprep.subr.bf16.mxu1 %v2559_v13 }
 0x316   : > { %2591 = vmatpush1.bf16.msra.mxu1 %v2558_v26 }
 0x317   : > { %v2557_v20 = vpop.permute.xlu1 %2556  ;;  %v2549_v15 = vpop.permute.xlu0 %2548 }
 0x318   : > { %v2563_v54 = vsel %vm712_vm7, %v2555_v41, %v2557_v20  ;;  %v2560_v27 = vsel %vm712_vm7, %v2547_v10, %v2549_v15 }
 0x319   : > { %5825 = vmatmul.mubr.msk.bf16.vlgmr.msra.gmra.mxu1 %vm1306_vm0, %v6411_v56  ;;  %6156 = vmatprep.subr.bf16.mxu0 %v2563_v54 }
 0x31a   : > { %2618 = vmatprep.mubr.bf16.mxu1 %v8557_v34  ;;  %6157 = vmatpush3.bf16.msra.mxu0 %v2563_v54 }
 0x31b   : > { %5820 = vmatmul.mubr.msk.bf16.gmra.mxu0 %vm1306_vm0, %v2379_v28  ;;  %6158 = vmatprep.subr.bf16.mxu0 %v2560_v27 }
 0x31c   : > { %6160 = vmatprep.mubr.msk.bf16.mxu0 %vm1306_vm0, %v6411_v56 }
 0x31e   : > { %6159 = vmatpush3.bf16.msra.mxu0 %v2560_v27 }
 0x321   : > { %5826 = vmatmul.mubr.msk.bf16.gmra.mxu1 %vm1306_vm0, %v6412_v35 }
 0x323   : > { %6161 = vmatmul.mubr.msk.bf16.vlgmr.msra.gmra.mxu0 %vm1306_vm0, %v6412_v35 }
 0x324   : > { %2922 = vmatprep.mubr.bf16.mxu0 %v8557_v34 }
 0x378   : > { %v1347_v63 = vpop.f32.mrf.mxu1 }
 0x37a   : > { %v1349_v22 = vpop.f32.mrf.mxu1 }
 0x37c   : > { %v1351_v59 = vpop.f32.mrf.mxu1 }
 0x37e   : > { %v7373_v49 = vpop.f32.mrf.mxu1 }
 0x380   : > { %v1357_v38 = vpop.f32.mrf.mxu1 }
 0x381   : > { %v6098_v36 = vpop.f32.mrf.mxu0 }
 0x382   : > { %v1359_v31 = vpop.f32.mrf.mxu1 }
 0x383   : > { %v1400_v39 = vpop.f32.mrf.mxu0 }
 0x384   : > { %v1361_v9 = vpop.f32.mrf.mxu1 }
 0x385   : > { %v6099_v7 = vpop.f32.mrf.mxu0 }
 0x386   : > { %v7375_v40 = vpop.f32.mrf.mxu1 }
 0x387   : > { %v7377_v45 = vpop.f32.mrf.mxu0 }
 0x388   : > { %v6106_v52 = vpop.f32.mrf.mxu1 }
 0x389   : > { %v7379_v14 = vadd.f32 %v6106_v52, %v6098_v36 }
 0x38a   : > { %v1483_v47 = vpop.f32.mrf.mxu0  ;;  %v1536_v25 = vpop.f32.mrf.mxu1 }
 0x38b   : > { %v7381_v53 = vadd.f32 %v1483_v47, %v1347_v63  ;;  %v7383_v57 = vadd.f32 %v1536_v25, %v1400_v39 }
 0x38c   : > { %v1485_v12 = vpop.f32.mrf.mxu0  ;;  %v6107_v58 = vpop.f32.mrf.mxu1 }
 0x38d   : > { %v7385_v16 = vadd.f32 %v1485_v12, %v1349_v22  ;;  %v7387_v28 = vadd.f32 %v6107_v58, %v6099_v7 }
 0x38e   : > { %v1487_v62 = vpop.f32.mrf.mxu0  ;;  %v7391_v2 = vpop.f32.mrf.mxu1 }
 0x38f   : > { %v7389_v1 = vadd.f32 %v1487_v62, %v1351_v59 }
 0x390   : > { %v7393_v21 = vpop.f32.mrf.mxu0  ;;  %v7395_v24 = vpop.f32.mrf.mxu1 }
 0x392   : > { %v7399_v5 = vpop.f32.mrf.mxu1 }
 0x393   : > { %v1493_v6 = vpop.f32.mrf.mxu0 }
 0x394   : > { %v7397_v32 = vadd.f32 %v1493_v6, %v1357_v38  ;;  %v7403_v46 = vpop.f32.mrf.mxu1 }
 0x395   : > { %v1495_v41 = vpop.f32.mrf.mxu0 }
 0x396   : > { %v7401_v4 = vadd.f32 %v1495_v41, %v1359_v31  ;;  %v1630_v8 = vpop.f32.mrf.mxu1 }
 0x397   : > { %v1497_v37 = vpop.f32.mrf.mxu0 }
 0x398   : > { %v7405_v43 = vadd.f32 %v1497_v37, %v1361_v9  ;;  %v1634_v10 = vpop.f32.mrf.mxu1 }
 0x399   : > { %v1499_v3 = vpop.f32.mrf.mxu0 }
 0x39a   : > { %v7409_v26 = vpop.f32.mrf.mxu1 }
 0x39b   : > { %v7407_v13 = vpop.f32.mrf.mxu0 }
 0x39c   : > { %v7413_v20 = vpop.f32.mrf.mxu1 }
 0x39d   : > { %v7411_v56 = vpop.f32.mrf.mxu0 }
 0x39e   : > { %v7417_v54 = vpop.f32.mrf.mxu1 }
 0x39f   : > { %v7415_v15 = vpop.f32.mrf.mxu0 }
 0x3a0   : > { %v7421_v35 = vpop.f32.mrf.mxu1 }
 0x3a1   : > { %v7419_v27 = vpop.f32.mrf.mxu0 }
 0x3a2   : > { %v7423_v22 = vpop.f32.mrf.mxu1 }
 0x3a3   : > { %v1777_v63 = vpop.f32.mrf.mxu0 }
 0x3a4   : > { %v7427_v36 = vpop.f32.mrf.mxu1 }
 0x3a5   : > { %v7425_v59 = vpop.f32.mrf.mxu0 }
 0x3a6   : > { %v7431_v39 = vpop.f32.mrf.mxu1 }
 0x3a7   : > { %v7429_v38 = vpop.f32.mrf.mxu0 }
 0x3a8   : > { %v1951_v7 = vpop.f32.mrf.mxu1 }
 0x3a9   : > { %v7433_v31 = vpop.f32.mrf.mxu0 }
 0x3aa   : > { %v7437_v52 = vpop.f32.mrf.mxu1 }
 0x3ab   : > { %v7435_v9 = vpop.f32.mrf.mxu0 }
 0x3ac   : > { %v7441_v25 = vpop.f32.mrf.mxu1 }
 0x3ad   : > { %v7439_v47 = vpop.f32.mrf.mxu0 }
 0x3ae   : > { %v7445_v58 = vpop.f32.mrf.mxu1 }
 0x3af   : > { %v7443_v12 = vpop.f32.mrf.mxu0 }
 0x3b0   : > { %v7449_v6 = vpop.f32.mrf.mxu1 }
 0x3b1   : > { %v7447_v62 = vpop.f32.mrf.mxu0 }
 0x3b2   : > { %v7453_v37 = vpop.f32.mrf.mxu1 }
 0x3b3   : > { %v7451_v41 = vpop.f32.mrf.mxu0 }
 0x3b4   : > { %v7457_v51 = vpop.f32.mrf.mxu1 }
 0x3b5   : > { %v7455_v34 = vpop.f32.mrf.mxu0 }
 0x3b6   : > { %v7461_v17 = vpop.f32.mrf.mxu1 }
 0x3b7   : > { %v7459_v33 = vpop.f32.mrf.mxu0 }
 0x3b8   : > { %v7465_v18 = vpop.f32.mrf.mxu1 }
 0x3b9   : > { %v7463_v42 = vpop.f32.mrf.mxu0  ;;  %8629 = vst [vmem:[#allocation22_spill] sm:$0xff] %v7465_v18 }
 0x3ba   : > { %8628 = vst [vmem:[#allocation21_spill] sm:$0xff] %v7463_v42  ;;  %v7467_v30 = vpop.f32.mrf.mxu1 }
 0x3bb   : > { %v2143_v23 = vpop.f32.mrf.mxu0  ;;  %8630 = vst [vmem:[#allocation23_spill] sm:$0xff] %v7467_v30 }
 0x3bc   : > { %v7469_v11 = vpop.f32.mrf.mxu1 }
 0x3bd   : > { %v2145_v19 = vpop.f32.mrf.mxu0  ;;  %8631 = vst [vmem:[#allocation24_spill] sm:$0xff] %v7469_v11 }
 0x3be   : > { %v7473_v0 = vpop.f32.mrf.mxu1 }
 0x3bf   : > { %v7471_v48 = vpop.f32.mrf.mxu0  ;;  %8633 = vst [vmem:[#allocation26_spill] sm:$0xff] %v7473_v0 }
 0x3c0   : > { %8632 = vst [vmem:[#allocation25_spill] sm:$0xff] %v7471_v48  ;;  %v2296_v60 = vpop.f32.mrf.mxu1 }
 0x3c1   : > { %v7475_v61 = vpop.f32.mrf.mxu0 }
 0x3c2   : > { %8634 = vst [vmem:[#allocation27_spill] sm:$0xff] %v7475_v61  ;;  %v7479_v44 = vpop.f32.mrf.mxu1 }
 0x3c3   : > { %v7477_v29 = vpop.f32.mrf.mxu0 }
 0x3c4   : > { %8635 = vst [vmem:[#allocation28_spill] sm:$0xff] %v7477_v29  ;;  %v7483_v50 = vpop.f32.mrf.mxu1 }
 0x3c5   : > { %v7481_v55 = vpop.f32.mrf.mxu0  ;;  %8637 = vst [vmem:[#allocation30_spill] sm:$0xff] %v7483_v50 }
 0x3c6   : > { %8636 = vst [vmem:[#allocation29_spill] sm:$0xff] %v7481_v55  ;;  %v7487_v30 = vpop.f32.mrf.mxu1  ;;  %v1490_v55 = vadd.f32 %v7393_v21, %v7373_v49  ;;  %v1698_v49 = vadd.f32 %v1634_v10, %v7397_v32 }
 0x3c7   : > { %v7485_v18 = vpop.f32.mrf.mxu0  ;;  %8638 = vst [vmem:[#allocation31_spill] sm:$0xff] %v7487_v30  ;;  %v1540_v30 = vadd.f32 %v7391_v2, %v7377_v45  ;;  %v1700_v45 = vadd.f32 %v7407_v13, %v7379_v14 }
 0x3c8   : > { %v7491_v42 = vpop.f32.mrf.mxu1  ;;  %v1851_v10 = vadd.f32 %v7435_v9, %v1698_v49 }
 0x3c9   : > { %v7489_v11 = vpop.f32.mrf.mxu0  ;;  %8640 = vst [vmem:[#allocation33_spill] sm:$0xff] %v7491_v42  ;;  %v1697_v32 = vadd.f32 %v7419_v27, %v1540_v30  ;;  %v7542_v30 = vpop.permute.xlu1 %2706 }
 0x3ca   : > { %8639 = vst [vmem:[#allocation32_spill] sm:$0xff] %v7489_v11  ;;  %v7495_v61 = vpop.f32.mrf.mxu1  ;;  %v1692_v11 = vadd.f32 %v7395_v24, %v7381_v53  ;;  %v1699_v53 = vadd.f32 %v7409_v26, %v7401_v4  ;;  %v2025_v27 = vadd.f32 %v7449_v6, %v1851_v10  ;;  %v8648_v6 = vld [vmem:[#allocation23_spill] sm:$0xff] }
 0x3cb   : > { %v7493_v0 = vpop.f32.mrf.mxu0  ;;  %8642 = vst [vmem:[#allocation35_spill] sm:$0xff] %v7495_v61  ;;  %v1500_v61 = vadd.f32 %v1499_v3, %v7375_v40  ;;  %v1703_v40 = vadd.f32 %v7415_v15, %v7387_v28  ;;  %v1850_v28 = vadd.f32 %v7431_v39, %v1697_v32 }
 0x3cc   : > { %8641 = vst [vmem:[#allocation34_spill] sm:$0xff] %v7493_v0  ;;  %v7499_v29 = vpop.f32.mrf.mxu1  ;;  %v1693_v0 = vadd.f32 %v7399_v5, %v7385_v16  ;;  %v1694_v16 = vadd.f32 %v7411_v56, %v7383_v57  ;;  %v1845_v2 = vadd.f32 %v1777_v63, %v1692_v11  ;;  %v1853_v5 = vadd.f32 %v7421_v35, %v1700_v45  ;;  %v8650_v45 = vld [vmem:[#allocation27_spill] sm:$0xff] }
 0x3cd   : > { %v7497_v48 = vpop.f32.mrf.mxu0  ;;  %8644 = vst [vmem:[#allocation37_spill] sm:$0xff] %v7499_v29  ;;  %v1696_v29 = vadd.f32 %v1630_v8, %v1490_v55  ;;  %v1701_v55 = vadd.f32 %v7413_v20, %v7405_v43  ;;  %v1856_v8 = vadd.f32 %v7427_v36, %v1703_v40  ;;  %v7570_v49 = vpop.permute.xlu1 %2696 }
 0x3ce   : > { %8643 = vst [vmem:[#allocation36_spill] sm:$0xff] %v7497_v48  ;;  %v7511_v42 = vpop.f32.mrf.mxu1  ;;  %v1695_v48 = vadd.f32 %v7403_v46, %v7389_v1  ;;  %v1702_v1 = vadd.f32 %v7417_v54, %v1500_v61  ;;  %v1847_v4 = vadd.f32 %v7423_v22, %v1694_v16  ;;  %v1846_v57 = vadd.f32 %v7425_v59, %v1693_v0 }
 0x3cf   : > { %v7503_v50 = vpop.f32.mrf.mxu0  ;;  %v2019_v11 = vadd.f32 %v1951_v7, %v1845_v2  ;;  %v1849_v61 = vadd.f32 %v7433_v31, %v1696_v29  ;;  %v1852_v0 = vadd.f32 %v7439_v47, %v1699_v53  ;;  %v2027_v35 = vadd.f32 %v7451_v41, %v1853_v5  ;;  %v7561_v7 = vpop.permute.xlu0 %2711  ;;  %v8649_v41 = vld [vmem:[#allocation24_spill] sm:$0xff] }
 0x3d0   : > { %v7525_v24 = vpop.f32.mrf.mxu1  ;;  %v1848_v43 = vadd.f32 %v7429_v38, %v1695_v48  ;;  %v2020_v13 = vadd.f32 %v7437_v52, %v1846_v57  ;;  %v1854_v48 = vadd.f32 %v7443_v12, %v1701_v55  ;;  %v1855_v29 = vadd.f32 %v7447_v62, %v1702_v1  ;;  %v8645_v52 = vld [vmem:[#allocation25_spill] sm:$0xff]  ;;  %v8653_v1 = vld [vmem:[#allocation28_spill] sm:$0xff] }
 0x3d1   : > { %v7517_v21 = vpop.f32.mrf.mxu0  ;;  %v2211_v26 = vadd.f32 %v2143_v23, %v2019_v11  ;;  %v2023_v15 = vadd.f32 %v7445_v58, %v1849_v61  ;;  %v2026_v23 = vadd.f32 %v7453_v37, %v1852_v0  ;;  %v2021_v36 = vadd.f32 %v7455_v34, %v1847_v4  ;;  %v8647_v58 = vld [vmem:[#allocation22_spill] sm:$0xff] }
 0x3d2   : > { %v7536_v46 = vpop.f32.mrf.mxu1  ;;  %v2022_v20 = vadd.f32 %v7441_v25, %v1848_v43  ;;  %v2212_v63 = vadd.f32 %v2145_v19, %v2020_v13  ;;  %v2028_v38 = vadd.f32 %v7457_v51, %v1854_v48  ;;  %v2030_v39 = vadd.f32 %v7459_v33, %v1856_v8  ;;  %v8646_v25 = vld [vmem:[#allocation21_spill] sm:$0xff]  ;;  %v8655_v8 = vld [vmem:[#allocation31_spill] sm:$0xff]  ;;  %v8656_v13 = vld [vmem:[#allocation32_spill] sm:$0xff] }
 0x3d3   : > { %v2448_v14 = vpop.f32.mrf.mxu0  ;;  %v2364_v22 = vadd.f32 %v2296_v60, %v2211_v26  ;;  %v2029_v9 = vadd.f32 %v7461_v17, %v1855_v29  ;;  %v2024_v12 = vadd.f32 %v8646_v25, %v1850_v28  ;;  %v2219_v62 = vadd.f32 %v8647_v58, %v2027_v35  ;;  %v8651_v17 = vld [vmem:[#allocation30_spill] sm:$0xff] }
 0x3d4   : > { %v7547_v56 = vpop.f32.mrf.mxu1  ;;  %v2214_v47 = vadd.f32 %v8645_v52, %v2022_v20  ;;  %v2365_v19 = vadd.f32 %v7479_v44, %v2212_v63  ;;  %v2213_v34 = vadd.f32 %v8648_v6, %v2021_v36  ;;  %v2222_v51 = vadd.f32 %v8649_v41, %v2030_v39  ;;  %v8652_v44 = vld [vmem:[#allocation26_spill] sm:$0xff]  ;;  %v7584_v63 = vpop.permute.xlu0 %2701 }
 0x3d5   : > { %v2450_v3 = vpop.f32.mrf.mxu0  ;;  %v2516_v60 = vadd.f32 %v2448_v14, %v2364_v22  ;;  %v2215_v53 = vadd.f32 %v8650_v45, %v2023_v15  ;;  %v2216_v40 = vadd.f32 %v8652_v44, %v2024_v12  ;;  %v2217_v32 = vadd.f32 %v8653_v1, %v2025_v27  ;;  %v8654_v14 = vld [vmem:[#allocation29_spill] sm:$0xff]  ;;  %v8658_v20 = vld [vmem:[#allocation34_spill] sm:$0xff]  ;;  %v8659_v15 = vld [vmem:[#allocation35_spill] sm:$0xff] }
 0x3d6   : > { %v7555_v59 = vpop.f32.mrf.mxu1  ;;  %v2367_v16 = vadd.f32 %v8651_v17, %v2214_v47  ;;  %v2517_v2 = vadd.f32 %v2450_v3, %v2365_v19  ;;  %v2218_v5 = vadd.f32 %v8654_v14, %v2026_v23  ;;  %v2220_v4 = vadd.f32 %v7485_v18, %v2028_v38  ;;  %v8657_v3 = vld [vmem:[#allocation33_spill] sm:$0xff]  ;;  %v8660_v18 = vld [vmem:[#allocation36_spill] sm:$0xff] }
 0x3d7   : > { %v2452_v54 = vpop.f32.mrf.mxu0  ;;  %v2368_v43 = vadd.f32 %v8655_v8, %v2215_v53  ;;  %v2221_v0 = vadd.f32 %v8656_v13, %v2029_v9  ;;  %v2370_v26 = vadd.f32 %v8657_v3, %v2217_v32  ;;  %v2372_v48 = vadd.f32 %v8658_v20, %v2219_v62  ;;  %v8661_v38 = vld [vmem:[#allocation37_spill] sm:$0xff]  ;;  %v8662_v53 = vld [vmem:[#allocation4_spill] sm:$0xff] }
 0x3d8   : > { %v2519_v28 = vadd.f32 %v2452_v54, %v2367_v16  ;;  %v2371_v29 = vadd.f32 %v8659_v15, %v2218_v5  ;;  %v2366_v22 = vadd.f32 %v8660_v18, %v2213_v34  ;;  %v2373_v39 = vadd.f32 %v8661_v38, %v2220_v4 }
 0x3d9   : > { %v2454_v31 = vpop.f32.mrf.mxu0  ;;  %v2610_v33 = vpop.f32.mrf.mxu1  ;;  %v2375_v9 = vadd.f32 %v7503_v50, %v2222_v51  ;;  %v2374_v52 = vadd.f32 %v7511_v42, %v2221_v0  ;;  %v2369_v25 = vadd.f32 %v7517_v21, %v2216_v40  ;;  %v2524_v6 = vadd.f32 %v7525_v24, %v2372_v48  ;;  %v8663_v51 = vld [vmem:[#allocation5_spill] sm:$0xff] }
 0x3da   : > { %v2678_v55 = vadd.f32 %v2610_v33, %v2516_v60  ;;  %v2520_v47 = vadd.f32 %v2454_v31, %v2368_v43  ;;  %v2518_v34 = vadd.f32 %v7536_v46, %v2366_v22 }
 0x3db   : > { %v2458_v37 = vpop.f32.mrf.mxu0  ;;  %v2612_v11 = vpop.f32.mrf.mxu1  ;;  %v2527_v21 = vadd.f32 %v7547_v56, %v2375_v9 }
 0x3dc   : > { %v2714_v61 = vadd.f32 %v7570_v49, %v2678_v55  ;;  %v2679_v10 = vadd.f32 %v2612_v11, %v2517_v2  ;;  %v2522_v12 = vadd.f32 %v2458_v37, %v2370_v26  ;;  %v2521_v37 = vadd.f32 %v7555_v59, %v2369_v25 }
 0x3dd   : > { %v2460_v57 = vpop.f32.mrf.mxu0  ;;  %v2614_v35 = vpop.f32.mrf.mxu1 }
 0x3de   : > { %v2726_v23 = vmax.f32 %v2714_v61, 0.0  ;;  %v2715_v54 = vadd.f32 %v7570_v49, %v2679_v10  ;;  %v2681_v36 = vadd.f32 %v2614_v35, %v2519_v28  ;;  %v2523_v41 = vadd.f32 %v2460_v57, %v2371_v29 }
 0x3df   : > { %v2462_v27 = vpop.f32.mrf.mxu0  ;;  %v2616_v60 = vpop.f32.mrf.mxu1 }
 0x3e0   : > { %v2727_v58 = vmax.f32 %v2715_v54, 0.0  ;;  %v2717_v62 = vadd.f32 %v7584_v63, %v2681_v36  ;;  %v2682_v33 = vadd.f32 %v2616_v60, %v2520_v47  ;;  %v2738_v50 = vmul.f32 %v2726_v23, %v8662_v53 }
 0x3e1   : > { %v2464_v19 = vpop.f32.mrf.mxu0  ;;  %v2620_v45 = vpop.f32.mrf.mxu1  ;;  %v2525_v46 = vadd.f32 %v2462_v27, %v2373_v39 }
 0x3e2   : > { %v2739_v42 = vmul.f32 %v2727_v58, %v8663_v51  ;;  %v2729_v31 = vmax.f32 %v2717_v62, 0.0  ;;  %v2684_v17 = vadd.f32 %v2620_v45, %v2522_v12  ;;  %v2718_v2 = vadd.f32 %v7584_v63, %v2682_v33  ;;  %v7608_v27 = vpop.permute.xlu1 %2820 }
 0x3e3   : > { %v6162_v16 = vpop.f32.mrf.mxu0  ;;  %v2622_v24 = vpop.f32.mrf.mxu1  ;;  %v2526_v14 = vadd.f32 %v2464_v19, %v2374_v52  ;;  %6168 = vmatprep.mubr.msk.bf16.mxu1 %vm1306_vm0, %v7608_v27 }
 0x3e4   : > { %v2686_v55 = vadd.f32 %v6162_v16, %v2524_v6  ;;  %v5965_v44 = vpack.c.bf16 %v2739_v42, %v2738_v50  ;;  %v2720_v40 = vadd.f32 %v7542_v30, %v2684_v17  ;;  %v2685_v1 = vadd.f32 %v2622_v24, %v2523_v41  ;;  %v7649_v24 = vld [vmem:[#allocation3 + $0x38] ss:$20 sps:$4 sm:$0xff]  }
 0x3e5   : > { %v2663_v32 = vpop.f32.mrf.mxu0  ;;  %v2730_v5 = vmax.f32 %v2718_v2, 0.0  ;;  %v2624_v11 = vpop.f32.mrf.mxu1  ;;  %v2741_v56 = vmul.f32 %v2729_v31, %v8662_v53  ;;  %v8666_v2 = vld [vmem:[#allocation19_spill] sm:$0xff] }
 0x3e6   : > { %v2722_v4 = vadd.f32 %v7542_v30, %v2686_v55  ;;  %v2680_v57 = vadd.f32 %v2663_v32, %v2518_v34  ;;  %2790 = vst [vmem:[#allocation3 + $0x4] sm:$0xff] %v5965_v44  ;;  %v2732_v59 = vmax.f32 %v2720_v40, 0.0  ;;  %v2721_v8 = vadd.f32 %v7542_v30, %v2685_v1  ;;  %v8664_v30 = vld [vmem:[#allocation10_spill] sm:$0xff]  ;;  %v6427_v44 = vld [vmem:[#allocation3 + $0x28] ss:$20 sps:$4 sm:$0xff]   ;;  %v8668_v40 = vld [vmem:[#allocation20_spill] sm:$0xff] }
 0x3e7   : > { %v2687_v43 = vadd.f32 %v2624_v11, %v2525_v46  ;;  %v6163_v28 = vpop.f32.mrf.mxu0  ;;  %v2742_v61 = vmul.f32 %v2730_v5, %v8663_v51  ;;  %v2626_v3 = vpop.f32.mrf.mxu1  ;;  %v7617_v47 = vpack.c.bf16 %v2741_v56, %v2738_v50  ;;  %v6430_v32 = vld [vmem:[#allocation3 + $0x10] ss:$20 sps:$4 sm:$0xff]   ;;  %v7676_v5 = vld [vmem:[%s7357_s29 + $0x1c] ss:$12 sps:$4 sm:$0xff]  }
 0x3e8   : > { %v2734_v10 = vmax.f32 %v2722_v4, 0.0  ;;  %v2716_v13 = vadd.f32 %v7570_v49, %v2680_v57  ;;  %v2689_v0 = vadd.f32 %v6163_v28, %v2527_v21  ;;  %v2744_v26 = vmul.f32 %v2732_v59, %v8662_v53  ;;  %v7685_v4 = vld [vmem:[%s7357_s29 + $0x4] ss:$12 sps:$4 sm:$0xff]   ;;  %v7700_v57 = vpop.permute.xlu0 %2822  ;;  %v7718_v59 = vpop.permute.xlu1 %3128 }
 0x3e9   : > { %v2733_v20 = vmax.f32 %v2721_v8, 0.0  ;;  %v2723_v48 = vadd.f32 %v7561_v7, %v2687_v43  ;;  %v2688_v15 = vadd.f32 %v2626_v3, %v2526_v14  ;;  %v2666_v29 = vpop.f32.mrf.mxu0  ;;  %v5967_v35 = vpack.c.bf16 %v2742_v61, %v2741_v56 }
 0x3ea   : > { %v2746_v18 = vmul.f32 %v2734_v10, %v8664_v30  ;;  %v2728_v22 = vmax.f32 %v2716_v13, 0.0  ;;  %v2725_v23 = vadd.f32 %v7561_v7, %v2689_v0  ;;  %v2683_v38 = vadd.f32 %v2666_v29, %v2521_v37 }
 0x3eb   : > { %v2745_v49 = vmul.f32 %v2733_v20, %v8663_v51  ;;  %v2735_v54 = vmax.f32 %v2723_v48, 0.0  ;;  %v2724_v36 = vadd.f32 %v7561_v7, %v2688_v15  ;;  %2792 = vst [vmem:[#allocation3 + $0x18] sm:$0xff] %v5967_v35  ;;  %v7621_v62 = vpack.c.bf16 %v2742_v61, %v2739_v42  ;;  %v6417_v42 = vld [vmem:[#allocation3] ss:$20 sps:$4 sm:$0xff]  }
 0x3ec   : > { %v5970_v39 = vpack.c.bf16 %v2746_v18, %v2746_v18  ;;  %v2740_v9 = vmul.f32 %v2728_v22, %v8664_v30  ;;  %v2737_v52 = vmax.f32 %v2725_v23, 0.0  ;;  %v2719_v25 = vadd.f32 %v7584_v63, %v2683_v38  ;;  %v7705_v11 = vpop.permute.xlu0 %3130 }
 0x3ed   : > { %v5969_v19 = vpack.c.bf16 %v2745_v49, %v2744_v26  ;;  %v2736_v60 = vmax.f32 %v2724_v36, 0.0  ;;  %v2747_v7 = vmul.f32 %v2735_v54, %v8662_v53 }
 0x3ee   : > { %2795 = vst [vmem:[#allocation3 + $0x34] sm:$0xf] %v5970_v39  ;;  %v5966_v12 = vpack.c.bf16 %v2740_v9, %v2740_v9  ;;  %v2749_v58 = vmul.f32 %v2737_v52, %v8664_v30  ;;  %v2731_v34 = vmax.f32 %v2719_v25, 0.0 }
 0x3ef   : > { %2794 = vst [vmem:[#allocation3 + $0x2c] sm:$0xff] %v5969_v19  ;;  %v2748_v6 = vmul.f32 %v2736_v60, %v8663_v51  ;;  %v7626_v31 = vpack.c.bf16 %v2747_v7, %v2744_v26 }
 0x3f0   : > { %2791 = vst [vmem:[#allocation3 + $0xc] sm:$0xf] %v5966_v12  ;;  %v5972_v41 = vpack.c.bf16 %v2749_v58, %v2749_v58  ;;  %v2743_v45 = vmul.f32 %v2731_v34, %v8664_v30 }
 0x3f1   : > { %v5971_v33 = vpack.c.bf16 %v2748_v6, %v2747_v7  ;;  %v7628_v17 = vpack.c.bf16 %v2748_v6, %v2745_v49 }
 0x3f2   : > { %2797 = vst [vmem:[#allocation3 + $0x48] sm:$0xf] %v5972_v41  ;;  %v5968_v63 = vpack.c.bf16 %v2743_v45, %v2743_v45  ;;  %v6415_v50 = vld [vmem:[#allocation3 + $0x4] ss:$20 sps:$4 sm:$0xff]   ;;  %v6418_v16 = vld [vmem:[#allocation3 + $0x8] ss:$20 sps:$4 sm:$0xff]  }
 0x3f3   : > { %2796 = vst [vmem:[#allocation3 + $0x40] sm:$0xff] %v5971_v33  ;;  %2858 = vrot.lane.b32.xlu0 %v6415_v50, %s8585_s23  ;;  %2860 = vrot.lane.b32.xlu1 %v6418_v16, %s8585_s23 }
 0x3f4   : > { %2793 = vst [vmem:[#allocation3 + $0x20] sm:$0xf] %v5968_v63  ;;  %v8671_v63 = vmov 0  }
 0x3f7   : > { %2856 = vrot.lane.b32.xlu0 %v6417_v42, %s8585_s23 }
 0x3f9   : > { %v6428_v46 = vld [vmem:[#allocation3 + $0x34] ss:$20 sps:$4 sm:$0xff]  }
 0x3fa   : > { %v6421_v37 = vld [vmem:[#allocation3 + $0x30] ss:$20 sps:$4 sm:$0xff]   ;;  %v6423_v55 = vld [vmem:[#allocation3 + $0x2c] ss:$20 sps:$4 sm:$0xff]   ;;  %v6429_v1 = vld [vmem:[#allocation3 + $0x34] ss:$20 sps:$4 sm:$0xff]  }
 0x3fb   : > { %v6420_v21 = vld [vmem:[#allocation3 + $0xc] ss:$20 sps:$4 sm:$0xff]  }
 0x3fc   : > { %2998 = vrot.lane.b32.xlu0 %v6420_v21, %s8583_s22  ;;  %2862 = vrot.lane.b32.xlu1 %v6420_v21, %s8585_s23  ;;  %v6432_v14 = vld [vmem:[#allocation3 + $0xc] ss:$20 sps:$4 sm:$0xff]  }
 0x400   : > { %2992 = vrot.lane.b32.xlu0 %v6417_v42, %s8583_s22  ;;  %2996 = vrot.lane.b32.xlu1 %v6418_v16, %s8583_s22 }
 0x404   : > { %3134 = vrot.lane.b32.xlu0 %v6415_v50, %s8665_s12  ;;  %2994 = vrot.lane.b32.xlu1 %v6415_v50, %s8583_s22 }
 0x408   : > { %3132 = vrot.lane.b32.xlu0 %v6417_v42, %s8665_s12  ;;  %3136 = vrot.lane.b32.xlu1 %v6418_v16, %s8665_s12 }
 0x40c   : > { %3290 = vrot.lane.b32.xlu0 %v6420_v21, %s8581_s24  ;;  %3138 = vrot.lane.b32.xlu1 %v6420_v21, %s8665_s12 }
 0x410   : > { %3284 = vrot.lane.b32.xlu0 %v6417_v42, %s8581_s24  ;;  %3288 = vrot.lane.b32.xlu1 %v6418_v16, %s8581_s24 }
 0x414   : > { %2868 = vrot.lane.b32.xlu0 %v6421_v37, %s8585_s23  ;;  %3286 = vrot.lane.b32.xlu1 %v6415_v50, %s8581_s24 }
 0x418   : > { %3282 = vrot.lane.b32.xlu0 %v8666_v2, %s6537_s30  ;;  %2866 = vrot.lane.b32.xlu1 %v6423_v55, %s8585_s23 }
 0x41c   : > { %3664 = vrot.lane.b32.xlu0 %v7649_v24, %s8667_s25  ;;  %2864 = vrot.lane.b32.xlu1 %v6427_v44, %s8585_s23 }
 0x420   : > { %2870 = vrot.lane.b32.xlu0 %v6428_v46, %s8585_s23  ;;  %3280 = vrot.lane.b32.xlu1 %v8668_v40, %s6537_s30  ;;  %s534_s23 = scalar_lea.vmem %s8542_s7, %s6890_s27 }
 0x421   : > { %v4267_v15 = vld [vmem:[%s534_s23 + $0x18] sm:$0xff]  ;;  %v4265_v18 = vld [vmem:[%s534_s23 + $0x8] sm:$0xff]  ;;  %v4266_v49 = vld [vmem:[%s534_s23 + $0x10] sm:$0xff] }
 0x422   : > { %v4264_v38 = vld [vmem:[%s534_s23] sm:$0xff] }
 0x424   : > { %3004 = vrot.lane.b32.xlu0 %v6421_v37, %s8583_s22  ;;  %3662 = vrot.lane.b32.xlu1 %v6429_v1, %s8667_s25 }
 0x428   : > { %3000 = vrot.lane.b32.xlu0 %v6427_v44, %s8583_s22  ;;  %3006 = vrot.lane.b32.xlu1 %v6428_v46, %s8583_s22 }
 0x42c   : > { %3144 = vrot.lane.b32.xlu0 %v6421_v37, %s8665_s12  ;;  %3002 = vrot.lane.b32.xlu1 %v6423_v55, %s8583_s22  ;;  %s6311_s22 = smul.u32 12, %s8749_s14 }
 0x430   : > { %3656 = vrot.lane.b32.xlu0 %v6430_v32, %s8667_s25  ;;  %3142 = vrot.lane.b32.xlu1 %v6423_v55, %s8665_s12 }
 0x434   : > { %3650 = vrot.lane.b32.xlu0 %v7617_v47, %s8667_s25  ;;  %3140 = vrot.lane.b32.xlu1 %v6427_v44, %s8665_s12 }
 0x438   : > { %3146 = vrot.lane.b32.xlu0 %v6428_v46, %s8665_s12  ;;  %3654 = vrot.lane.b32.xlu1 %v6432_v14, %s8667_s25 }
 0x43c   : > { %3296 = vrot.lane.b32.xlu0 %v6421_v37, %s8581_s24  ;;  %3652 = vrot.lane.b32.xlu1 %v7621_v62, %s8667_s25 }
 0x440   : > { %3292 = vrot.lane.b32.xlu0 %v6427_v44, %s8581_s24  ;;  %3298 = vrot.lane.b32.xlu1 %v6428_v46, %s8581_s24 }
 0x444   : > { %3616 = vrot.lane.b32.xlu0 %v7676_v5, %s6532_s26  ;;  %3294 = vrot.lane.b32.xlu1 %v6423_v55, %s8581_s24  ;;  %s7960_s24 = scalar_lea.vmem %s8543_s8, %s6311_s22  ;;  %s8729_s22 = smov 1  }
 0x448   : > { %3804 = vrot.lane.b32.xlu0 %v7621_v62, %s8669_s11  ;;  %3614 = vrot.lane.b32.xlu1 %v7685_v4, %s6532_s26 }
 0x44c   : > { %3802 = vrot.lane.b32.xlu0 %v7617_v47, %s8669_s11  ;;  %3814 = vrot.lane.b32.xlu1 %v6429_v1, %s8669_s11 }
 0x450   : > { %3816 = vrot.lane.b32.xlu0 %v7649_v24, %s8669_s11  ;;  %3806 = vrot.lane.b32.xlu1 %v6432_v14, %s8669_s11 }
 0x454   : > { %3966 = vrot.lane.b32.xlu0 %v6429_v1, %s8670_s20  ;;  %3798 = vrot.lane.b32.xlu1 %v7685_v4, %s6533_s28 }
 0x458   : > { %3658 = vrot.lane.b32.xlu0 %v7626_v31, %s8667_s25  ;;  %3808 = vrot.lane.b32.xlu1 %v6430_v32, %s8669_s11 }
 0x45c   : > { %3812 = vrot.lane.b32.xlu0 %v7628_v17, %s8669_s11  ;;  %3660 = vrot.lane.b32.xlu1 %v7628_v17, %s8667_s25 }
 0x460   : > { %3800 = vrot.lane.b32.xlu0 %v7676_v5, %s6533_s28  ;;  %3968 = vrot.lane.b32.xlu1 %v7649_v24, %s8670_s20 }
 0x464   : > { %3960 = vrot.lane.b32.xlu0 %v6430_v32, %s8670_s20  ;;  %3810 = vrot.lane.b32.xlu1 %v7626_v31, %s8669_s11 }
 0x465   : > { %v2859_v56 = vpop.permute.xlu0 %2858  ;;  %v2861_v43 = vpop.permute.xlu1 %2860 }
 0x466   : > { %v2873_v58 = vsel %vm1293_vm5, %v2859_v56, %v2861_v43 }
 0x468   : > { %3954 = vrot.lane.b32.xlu0 %v7617_v47, %s8670_s20  ;;  %3958 = vrot.lane.b32.xlu1 %v6432_v14, %s8670_s20 }
 0x469   : > { %v2857_v8 = vpop.permute.xlu0 %2856 }
 0x46a   : > { %v2872_v41 = vsel %vm1293_vm5, %v2857_v8, %v2859_v56 }
 0x46c   : > { %3952 = vrot.lane.b32.xlu0 %v7676_v5, %s6537_s30  ;;  %3956 = vrot.lane.b32.xlu1 %v7621_v62, %s8670_s20 }
 0x46e   : > { %v7723_v28 = vpop.permute.xlu0 %2998  ;;  %v2863_v61 = vpop.permute.xlu1 %2862 }
 0x46f   : > { %v2874_v7 = vsel %vm1293_vm5, %v2861_v43, %v2863_v61 }
 0x470   : > { %3962 = vrot.lane.b32.xlu0 %v7626_v31, %s8670_s20  ;;  %3950 = vrot.lane.b32.xlu1 %v7685_v4, %s6537_s30 }
 0x472   : > { %v7729_v10 = vpop.permute.xlu0 %2992  ;;  %v7735_v13 = vpop.permute.xlu1 %2996 }
 0x473   : > { %v3010_v21 = vsel %vm1000_vm2, %v7735_v13, %v7723_v28 }
 0x474   : > { %4126 = vrot.lane.b32.xlu0 %v7628_v17, %s6528_s21  ;;  %3964 = vrot.lane.b32.xlu1 %v7628_v17, %s8670_s20 }
 0x476   : > { %v7737_v0 = vpop.permute.xlu0 %3134  ;;  %v7743_v3 = vpop.permute.xlu1 %2994 }
 0x477   : > { %v3009_v44 = vsel %vm1000_vm2, %v7743_v3, %v7735_v13 }
 0x478   : > { %4118 = vrot.lane.b32.xlu0 %v7621_v62, %s6528_s21  ;;  %4128 = vrot.lane.b32.xlu1 %v6429_v1, %s6528_s21 }
 0x47a   : > { %v7745_v26 = vpop.permute.xlu0 %3132  ;;  %v7750_v20 = vpop.permute.xlu1 %3136 }
 0x47b   : > { %v3149_v28 = vsel %vm1571_vm6, %v7737_v0, %v7750_v20 }
 0x47c   : > { %4116 = vrot.lane.b32.xlu0 %v7617_v47, %s6528_s21  ;;  %4124 = vrot.lane.b32.xlu1 %v7626_v31, %s6528_s21 }
 0x47e   : > { %v7752_v48 = vpop.permute.xlu0 %3290  ;;  %v7761_v29 = vpop.permute.xlu1 %3138 }
 0x480   : > { %4122 = vrot.lane.b32.xlu0 %v6430_v32, %s6528_s21  ;;  %4120 = vrot.lane.b32.xlu1 %v6432_v14, %s6528_s21  ;;  %v3008_v14 = vsel %vm1000_vm2, %v7729_v10, %v7743_v3  ;;  %v3150_v10 = vsel %vm1571_vm6, %v7750_v20, %v7761_v29 }
 0x482   : > { %v7763_v35 = vpop.permute.xlu0 %3284  ;;  %v7766_v22 = vpop.permute.xlu1 %3288 }
 0x483   : > { %v3302_v29 = vsel %vm1724_vm8, %v7766_v22, %v7752_v48 }
 0x484   : > { %4285 = vperm.xlu0 %6380, %v4267_v15   ;;  %4130 = vrot.lane.b32.xlu1 %v7649_v24, %s6528_s21 }
 0x486   : > { %v2869_v23 = vpop.permute.xlu0 %2868  ;;  %v7770_v54 = vpop.permute.xlu1 %3286 }
 0x487   : > { %v3301_v48 = vsel %vm1724_vm8, %v7770_v54, %v7766_v22 }
 0x488   : > { %4275 = vperm.xlu0 %6380, %v4265_v18   ;;  %4280 = vperm.xlu1 %6381, %v4266_v49  }
 0x48a   : > { %v7772_v36 = vpop.permute.xlu0 %3282  ;;  %v2867_v39 = vpop.permute.xlu1 %2866 }
 0x48b   : > { %v2876_v52 = vsel %vm1293_vm5, %v2867_v39, %v2869_v23 }
 0x48c   : > { %4270 = vperm.xlu1 %6381, %v4264_v38   ;;  %2902 = vmatprep.subr.bf16.mxu0 %v2876_v52 }
 0x48e   : > { %v7774_v9 = vpop.permute.xlu0 %3664  ;;  %v2865_v19 = vpop.permute.xlu1 %2864 }
 0x48f   : > { %v2875_v25 = vsel %vm1293_vm5, %v2865_v19, %v2867_v39  ;;  %v6435_v39 = vld [vmem:[#allocation3 + $0x34] ss:$20 sps:$4 sm:$0xff]  }
 0x490   : > { %2903 = vmatpush1.bf16.msra.mxu0 %v2875_v25 }
 0x491   : > { %2904 = vmatprep.subr.bf16.mxu0 %v2873_v58 }
 0x492   : > { %v2871_v60 = vpop.permute.xlu0 %2870  ;;  %v7781_v6 = vpop.permute.xlu1 %3280 }
 0x493   : > { %v2877_v12 = vsel %vm1293_vm5, %v2869_v23, %v2871_v60 }
 0x494   : > { %6164 = vmatprep.subr.bf16.mxu1 %v2877_v12  ;;  %2905 = vmatpush1.bf16.msra.mxu0 %v2872_v41 }
 0x495   : > { %6165 = vmatpush3.bf16.msra.mxu1 %v2877_v12 }
 0x496   : > { %6166 = vmatprep.subr.bf16.mxu1 %v2874_v7  ;;  %v3005_v34 = vpop.permute.xlu0 %3004  ;;  %v7784_v33 = vpop.permute.xlu1 %3662 }
 0x497   : > { %5847 = vmatmul.mubr.msk.bf16.vlgmr.msra.gmra.mxu0 %vm1306_vm0, %v7608_v27 }
 0x498   : > { %2932 = vmatprep.mubr.bf16.mxu0 %v8671_v63 }
 0x499   : > { %6167 = vmatpush3.bf16.msra.mxu1 %v2874_v7 }
 0x49a   : > { %v3001_v45 = vpop.permute.xlu0 %3000  ;;  %v3007_v50 = vpop.permute.xlu1 %3006 }
 0x49b   : > { %v3013_v16 = vsel %vm1000_vm2, %v3005_v34, %v3007_v50 }
 0x49c   : > { %6169 = vmatmul.mubr.msk.bf16.vlgmr.msra.gmra.mxu1 %vm1306_vm0, %v7700_v57  ;;  %6172 = vmatprep.subr.bf16.mxu0 %v3013_v16 }
 0x49d   : > { %3058 = vmatprep.mubr.bf16.mxu1 %v8671_v63  ;;  %6173 = vmatpush3.bf16.msra.mxu0 %v3013_v16 }
 0x49e   : > { %v3145_v42 = vpop.permute.xlu0 %3144  ;;  %v3003_v37 = vpop.permute.xlu1 %3002  ;;  %6174 = vmatprep.subr.bf16.mxu0 %v3010_v21 }
 0x49f   : > { %5848 = vmatmul.mubr.msk.bf16.gmra.mxu0 %vm1306_vm0, %v7700_v57  ;;  %v3012_v55 = vsel %vm1000_vm2, %v3003_v37, %v3005_v34  ;;  %v3011_v24 = vsel %vm1000_vm2, %v3001_v45, %v3003_v37 }
 0x4a0   : > { %3038 = vmatprep.subr.bf16.mxu1 %v3012_v55  ;;  %6176 = vmatprep.mubr.msk.bf16.mxu0 %vm1306_vm0, %v8668_v40 }
 0x4a1   : > { %3039 = vmatpush1.bf16.msra.mxu1 %v3011_v24  ;;  %6175 = vmatpush3.bf16.msra.mxu0 %v3010_v21 }
 0x4a2   : > { %v7796_v27 = vpop.permute.xlu0 %3656  ;;  %v3143_v46 = vpop.permute.xlu1 %3142  ;;  %3040 = vmatprep.subr.bf16.mxu1 %v3009_v44 }
 0x4a3   : > { %v3152_v32 = vsel %vm1571_vm6, %v3143_v46, %v3145_v42 }
 0x4a4   : > { %3178 = vmatprep.subr.bf16.mxu0 %v3152_v32 }
 0x4a5   : > { %3041 = vmatpush1.bf16.msra.mxu1 %v3008_v14 }
 0x4a6   : > { %v7807_v1 = vpop.permute.xlu0 %3650  ;;  %v3141_v57 = vpop.permute.xlu1 %3140 }
 0x4a7   : > { %v3151_v8 = vsel %vm1571_vm6, %v3141_v57, %v3143_v46  ;;  %6177 = vmatmul.mubr.msk.bf16.vlgmr.msra.gmra.mxu0 %vm1306_vm0, %v8666_v2 }
 0x4a8   : > { %5851 = vmatmul.mubr.msk.bf16.vlgmr.msra.gmra.mxu1 %vm1306_vm0, %v8668_v40  ;;  %3179 = vmatpush1.bf16.msra.mxu0 %v3151_v8  ;;  %v3148_v40 = vsel %vm1571_vm6, %v7745_v26, %v7737_v0 }
 0x4a9   : > { %3180 = vmatprep.subr.bf16.mxu0 %v3149_v28  ;;  %3198 = vmatprep.mubr.bf16.mxu0 %v8671_v63 }
 0x4aa   : > { %v3147_v56 = vpop.permute.xlu0 %3146  ;;  %v7822_v61 = vpop.permute.xlu1 %3654  ;;  %3068 = vmatprep.mubr.bf16.mxu1 %v8671_v63 }
 0x4ab   : > { %v3153_v43 = vsel %vm1571_vm6, %v3145_v42, %v3147_v56 }
 0x4ac   : > { %6180 = vmatprep.subr.bf16.mxu1 %v3153_v43  ;;  %3181 = vmatpush1.bf16.msra.mxu0 %v3148_v40 }
 0x4ad   : > { %6181 = vmatpush3.bf16.msra.mxu1 %v3153_v43 }
 0x4ae   : > { %v3297_v13 = vpop.permute.xlu0 %3296  ;;  %6182 = vmatprep.subr.bf16.mxu1 %v3150_v10  ;;  %v7832_v3 = vpop.permute.xlu1 %3652 }
 0x4af   : > { %5855 = vmatmul.mubr.msk.bf16.vlgmr.msra.gmra.mxu0 %vm1306_vm0, %v7718_v59  ;;  %v3666_v41 = vsel %vm8677_vm11, %v7807_v1, %v7832_v3 }
 0x4b0   : > { %5852 = vmatmul.mubr.msk.bf16.gmra.mxu1 %vm1306_vm0, %v8666_v2  ;;  %3208 = vmatprep.mubr.bf16.mxu0 %v8671_v63 }
 0x4b1   : > { %6183 = vmatpush3.bf16.msra.mxu1 %v3150_v10  ;;  %6184 = vmatprep.mubr.msk.bf16.mxu1 %vm1306_vm0, %v7718_v59 }
 0x4b2   : > { %v3293_v15 = vpop.permute.xlu0 %3292  ;;  %v3299_v0 = vpop.permute.xlu1 %3298 }
 0x4b3   : > { %v3305_v20 = vsel %vm1724_vm8, %v3297_v13, %v3299_v0 }
 0x4b4   : > { %6188 = vmatprep.subr.bf16.mxu0 %v3305_v20 }
 0x4b5   : > { %6189 = vmatpush3.bf16.msra.mxu0 %v3305_v20  ;;  %v6437_v20 = vld [vmem:[%s7357_s29 + $0x8] ss:$12 sps:$4 sm:$0xff]  }
 0x4b6   : > { %v7841_v26 = vpop.permute.xlu0 %3616  ;;  %v3295_v18 = vpop.permute.xlu1 %3294  ;;  %6190 = vmatprep.subr.bf16.mxu0 %v3302_v29 }
 0x4b7   : > { %5856 = vmatmul.mubr.msk.bf16.gmra.mxu0 %vm1306_vm0, %v7705_v11  ;;  %v3304_v2 = vsel %vm1724_vm8, %v3295_v18, %v3297_v13  ;;  %v3303_v59 = vsel %vm1724_vm8, %v3293_v15, %v3295_v18 }
 0x4b8   : > { %6185 = vmatmul.mubr.msk.bf16.vlgmr.msra.gmra.mxu1 %vm1306_vm0, %v7705_v11  ;;  %3330 = vmatprep.subr.bf16.mxu1 %v3304_v2  ;;  %v3300_v11 = vsel %vm1724_vm8, %v7763_v35, %v7770_v54 }
 0x4b9   : > { %6192 = vmatprep.mubr.msk.bf16.mxu0 %vm1306_vm0, %v7781_v6  ;;  %3331 = vmatpush1.bf16.msra.mxu1 %v3303_v59  ;;  %v6438_v59 = vld [vmem:[%s7357_s29 + $0x20] ss:$12 sps:$4 sm:$0xff]   ;;  %s8728_s29 = smov 19  }
 0x4ba   : > { %v7847_v23 = vpop.permute.xlu0 %3804  ;;  %6191 = vmatpush3.bf16.msra.mxu0 %v3302_v29  ;;  %v3615_v49 = vpop.permute.xlu1 %3614  ;;  %3332 = vmatprep.subr.bf16.mxu1 %v3301_v48  ;;  %v7963_v48 = vld [vmem:[%s7960_s24] sm:$0x7] }
 0x4bb   : > { %3504 = vmatprep.subr.bf16.mxu0 %v7628_v17  ;;  %3350 = vmatprep.mubr.bf16.mxu1 %v8671_v63  ;;  %v6436_v17 = vld [vmem:[#allocation3 + $0xc] ss:$20 sps:$4 sm:$0xff]   ;;  %8678 = vst [vmem:[#allocation25_spill] sm:$0xff] %v7963_v48 }
 0x4bd   : > { %3333 = vmatpush1.bf16.msra.mxu1 %v3300_v11  ;;  %v4888_v11 = vld [vmem:[%s7960_s24 + $0x4] sm:$0x7] }
 0x4be   : > { %v7860_v38 = vpop.permute.xlu0 %3802  ;;  %v3815_v52 = vpop.permute.xlu1 %3814  ;;  %6196 = vmatprep.subr.bf16.mxu1 %v6435_v39 }
 0x4bf   : > { %6193 = vmatmul.mubr.msk.bf16.vlgmr.msra.gmra.mxu0 %vm1306_vm0, %v7772_v36 }
 0x4c0   : > { %3505 = vmatpush1.bf16.msra.mxu0 %v7626_v31  ;;  %5859 = vmatmul.mubr.msk.bf16.vlgmr.msra.gmra.mxu1 %vm1306_vm0, %v7781_v6  ;;  %v3671_v31 = vsel %vm8672_vm1, %v7784_v33, %v7774_v9 }
 0x4c1   : > { %3506 = vmatprep.subr.bf16.mxu0 %v7621_v62  ;;  %6197 = vmatpush3.bf16.msra.mxu1 %v6435_v39  ;;  %v3668_v62 = vsel %vm8673_vm4, %v7822_v61, %v7796_v27  ;;  %v3818_v27 = vsel %vm2243_vm15, %v7860_v38, %v7847_v23  ;;  %v7970_v39 = vcombine.low %v4888_v11, %v4888_v11 }
 0x4c2   : > { %v3817_v19 = vpop.permute.xlu0 %3816  ;;  %v3807_v22 = vpop.permute.xlu1 %3806  ;;  %6198 = vmatprep.subr.bf16.mxu1 %v6436_v17  ;;  %3524 = vmatprep.mubr.bf16.mxu0 %v8671_v63 }
 0x4c3   : > { %3360 = vmatprep.mubr.bf16.mxu1 %v8671_v63  ;;  %v3819_v42 = vsel %vm2243_vm15, %v7847_v23, %v3807_v22  ;;  %8679 = vst [vmem:[#allocation21_spill] sm:$0xff] %v7970_v39 }
 0x4c4   : > { %3507 = vmatpush1.bf16.msra.mxu0 %v7617_v47 }
 0x4c5   : > { %6204 = vmatprep.subr.bf16.mxu0 %v3671_v31  ;;  %6199 = vmatpush3.bf16.msra.mxu1 %v6436_v17 }
 0x4c6   : > { %v7873_v35 = vpop.permute.xlu0 %3966  ;;  %v3799_v54 = vpop.permute.xlu1 %3798 }
 0x4c7   : > { %5871 = vmatmul.mubr.msk.bf16.vlgmr.msra.gmra.mxu0 %vm1306_vm0, %v7685_v4 }
 0x4c8   : > { %6205 = vmatpush3.bf16.msra.mxu0 %v3671_v31  ;;  %5860 = vmatmul.mubr.msk.bf16.gmra.mxu1 %vm1306_vm0, %v7772_v36 }
 0x4c9   : > { %6206 = vmatprep.subr.bf16.mxu0 %v3668_v62  ;;  %3534 = vmatprep.mubr.bf16.mxu0 %v8671_v63 }
 0x4ca   : > { %v3659_v60 = vpop.permute.xlu0 %3658  ;;  %v3809_v47 = vpop.permute.xlu1 %3808  ;;  %6200 = vmatprep.mubr.msk.bf16.mxu1 %vm1306_vm0, %v7685_v4  ;;  %v3667_v4 = vsel %vm8676_vm10, %v7832_v3, %v7822_v61 }
 0x4cb   : > { %v3820_v16 = vsel %vm2243_vm15, %v3807_v22, %v3809_v47 }
 0x4cc   : > { %6207 = vmatpush3.bf16.msra.mxu0 %v3668_v62 }
 0x4ce   : > { %v3813_v9 = vpop.permute.xlu0 %3812  ;;  %v3661_v12 = vpop.permute.xlu1 %3660 }
 0x4cf   : > { %v3822_v25 = vsel %vm2243_vm15, %v3813_v9, %v3815_v52  ;;  %v3669_v36 = vsel %vm8674_vm9, %v3659_v60, %v3661_v12  ;;  %5872 = vmatmul.mubr.msk.bf16.gmra.mxu0 %vm1306_vm0, %v7676_v5  ;;  %v3670_v7 = vsel %vm8675_vm13, %v3661_v12, %v7784_v33 }
 0x4d0   : > { %3848 = vmatprep.subr.bf16.mxu0 %v3822_v25  ;;  %6201 = vmatmul.mubr.msk.bf16.vlgmr.msra.gmra.mxu1 %vm1306_vm0, %v7676_v5  ;;  %v3823_v5 = vsel %vm2243_vm15, %v3815_v52, %v3817_v19 }
 0x4d1   : > { %3696 = vmatprep.subr.bf16.mxu1 %v3670_v7  ;;  %6208 = vmatprep.mubr.msk.bf16.mxu0 %vm1306_vm0, %v3615_v49 }
 0x4d2   : > { %v3801_v58 = vpop.permute.xlu0 %3800  ;;  %3697 = vmatpush1.bf16.msra.mxu1 %v3669_v36  ;;  %v3969_v6 = vpop.permute.xlu1 %3968  ;;  %3716 = vmatprep.mubr.bf16.mxu1 %v8671_v63 }
 0x4d3   : > { %3698 = vmatprep.subr.bf16.mxu1 %v3667_v4  ;;  %v3975_v55 = vsel %vm680_vm14, %v7873_v35, %v3969_v6 }
 0x4d6   : > { %v3961_v34 = vpop.permute.xlu0 %3960  ;;  %3699 = vmatpush1.bf16.msra.mxu1 %v3666_v41  ;;  %v3811_v33 = vpop.permute.xlu1 %3810 }
 0x4d7   : > { %6212 = vmatprep.subr.bf16.mxu1 %v3823_v5  ;;  %v3821_v50 = vsel %vm2243_vm15, %v3811_v33, %v3813_v9  ;;  %6209 = vmatmul.mubr.msk.bf16.vlgmr.msra.gmra.mxu0 %vm1306_vm0, %v7841_v26 }
 0x4d8   : > { %3849 = vmatpush1.bf16.msra.mxu0 %v3821_v50  ;;  %3868 = vmatprep.mubr.bf16.mxu0 %v8671_v63 }
 0x4d9   : > { %5883 = vmatmul.mubr.msk.bf16.vlgmr.msra.gmra.mxu1 %vm1306_vm0, %v3615_v49  ;;  %3850 = vmatprep.subr.bf16.mxu0 %v3819_v42  ;;  %v5909_v49 = vcombine.low %v7963_v48, %v7963_v48 }
 0x4da   : > { %v3955_v45 = vpop.permute.xlu0 %3954  ;;  %6213 = vmatpush3.bf16.msra.mxu1 %v3823_v5  ;;  %v3959_v21 = vpop.permute.xlu1 %3958  ;;  %3726 = vmatprep.mubr.bf16.mxu1 %v8671_v63 }
 0x4db   : > { %6214 = vmatprep.subr.bf16.mxu1 %v3820_v16  ;;  %v3972_v46 = vsel %vm680_vm14, %v3959_v21, %v3961_v34  ;;  %4396 = vrot.lane.b32.xlu1 %v5909_v49, %s6532_s26 }
 0x4dc   : > { %3851 = vmatpush1.bf16.msra.mxu0 %v3818_v27  ;;  %4654 = vrot.lane.b32.xlu0 %v5909_v49, %s6533_s28 }
 0x4dd   : > { %6220 = vmatprep.subr.bf16.mxu0 %v3975_v55 }
 0x4de   : > { %v3953_v37 = vpop.permute.xlu0 %3952  ;;  %6215 = vmatpush3.bf16.msra.mxu1 %v3820_v16  ;;  %v3957_v24 = vpop.permute.xlu1 %3956 }
 0x4df   : > { %5887 = vmatmul.mubr.msk.bf16.vlgmr.msra.gmra.mxu0 %vm1306_vm0, %v3799_v54  ;;  %v3971_v8 = vsel %vm680_vm14, %v3957_v24, %v3959_v21  ;;  %v3970_v10 = vsel %vm680_vm14, %v3955_v45, %v3957_v24  ;;  %4771 = vrot.lane.b32.xlu1 %v5909_v49, %s6537_s30 }
 0x4e0   : > { %6221 = vmatpush3.bf16.msra.mxu0 %v3975_v55  ;;  %3878 = vmatprep.mubr.bf16.mxu0 %v8671_v63 }
 0x4e1   : > { %5884 = vmatmul.mubr.msk.bf16.gmra.mxu1 %vm1306_vm0, %v7841_v26  ;;  %6222 = vmatprep.subr.bf16.mxu0 %v3972_v46 }
 0x4e2   : > { %v3963_v44 = vpop.permute.xlu0 %3962  ;;  %6216 = vmatprep.mubr.msk.bf16.mxu1 %vm1306_vm0, %v3799_v54  ;;  %v3951_v1 = vpop.permute.xlu1 %3950  ;;  %5027 = vrot.lane.b32.xlu0 %v7970_v39, %s6532_s26  ;;  %s8727_s26 = smov 18  }
 0x4e4   : > { %6223 = vmatpush3.bf16.msra.mxu0 %v3972_v46 }
 0x4e6   : > { %v4127_v32 = vpop.permute.xlu0 %4126  ;;  %v3965_v14 = vpop.permute.xlu1 %3964 }
 0x4e7   : > { %v3973_v57 = vsel %vm680_vm14, %v3963_v44, %v3965_v14  ;;  %5888 = vmatmul.mubr.msk.bf16.gmra.mxu0 %vm1306_vm0, %v3801_v58  ;;  %v3974_v56 = vsel %vm680_vm14, %v3965_v14, %v7873_v35 }
 0x4e8   : > { %4000 = vmatprep.subr.bf16.mxu1 %v3974_v56  ;;  %6224 = vmatprep.mubr.msk.bf16.mxu0 %vm1306_vm0, %v3951_v1 }
 0x4e9   : > { %6217 = vmatmul.mubr.msk.bf16.vlgmr.msra.gmra.mxu1 %vm1306_vm0, %v3801_v58 }
 0x4ea   : > { %4001 = vmatpush1.bf16.msra.mxu1 %v3973_v57  ;;  %v4129_v43 = vpop.permute.xlu1 %4128  ;;  %4020 = vmatprep.mubr.bf16.mxu1 %v8671_v63  ;;  %v4119_v28 = vpop.permute.xlu0 %4118 }
 0x4eb   : > { %4002 = vmatprep.subr.bf16.mxu1 %v3971_v8  ;;  %v4136_v61 = vsel %vm712_vm7, %v4127_v32, %v4129_v43 }
 0x4ec   : > { %4162 = vmatprep.subr.bf16.mxu0 %v4136_v61 }
 0x4ee   : > { %4003 = vmatpush1.bf16.msra.mxu1 %v3970_v10  ;;  %v4125_v13 = vpop.permute.xlu1 %4124  ;;  %v4117_v3 = vpop.permute.xlu0 %4116 }
 0x4ef   : > { %v4135_v40 = vsel %vm712_vm7, %v4125_v13, %v4127_v32  ;;  %6225 = vmatmul.mubr.msk.bf16.vlgmr.msra.gmra.mxu0 %vm1306_vm0, %v3953_v37  ;;  %v4132_v26 = vsel %vm712_vm7, %v4117_v3, %v4119_v28 }
 0x4f0   : > { %4163 = vmatpush1.bf16.msra.mxu0 %v4135_v40  ;;  %4182 = vmatprep.mubr.bf16.mxu0 %v8671_v63 }
 0x4f1   : > { %5891 = vmatmul.mubr.msk.bf16.vlgmr.msra.gmra.mxu1 %vm1306_vm0, %v3951_v1 }
 0x4f2   : > { %4030 = vmatprep.mubr.bf16.mxu1 %v8671_v63  ;;  %v4121_v15 = vpop.permute.xlu1 %4120  ;;  %v4123_v23 = vpop.permute.xlu0 %4122 }
 0x4f3   : > { %v4133_v0 = vsel %vm712_vm7, %v4119_v28, %v4121_v15  ;;  %v4134_v2 = vsel %vm712_vm7, %v4121_v15, %v4123_v23 }
 0x4f4   : > { %4164 = vmatprep.subr.bf16.mxu0 %v4133_v0 }
 0x4f5   : > { %4165 = vmatpush1.bf16.msra.mxu0 %v4132_v26 }
 0x4f6   : > { %v4131_v29 = vpop.permute.xlu1 %4130 }
 0x4f7   : > { %v4137_v18 = vsel %vm712_vm7, %v4129_v43, %v4131_v29 }
 0x4f8   : > { %5897 = vmatmul.mubr.msk.bf16.vlgmr.msra.gmra.mxu0 %vm1306_vm0, %v6437_v20  ;;  %6228 = vmatprep.subr.bf16.mxu1 %v4137_v18 }
 0x4f9   : > { %5892 = vmatmul.mubr.msk.bf16.gmra.mxu1 %vm1306_vm0, %v3953_v37  ;;  %4192 = vmatprep.mubr.bf16.mxu0 %v8671_v63 }
 0x4fa   : > { %6229 = vmatpush3.bf16.msra.mxu1 %v4137_v18  ;;  %6232 = vmatprep.mubr.msk.bf16.mxu1 %vm1306_vm0, %v6437_v20 }
 0x4fb   : > { %6230 = vmatprep.subr.bf16.mxu1 %v4134_v2 }
 0x4fe   : > { %6231 = vmatpush3.bf16.msra.mxu1 %v4134_v2 }
 0x500   : > { %5898 = vmatmul.mubr.msk.bf16.gmra.mxu0 %vm1306_vm0, %v6438_v59 }
 0x501   : > { %6233 = vmatmul.mubr.msk.bf16.vlgmr.msra.gmra.mxu1 %vm1306_vm0, %v6438_v59 }
 0x502   : > { %4493 = vmatprep.mubr.bf16.mxu1 %v8671_v63 }
 0x557   : > { %v2924_v38 = vpop.f32.mrf.mxu0 }
 0x559   : > { %v2926_v52 = vpop.f32.mrf.mxu0 }
 0x55b   : > { %v2928_v17 = vpop.f32.mrf.mxu0 }
 0x55c   : > { %v6170_v19 = vpop.f32.mrf.mxu1 }
 0x55d   : > { %v2930_v22 = vpop.f32.mrf.mxu0 }
 0x55e   : > { %v2977_v35 = vpop.f32.mrf.mxu1 }
 0x55f   : > { %v2934_v31 = vpop.f32.mrf.mxu0 }
 0x560   : > { %v6171_v60 = vpop.f32.mrf.mxu1 }
 0x561   : > { %v2936_v54 = vpop.f32.mrf.mxu0 }
 0x562   : > { %v2980_v9 = vpop.f32.mrf.mxu1 }
 0x563   : > { %v2938_v62 = vpop.f32.mrf.mxu0 }
 0x565   : > { %v2940_v47 = vpop.f32.mrf.mxu0 }
 0x567   : > { %v6178_v25 = vpop.f32.mrf.mxu0 }
 0x568   : > { %v7975_v12 = vadd.f32 %v6178_v25, %v6170_v19  ;;  %v3060_v58 = vpop.f32.mrf.mxu1 }
 0x569   : > { %v7977_v36 = vadd.f32 %v3060_v58, %v2924_v38  ;;  %v3113_v7 = vpop.f32.mrf.mxu0 }
 0x56a   : > { %v7979_v4 = vadd.f32 %v3113_v7, %v2977_v35  ;;  %v3062_v6 = vpop.f32.mrf.mxu1 }
 0x56b   : > { %v7981_v34 = vadd.f32 %v3062_v6, %v2926_v52  ;;  %v6179_v41 = vpop.f32.mrf.mxu0 }
 0x56c   : > { %v7983_v5 = vadd.f32 %v6179_v41, %v6171_v60  ;;  %v3064_v33 = vpop.f32.mrf.mxu1 }
 0x56d   : > { %v7985_v45 = vadd.f32 %v3064_v33, %v2928_v17  ;;  %v3116_v50 = vpop.f32.mrf.mxu0 }
 0x56e   : > { %v7987_v42 = vadd.f32 %v3116_v50, %v2980_v9  ;;  %v3066_v16 = vpop.f32.mrf.mxu1 }
 0x56f   : > { %v7989_v21 = vadd.f32 %v3066_v16, %v2930_v22  ;;  %v7991_v37 = vpop.f32.mrf.mxu0 }
 0x570   : > { %v3070_v27 = vpop.f32.mrf.mxu1 }
 0x571   : > { %v7993_v55 = vadd.f32 %v3070_v27, %v2934_v31  ;;  %v7995_v24 = vpop.f32.mrf.mxu0 }
 0x572   : > { %v3072_v44 = vpop.f32.mrf.mxu1 }
 0x573   : > { %v7997_v46 = vadd.f32 %v3072_v44, %v2936_v54  ;;  %v3204_v1 = vpop.f32.mrf.mxu0 }
 0x574   : > { %v3074_v32 = vpop.f32.mrf.mxu1 }
 0x575   : > { %v7999_v14 = vadd.f32 %v3074_v32, %v2938_v62  ;;  %v3206_v57 = vpop.f32.mrf.mxu0 }
 0x576   : > { %v3076_v56 = vpop.f32.mrf.mxu1 }
 0x577   : > { %v8001_v8 = vadd.f32 %v3076_v56, %v2940_v47  ;;  %v3210_v43 = vpop.f32.mrf.mxu0 }
 0x578   : > { %v6186_v28 = vpop.f32.mrf.mxu1 }
 0x579   : > { %v3212_v61 = vpop.f32.mrf.mxu0 }
 0x57a   : > { %v3253_v10 = vpop.f32.mrf.mxu1 }
 0x57b   : > { %v3214_v13 = vpop.f32.mrf.mxu0 }
 0x57c   : > { %v6187_v40 = vpop.f32.mrf.mxu1 }
 0x57d   : > { %v3216_v3 = vpop.f32.mrf.mxu0 }
 0x57e   : > { %v3256_v15 = vpop.f32.mrf.mxu1 }
 0x57f   : > { %v6194_v0 = vpop.f32.mrf.mxu0 }
 0x580   : > { %v3352_v26 = vpop.f32.mrf.mxu1 }
 0x581   : > { %v8003_v20 = vpop.f32.mrf.mxu0 }
 0x582   : > { %v3354_v29 = vpop.f32.mrf.mxu1 }
 0x583   : > { %v6195_v18 = vpop.f32.mrf.mxu0 }
 0x584   : > { %v3356_v23 = vpop.f32.mrf.mxu1 }
 0x585   : > { %v8005_v2 = vpop.f32.mrf.mxu0 }
 0x586   : > { %v8007_v59 = vpop.f32.mrf.mxu1 }
 0x587   : > { %v3526_v49 = vpop.f32.mrf.mxu0 }
 0x588   : > { %v8009_v38 = vpop.f32.mrf.mxu1 }
 0x589   : > { %v8011_v11 = vpop.f32.mrf.mxu0 }
 0x58a   : > { %v8013_v52 = vpop.f32.mrf.mxu1 }
 0x58b   : > { %v8015_v19 = vpop.f32.mrf.mxu0 }
 0x58c   : > { %v8017_v17 = vpop.f32.mrf.mxu1 }
 0x58d   : > { %v8019_v22 = vpop.f32.mrf.mxu0 }
 0x58e   : > { %v8021_v35 = vpop.f32.mrf.mxu1 }
 0x58f   : > { %v8023_v31 = vpop.f32.mrf.mxu0 }
 0x590   : > { %v8025_v54 = vpop.f32.mrf.mxu1 }
 0x591   : > { %v8027_v60 = vpop.f32.mrf.mxu0 }
 0x592   : > { %v8029_v62 = vpop.f32.mrf.mxu1 }
 0x593   : > { %v8031_v47 = vpop.f32.mrf.mxu0 }
 0x594   : > { %v8033_v9 = vpop.f32.mrf.mxu1 }
 0x595   : > { %v8035_v25 = vpop.f32.mrf.mxu0 }
 0x596   : > { %v8037_v58 = vpop.f32.mrf.mxu1 }
 0x597   : > { %v8039_v7 = vpop.f32.mrf.mxu0 }
 0x599   : > { %v3718_v6 = vpop.f32.mrf.mxu1  ;;  %v8041_v41 = vpop.f32.mrf.mxu0 }
 0x59a   : > { %8680 = vst [vmem:[#allocation22_spill] sm:$0xff] %v8041_v41 }
 0x59b   : > { %v3720_v33 = vpop.f32.mrf.mxu1  ;;  %v8043_v50 = vpop.f32.mrf.mxu0 }
 0x59c   : > { %8681 = vst [vmem:[#allocation23_spill] sm:$0xff] %v8043_v50 }
 0x59d   : > { %v8045_v16 = vpop.f32.mrf.mxu1  ;;  %v8047_v27 = vpop.f32.mrf.mxu0 }
 0x59e   : > { %8682 = vst [vmem:[#allocation24_spill] sm:$0xff] %v8047_v27 }
 0x59f   : > { %v8049_v44 = vpop.f32.mrf.mxu1  ;;  %v3870_v32 = vpop.f32.mrf.mxu0 }
 0x5a0   : > { %8683 = vst [vmem:[#allocation27_spill] sm:$0xff] %v8049_v44 }
 0x5a1   : > { %v8051_v56 = vpop.f32.mrf.mxu1  ;;  %v8053_v48 = vpop.f32.mrf.mxu0 }
 0x5a2   : > { %8684 = vst [vmem:[#allocation30_spill] sm:$0xff] %v8051_v56  ;;  %8685 = vst [vmem:[#allocation26_spill] sm:$0xff] %v8053_v48 }
 0x5a3   : > { %v8055_v63 = vpop.f32.mrf.mxu1  ;;  %v8057_v39 = vpop.f32.mrf.mxu0 }
 0x5a4   : > { %8686 = vst [vmem:[#allocation28_spill] sm:$0xff] %v8055_v63  ;;  %v3268_v63 = vadd.f32 %v7991_v37, %v7977_v36  ;;  %v3277_v36 = vadd.f32 %v3214_v13, %v7999_v14 }
 0x5a5   : > { %v8059_v30 = vpop.f32.mrf.mxu1  ;;  %v8061_v51 = vpop.f32.mrf.mxu0 }
 0x5a6   : > { %8687 = vst [vmem:[#allocation29_spill] sm:$0xff] %v8059_v30  ;;  %8688 = vst [vmem:[#allocation31_spill] sm:$0xff] %v8061_v51  ;;  %v3269_v51 = vadd.f32 %v7995_v24, %v7981_v34  ;;  %v3279_v34 = vadd.f32 %v6187_v40, %v7983_v5  ;;  %v3420_v37 = vadd.f32 %v3352_v26, %v3268_v63 }
 0x5a7   : > { %v8063_v53 = vpop.f32.mrf.mxu1  ;;  %v8065_v50 = vpop.f32.mrf.mxu0  ;;  %v3278_v24 = vadd.f32 %v3216_v3, %v8001_v8 }
 0x5a8   : > { %8689 = vst [vmem:[#allocation32_spill] sm:$0xff] %v8063_v53  ;;  %8690 = vst [vmem:[#allocation33_spill] sm:$0xff] %v8065_v50  ;;  %v3271_v53 = vadd.f32 %v3204_v1, %v7985_v45  ;;  %v3421_v1 = vadd.f32 %v3354_v29, %v3269_v51 }
 0x5a9   : > { %v8067_v27 = vpop.f32.mrf.mxu1  ;;  %v8069_v44 = vpop.f32.mrf.mxu0  ;;  %v3430_v3 = vadd.f32 %v8021_v35, %v3278_v24  ;;  %v8696_v35 = vld [vmem:[#allocation26_spill] sm:$0xff] }
 0x5aa   : > { %8691 = vst [vmem:[#allocation34_spill] sm:$0xff] %v8067_v27  ;;  %8692 = vst [vmem:[#allocation35_spill] sm:$0xff] %v8069_v44  ;;  %v3272_v27 = vadd.f32 %v3206_v57, %v7989_v21  ;;  %v3274_v44 = vadd.f32 %v3210_v43, %v7993_v55  ;;  %v3273_v21 = vadd.f32 %v3256_v15, %v7987_v42  ;;  %v8104_v42 = vpop.permute.xlu1 %4280 }
 0x5ab   : > { %v8071_v41 = vpop.f32.mrf.mxu1  ;;  %v8073_v56 = vpop.f32.mrf.mxu0  ;;  %v3431_v57 = vadd.f32 %v6195_v18, %v3279_v34  ;;  %v3423_v43 = vadd.f32 %v3356_v23, %v3271_v53  ;;  %v3595_v8 = vadd.f32 %v8011_v11, %v3421_v1  ;;  %v3429_v53 = vadd.f32 %v8017_v17, %v3277_v36  ;;  %v8702_v34 = vld [vmem:[#allocation28_spill] sm:$0xff] }
 0x5ac   : > { %8693 = vst [vmem:[#allocation36_spill] sm:$0xff] %v8071_v41  ;;  %8694 = vst [vmem:[#allocation37_spill] sm:$0xff] %v8073_v56  ;;  %v3276_v41 = vadd.f32 %v6186_v28, %v7975_v12  ;;  %v3275_v56 = vadd.f32 %v3212_v61, %v7997_v46  ;;  %v3594_v28 = vadd.f32 %v3526_v49, %v3420_v37 }
 0x5ad   : > { %v8075_v48 = vpop.f32.mrf.mxu1  ;;  %v8082_v30 = vpop.f32.mrf.mxu0  ;;  %v3425_v14 = vadd.f32 %v8005_v2, %v3273_v21  ;;  %v3424_v63 = vadd.f32 %v8007_v59, %v3272_v27  ;;  %v3426_v5 = vadd.f32 %v8009_v38, %v3274_v44  ;;  %v3787_v18 = vadd.f32 %v3720_v33, %v3595_v8  ;;  %v8700_v33 = vld [vmem:[#allocation27_spill] sm:$0xff]  ;;  %v8703_v24 = vld [vmem:[#allocation29_spill] sm:$0xff] }
 0x5ae   : > { %8695 = vst [vmem:[#allocation19_spill] sm:$0xff] %v8075_v48  ;;  %v3270_v48 = vadd.f32 %v3253_v10, %v7979_v4  ;;  %v3428_v55 = vadd.f32 %v6194_v0, %v3276_v41  ;;  %v3427_v51 = vadd.f32 %v8013_v52, %v3275_v56  ;;  %v3786_v10 = vadd.f32 %v3718_v6, %v3594_v28  ;;  %v8698_v6 = vld [vmem:[#allocation23_spill] sm:$0xff]  ;;  %v8699_v41 = vld [vmem:[#allocation24_spill] sm:$0xff]  ;;  %v8130_v44 = vpop.permute.xlu1 %4270 }
 0x5af   : > { %v8088_v50 = vpop.f32.mrf.mxu1  ;;  %v8093_v45 = vpop.f32.mrf.mxu0  ;;  %v3598_v40 = vadd.f32 %v8019_v22, %v3424_v63  ;;  %v3600_v15 = vadd.f32 %v8023_v31, %v3426_v5  ;;  %v3603_v59 = vadd.f32 %v8031_v47, %v3429_v53  ;;  %v3605_v49 = vadd.f32 %v8033_v9, %v3431_v57  ;;  %v8706_v28 = vld [vmem:[#allocation33_spill] sm:$0xff] }
 0x5b0   : > { %v3422_v46 = vadd.f32 %v8003_v20, %v3270_v48  ;;  %v3597_v48 = vadd.f32 %v8015_v19, %v3423_v43  ;;  %v3602_v0 = vadd.f32 %v8025_v54, %v3428_v55  ;;  %v3601_v20 = vadd.f32 %v8027_v60, %v3427_v51  ;;  %v8121_v19 = vpop.permute.xlu0 %4285  ;;  %v8697_v60 = vld [vmem:[#allocation22_spill] sm:$0xff]  ;;  %v8704_v55 = vld [vmem:[#allocation31_spill] sm:$0xff] }
 0x5b1   : > { %v4022_v12 = vpop.f32.mrf.mxu1  ;;  %v8098_v4 = vpop.f32.mrf.mxu0  ;;  %v3938_v23 = vadd.f32 %v3870_v32, %v3786_v10  ;;  %v3604_v38 = vadd.f32 %v8035_v25, %v3430_v3  ;;  %v3599_v11 = vadd.f32 %v8037_v58, %v3425_v14  ;;  %v3939_v31 = vadd.f32 %v8696_v35, %v3787_v18  ;;  %v8701_v32 = vld [vmem:[#allocation30_spill] sm:$0xff] }
 0x5b2   : > { %v3596_v29 = vadd.f32 %v8029_v62, %v3422_v46  ;;  %v3794_v17 = vadd.f32 %v8039_v7, %v3602_v0  ;;  %v3789_v22 = vadd.f32 %v8045_v16, %v3597_v48  ;;  %v3797_v47 = vadd.f32 %v8698_v6, %v3605_v49  ;;  %v8707_v51 = vld [vmem:[#allocation34_spill] sm:$0xff] }
 0x5b3   : > { %v4024_v61 = vpop.f32.mrf.mxu1  ;;  %v8109_v13 = vpop.f32.mrf.mxu0  ;;  %v4090_v54 = vadd.f32 %v4022_v12, %v3938_v23  ;;  %v3791_v9 = vadd.f32 %v8699_v41, %v3599_v11  ;;  %v3790_v25 = vadd.f32 %v8700_v33, %v3598_v40  ;;  %v3792_v56 = vadd.f32 %v8701_v32, %v3600_v15  ;;  %v8705_v12 = vld [vmem:[#allocation32_spill] sm:$0xff]  ;;  %v8710_v40 = vld [vmem:[#allocation37_spill] sm:$0xff]  ;;  %v8712_v23 = vld [vmem:[#allocation6_spill] sm:$0xff] }
 0x5b4   : > { %v3788_v62 = vadd.f32 %v8697_v60, %v3596_v29  ;;  %v3941_v7 = vadd.f32 %v8057_v39, %v3789_v22  ;;  %v4091_v16 = vadd.f32 %v4024_v61, %v3939_v31  ;;  %v3793_v37 = vadd.f32 %v8702_v34, %v3601_v20  ;;  %v8708_v61 = vld [vmem:[#allocation35_spill] sm:$0xff]  ;;  %v8709_v53 = vld [vmem:[#allocation36_spill] sm:$0xff]  ;;  %v8144_v20 = vpop.permute.xlu0 %4275 }
 0x5b5   : > { %v4026_v26 = vpop.f32.mrf.mxu1  ;;  %v4078_v2 = vpop.f32.mrf.mxu0  ;;  %v3795_v21 = vadd.f32 %v8703_v24, %v3603_v59  ;;  %v3942_v1 = vadd.f32 %v8704_v55, %v3790_v25  ;;  %v3796_v46 = vadd.f32 %v8705_v12, %v3604_v38  ;;  %v3944_v14 = vadd.f32 %v8706_v28, %v3792_v56  ;;  %v8711_v29 = vld [vmem:[#allocation19_spill] sm:$0xff]  ;;  %v8716_v24 = vld [vmem:[#allocation5_spill] sm:$0xff] }
 0x5b6   : > { %v4093_v63 = vadd.f32 %v4026_v26, %v3941_v7  ;;  %v3946_v39 = vadd.f32 %v8707_v51, %v3794_v17  ;;  %v3945_v48 = vadd.f32 %v8708_v61, %v3793_v37  ;;  %v3940_v10 = vadd.f32 %v8709_v53, %v3788_v62  ;;  %v8713_v62 = vld [vmem:[#allocation7_spill] sm:$0xff]  ;;  %v8715_v7 = vld [vmem:[#allocation4_spill] sm:$0xff]  ;;  %v8717_v12 = vld [vmem:[#allocation9_spill] sm:$0xff] }
 0x5b7   : > { %v4028_v52 = vpop.f32.mrf.mxu1  ;;  %v3947_v3 = vadd.f32 %v8710_v40, %v3795_v21  ;;  %v3949_v18 = vadd.f32 %v8711_v29, %v3797_v47  ;;  %v3948_v38 = vadd.f32 %v8082_v30, %v3796_v46  ;;  %v3943_v11 = vadd.f32 %v8088_v50, %v3791_v9  ;;  %v8714_v9 = vld [vmem:[#allocation8_spill] sm:$0xff] }
 0x5b8   : > { %v4184_v58 = vpop.f32.mrf.mxu0  ;;  %v4098_v17 = vadd.f32 %v8093_v45, %v3946_v39  ;;  %v4094_v22 = vadd.f32 %v4028_v52, %v3942_v1  ;;  %v4092_v41 = vadd.f32 %v8098_v4, %v3940_v10 }
 0x5b9   : > { %v4032_v27 = vpop.f32.mrf.mxu1  ;;  %v4252_v36 = vadd.f32 %v4184_v58, %v4090_v54  ;;  %v4101_v33 = vadd.f32 %v8109_v13, %v3949_v18  ;;  %v4095_v25 = vadd.f32 %v4078_v2, %v3943_v11 }
 0x5ba   : > { %v4186_v43 = vpop.f32.mrf.mxu0  ;;  %v4096_v54 = vadd.f32 %v4032_v27, %v3944_v14 }
 0x5bb   : > { %v4034_v57 = vpop.f32.mrf.mxu1  ;;  %v4288_v5 = vadd.f32 %v8130_v44, %v4252_v36  ;;  %v4253_v8 = vadd.f32 %v4186_v43, %v4091_v16 }
 0x5bc   : > { %v4188_v0 = vpop.f32.mrf.mxu0  ;;  %v4097_v32 = vadd.f32 %v4034_v57, %v3945_v48  ;;  %v8719_v48 = vld [vmem:[#allocation13_spill] sm:$0xff] }
 0x5bd   : > { %v4036_v15 = vpop.f32.mrf.mxu1  ;;  %v4300_v59 = vadd.f32 %v4288_v5, %v8712_v23  ;;  %v4289_v26 = vadd.f32 %v8130_v44, %v4253_v8  ;;  %v4255_v49 = vadd.f32 %v4188_v0, %v4093_v63  ;;  %v8718_v5 = vld [vmem:[#allocation11_spill] sm:$0xff]  ;;  %v8720_v0 = vld [vmem:[#allocation12_spill] sm:$0xff] }
 0x5be   : > { %v4190_v31 = vpop.f32.mrf.mxu0  ;;  %v4099_v16 = vadd.f32 %v4036_v15, %v3947_v3 }
 0x5bf   : > { %v4038_v35 = vpop.f32.mrf.mxu1  ;;  %v4312_v60 = vmax.f32 %v4300_v59, 0.0  ;;  %v4301_v6 = vadd.f32 %v4289_v26, %v8713_v62  ;;  %v4291_v47 = vadd.f32 %v8144_v20, %v4255_v49  ;;  %v4256_v58 = vadd.f32 %v4190_v31, %v4094_v22  ;;  %v8721_v49 = vld [vmem:[#allocation14_spill] sm:$0xff] }
 0x5c0   : > { %v4194_v30 = vpop.f32.mrf.mxu0  ;;  %v4100_v1 = vadd.f32 %v4038_v35, %v3948_v38 }
 0x5c1   : > { %v4313_v50 = vmax.f32 %v4301_v6, 0.0  ;;  %v4303_v45 = vadd.f32 %v4291_v47, %v8714_v9  ;;  %v4258_v52 = vadd.f32 %v4194_v30, %v4096_v54  ;;  %v6234_v56 = vpop.f32.mrf.mxu1  ;;  %v4324_v27 = vmul.f32 %v4312_v60, %v8715_v7  ;;  %v8722_v54 = vld [vmem:[#allocation10_spill] sm:$0xff]  ;;  %v8723_v6 = vld [vmem:[#allocation15_spill] sm:$0xff]  ;;  %v8725_v30 = vld [vmem:[#allocation16_spill] sm:$0xff] }
 0x5c2   : > { %v4292_v36 = vadd.f32 %v8144_v20, %v4256_v58  ;;  %v4260_v34 = vadd.f32 %v6234_v56, %v4098_v17  ;;  %v4196_v37 = vpop.f32.mrf.mxu0 }
 0x5c3   : > { %v4325_v4 = vmul.f32 %v4313_v50, %v8716_v24  ;;  %v4315_v21 = vmax.f32 %v4303_v45, 0.0  ;;  %v4294_v13 = vadd.f32 %v8104_v42, %v4258_v52  ;;  %v4259_v2 = vadd.f32 %v4196_v37, %v4097_v32  ;;  %v4237_v55 = vpop.f32.mrf.mxu1 }
 0x5c4   : > { %v4304_v46 = vadd.f32 %v4292_v36, %v8717_v12  ;;  %v4296_v57 = vadd.f32 %v8104_v42, %v4260_v34  ;;  %v4254_v43 = vadd.f32 %v4237_v55, %v4092_v41  ;;  %v4198_v28 = vpop.f32.mrf.mxu0  ;;  %v8726_v55 = vld [vmem:[#allocation18_spill] sm:$0xff] }
 0x5c5   : > { %v5973_v14 = vpack.c.bf16 %v4325_v4, %v4324_v27  ;;  %v4327_v63 = vmul.f32 %v4315_v21, %v8715_v7  ;;  %v4306_v8 = vadd.f32 %v4294_v13, %v8718_v5  ;;  %v4295_v51 = vadd.f32 %v8104_v42, %v4259_v2  ;;  %v6235_v39 = vpop.f32.mrf.mxu1  ;;  %v6449_v5 = vld [vmem:[#allocation3] ss:$20 sps:$4 sm:$0xff]  }
 0x5c6   : > { %v4316_v61 = vmax.f32 %v4304_v46, 0.0  ;;  %v4308_v53 = vadd.f32 %v4296_v57, %v8719_v48  ;;  %v4290_v10 = vadd.f32 %v8130_v44, %v4254_v43  ;;  %v4261_v40 = vadd.f32 %v4198_v28, %v4099_v16  ;;  %v4200_v3 = vpop.f32.mrf.mxu0 }
 0x5c7   : > { %4376 = vst [vmem:[#allocation3 + $0x4] sm:$0xff] %v5973_v14  ;;  %v4318_v15 = vmax.f32 %v4306_v8, 0.0  ;;  %v4307_v29 = vadd.f32 %v4295_v51, %v8720_v0  ;;  %v4263_v18 = vadd.f32 %v6235_v39, %v4101_v33  ;;  %v4262_v23 = vadd.f32 %v4200_v3, %v4100_v1  ;;  %v4240_v11 = vpop.f32.mrf.mxu1  ;;  %v8724_v33 = vld [vmem:[#allocation17_spill] sm:$0xff]  ;;  %v8269_v3 = vpop.permute.xlu1 %4396 }
 0x5c8   : > { %v4328_v59 = vmul.f32 %v4316_v61, %v8716_v24  ;;  %v4320_v26 = vmax.f32 %v4308_v53, 0.0  ;;  %v4302_v38 = vadd.f32 %v4290_v10, %v8721_v49  ;;  %v4297_v42 = vadd.f32 %v8121_v19, %v4261_v40  ;;  %v6454_v61 = vld [vmem:[#allocation3 + $0x10] ss:$20 sps:$4 sm:$0xff]   ;;  %v6458_v10 = vld [vmem:[#allocation3 + $0x28] ss:$20 sps:$4 sm:$0xff]  }
 0x5c9   : > { %v4330_v17 = vmul.f32 %v4318_v15, %v8715_v7  ;;  %v4319_v22 = vmax.f32 %v4307_v29, 0.0  ;;  %v4299_v44 = vadd.f32 %v8121_v19, %v4263_v18  ;;  %v4298_v35 = vadd.f32 %v8121_v19, %v4262_v23  ;;  %v8730_v40 = vld [vmem:[#allocation21_spill] sm:$0xff]  ;;  %v8271_v15 = vpop.permute.xlu0 %4654 }
 0x5ca   : > { %v5975_v31 = vpack.c.bf16 %v4328_v59, %v4327_v63  ;;  %v4332_v60 = vmul.f32 %v4320_v26, %v8722_v54  ;;  %v4314_v62 = vmax.f32 %v4302_v38, 0.0  ;;  %v4309_v47 = vadd.f32 %v4297_v42, %v8723_v6 }
 0x5cb   : > { %v4331_v41 = vmul.f32 %v4319_v22, %v8716_v24  ;;  %v4311_v58 = vadd.f32 %v4299_v44, %v8724_v33  ;;  %v4310_v32 = vadd.f32 %v4298_v35, %v8725_v30  ;;  %v4257_v50 = vadd.f32 %v4240_v11, %v4095_v25  ;;  %v8280_v0 = vpop.permute.xlu1 %4771 }
 0x5cc   : > { %4378 = vst [vmem:[#allocation3 + $0x18] sm:$0xff] %v5975_v31  ;;  %v5978_v9 = vpack.c.bf16 %v4332_v60, %v4332_v60  ;;  %v4326_v45 = vmul.f32 %v4314_v62, %v8722_v54  ;;  %v4321_v52 = vmax.f32 %v4309_v47, 0.0  ;;  %v8181_v56 = vpack.c.bf16 %v4328_v59, %v4325_v4 }
 0x5cd   : > { %v5977_v19 = vpack.c.bf16 %v4331_v41, %v4330_v17  ;;  %v4323_v16 = vmax.f32 %v4311_v58, 0.0  ;;  %v4322_v36 = vmax.f32 %v4310_v32, 0.0  ;;  %v4293_v34 = vadd.f32 %v8144_v20, %v4257_v50  ;;  %v8282_v29 = vpop.permute.xlu0 %5027 }
 0x5ce   : > { %4381 = vst [vmem:[#allocation3 + $0x34] sm:$0xf] %v5978_v9  ;;  %v5974_v37 = vpack.c.bf16 %v4326_v45, %v4326_v45  ;;  %v8184_v21 = vpack.c.bf16 %v4327_v63, %v4324_v27  ;;  %v4333_v13 = vmul.f32 %v4321_v52, %v8715_v7  ;;  %v8195_v7 = vld [vmem:[#allocation3 + $0x38] ss:$20 sps:$4 sm:$0xff]   ;;  %v6539_v8 = vmov 0.0  }
 0x5cf   : > { %4380 = vst [vmem:[#allocation3 + $0x2c] sm:$0xff] %v5977_v19  ;;  %v4335_v25 = vmul.f32 %v4323_v16, %v8722_v54  ;;  %v4334_v2 = vmul.f32 %v4322_v36, %v8716_v24  ;;  %v4305_v1 = vadd.f32 %v4293_v34, %v8726_v55  ;;  %5192 = vrot.lane.b32.xlu0 %v8195_v7, %s8669_s11 }
 0x5d0   : > { %4377 = vst [vmem:[#allocation3 + $0xc] sm:$0xf] %v5974_v37  ;;  %v8193_v27 = vpack.c.bf16 %v4333_v13, %v4330_v17  ;;  %6236 = vmatprep.subr.bf16.mxu0 %v6539_v8  ;;  %6240 = vmatprep.mubr.msk.bf16.mxu0 %vm6540_vm12, %v6539_v8 }
 0x5d1   : > { %v5980_v4 = vpack.c.bf16 %v4335_v25, %v4335_v25  ;;  %v5979_v12 = vpack.c.bf16 %v4334_v2, %v4333_v13  ;;  %v4317_v46 = vmax.f32 %v4305_v1, 0.0  ;;  %v8191_v57 = vpack.c.bf16 %v4334_v2, %v4331_v41 }
 0x5d3   : > { %4383 = vst [vmem:[#allocation3 + $0x48] sm:$0xf] %v5980_v4  ;;  %4382 = vst [vmem:[#allocation3 + $0x40] sm:$0xff] %v5979_v12  ;;  %v4329_v20 = vmul.f32 %v4317_v46, %v8722_v54  ;;  %v6444_v24 = vld [vmem:[#allocation3 + $0x8] ss:$20 sps:$4 sm:$0xff]  }
 0x5d4   : > { %4434 = vrot.lane.b32.xlu0 %v6444_v24, %s8727_s26  ;;  %v6447_v63 = vld [vmem:[#allocation3 + $0x4] ss:$20 sps:$4 sm:$0xff]  }
 0x5d5   : > { %v5976_v43 = vpack.c.bf16 %v4329_v20, %v4329_v20 }
 0x5d7   : > { %4379 = vst [vmem:[#allocation3 + $0x20] sm:$0xf] %v5976_v43 }
 0x5da   : > { %v8197_v28 = vld [vmem:[#allocation3 + $0x34] ss:$20 sps:$4 sm:$0xff]   ;;  %v6452_v39 = vld [vmem:[#allocation3 + $0x30] ss:$20 sps:$4 sm:$0xff]   ;;  %v6456_v53 = vld [vmem:[#allocation3 + $0x2c] ss:$20 sps:$4 sm:$0xff]  }
 0x5db   : > { %5073 = vrot.lane.b32.xlu1 %v8197_v28, %s8667_s25  ;;  %v6455_v48 = vld [vmem:[#allocation3 + $0x34] ss:$20 sps:$4 sm:$0xff]  }
 0x5de   : > { %v6446_v14 = vld [vmem:[#allocation3 + $0xc] ss:$20 sps:$4 sm:$0xff]  }
 0x5df   : > { %5075 = vrot.lane.b32.xlu1 %v8195_v7, %s8667_s25  ;;  %4436 = vrot.lane.b32.xlu0 %v6446_v14, %s8727_s26  ;;  %v6450_v51 = vld [vmem:[#allocation3 + $0xc] ss:$20 sps:$4 sm:$0xff]  }
 0x5e3   : > { %5190 = vrot.lane.b32.xlu1 %v8197_v28, %s8669_s11  ;;  %4544 = vrot.lane.b32.xlu0 %v6447_v63, %s8728_s29 }
 0x5e7   : > { %4432 = vrot.lane.b32.xlu1 %v6447_v63, %s8727_s26  ;;  %4542 = vrot.lane.b32.xlu0 %v6449_v5, %s8728_s29 }
 0x5eb   : > { %4430 = vrot.lane.b32.xlu1 %v6449_v5, %s8727_s26  ;;  %4658 = vrot.lane.b32.xlu0 %v6447_v63, %s8665_s12 }
 0x5ef   : > { %4546 = vrot.lane.b32.xlu1 %v6444_v24, %s8728_s29  ;;  %4656 = vrot.lane.b32.xlu0 %v6449_v5, %s8665_s12 }
 0x5f3   : > { %4548 = vrot.lane.b32.xlu1 %v6446_v14, %s8728_s29  ;;  %4777 = vrot.lane.b32.xlu0 %v6444_v24, %s8729_s22 }
 0x5f7   : > { %4660 = vrot.lane.b32.xlu1 %v6444_v24, %s8665_s12  ;;  %4779 = vrot.lane.b32.xlu0 %v6446_v14, %s8729_s22 }
 0x5fb   : > { %4662 = vrot.lane.b32.xlu1 %v6446_v14, %s8665_s12  ;;  %5063 = vrot.lane.b32.xlu0 %v8181_v56, %s8667_s25 }
 0x5ff   : > { %4775 = vrot.lane.b32.xlu1 %v6447_v63, %s8729_s22  ;;  %5061 = vrot.lane.b32.xlu0 %v8184_v21, %s8667_s25 }
 0x603   : > { %4773 = vrot.lane.b32.xlu1 %v6449_v5, %s8729_s22  ;;  %5182 = vrot.lane.b32.xlu0 %v6450_v51, %s8669_s11 }
 0x607   : > { %5065 = vrot.lane.b32.xlu1 %v6450_v51, %s8667_s25  ;;  %4442 = vrot.lane.b32.xlu0 %v6452_v39, %s8727_s26 }
 0x60b   : > { %5067 = vrot.lane.b32.xlu1 %v6454_v61, %s8667_s25  ;;  %4444 = vrot.lane.b32.xlu0 %v6455_v48, %s8727_s26 }
 0x60f   : > { %5180 = vrot.lane.b32.xlu1 %v8181_v56, %s8669_s11  ;;  %4554 = vrot.lane.b32.xlu0 %v6452_v39, %s8728_s29 }
 0x613   : > { %4440 = vrot.lane.b32.xlu1 %v6456_v53, %s8727_s26  ;;  %4550 = vrot.lane.b32.xlu0 %v6458_v10, %s8728_s29 }
 0x617   : > { %4438 = vrot.lane.b32.xlu1 %v6458_v10, %s8727_s26  ;;  %4666 = vrot.lane.b32.xlu0 %v6456_v53, %s8665_s12 }
 0x61b   : > { %4552 = vrot.lane.b32.xlu1 %v6456_v53, %s8728_s29  ;;  %4664 = vrot.lane.b32.xlu0 %v6458_v10, %s8665_s12 }
 0x61f   : > { %4556 = vrot.lane.b32.xlu1 %v6455_v48, %s8728_s29  ;;  %4783 = vrot.lane.b32.xlu0 %v6456_v53, %s8729_s22 }
 0x623   : > { %4668 = vrot.lane.b32.xlu1 %v6452_v39, %s8665_s12  ;;  %5184 = vrot.lane.b32.xlu0 %v6454_v61, %s8669_s11 }
 0x627   : > { %4670 = vrot.lane.b32.xlu1 %v6455_v48, %s8665_s12  ;;  %5307 = vrot.lane.b32.xlu0 %v8197_v28, %s8670_s20 }
 0x62b   : > { %4785 = vrot.lane.b32.xlu1 %v6452_v39, %s8729_s22  ;;  %4787 = vrot.lane.b32.xlu0 %v6455_v48, %s8729_s22 }
 0x62f   : > { %4781 = vrot.lane.b32.xlu1 %v6458_v10, %s8729_s22  ;;  %5297 = vrot.lane.b32.xlu0 %v8181_v56, %s8670_s20 }
 0x633   : > { %5178 = vrot.lane.b32.xlu1 %v8184_v21, %s8669_s11  ;;  %5071 = vrot.lane.b32.xlu0 %v8191_v57, %s8667_s25 }
 0x637   : > { %5176 = vrot.lane.b32.xlu1 %v8730_v40, %s6533_s28  ;;  %5069 = vrot.lane.b32.xlu0 %v8193_v27, %s8667_s25  ;;  %s5749_s28 = sshll.u32 %s8749_s14, 3 }
 0x638   : > { %s543_s25 = scalar_lea.vmem %s8544_s9, %s5749_s28 }
 0x639   : > { %v5526_v17 = vld [vmem:[%s543_s25] sm:$0x3f] }
 0x63b   : > { %5309 = vrot.lane.b32.xlu1 %v8195_v7, %s8670_s20  ;;  %5295 = vrot.lane.b32.xlu0 %v8184_v21, %s8670_s20 }
 0x63f   : > { %5299 = vrot.lane.b32.xlu1 %v6450_v51, %s8670_s20  ;;  %5188 = vrot.lane.b32.xlu0 %v8191_v57, %s8669_s11 }
 0x641   : > { %v8290_v23 = vpop.permute.xlu0 %5192 }
 0x643   : > { %5301 = vrot.lane.b32.xlu1 %v6454_v61, %s8670_s20  ;;  %5293 = vrot.lane.b32.xlu0 %v8730_v40, %s6537_s30 }
 0x646   : > { %v4435_v26 = vpop.permute.xlu0 %4434 }
 0x647   : > { %5186 = vrot.lane.b32.xlu1 %v8193_v27, %s8669_s11  ;;  %5303 = vrot.lane.b32.xlu0 %v8193_v27, %s8670_s20  ;;  %s6313_s11 = smul.u32 6, %s8749_s14 }
 0x64b   : > { %5305 = vrot.lane.b32.xlu1 %v8191_v57, %s8670_s20  ;;  %5425 = vrot.lane.b32.xlu0 %v8195_v7, %s6528_s21 }
 0x64d   : > { %v8288_v18 = vpop.permute.xlu1 %5073 }
 0x64f   : > { %5423 = vrot.lane.b32.xlu1 %v8197_v28, %s6528_s21  ;;  %5421 = vrot.lane.b32.xlu0 %v8191_v57, %s6528_s21 }
 0x651   : > { %v8296_v59 = vpop.permute.xlu1 %5075  ;;  %v4437_v38 = vpop.permute.xlu0 %4436 }
 0x652   : > { %v4448_v25 = vsel %vm1293_vm5, %v4435_v26, %v4437_v38 }
 0x653   : > { %5413 = vrot.lane.b32.xlu1 %v8181_v56, %s6528_s21  ;;  %5415 = vrot.lane.b32.xlu0 %v6450_v51, %s6528_s21 }
 0x655   : > { %v8302_v49 = vpop.permute.xlu1 %5190  ;;  %v8308_v11 = vpop.permute.xlu0 %4544 }
 0x657   : > { %5419 = vrot.lane.b32.xlu1 %v8193_v27, %s6528_s21  ;;  %5417 = vrot.lane.b32.xlu0 %v6454_v61, %s6528_s21  ;;  %v8732_v61 = vmov 0  }
 0x659   : > { %v4433_v42 = vpop.permute.xlu1 %4432  ;;  %v4543_v44 = vpop.permute.xlu0 %4542 }
 0x65a   : > { %v4447_v12 = vsel %vm1293_vm5, %v4433_v42, %v4435_v26  ;;  %v4558_v48 = vsel %vm1000_vm2, %v4543_v44, %v8308_v11 }
 0x65b   : > { %5411 = vrot.lane.b32.xlu1 %v8184_v21, %s6528_s21  ;;  %s6312_s21 = smul.u32 3, %s8751_s13 }
 0x65d   : > { %v4431_v22 = vpop.permute.xlu1 %4430  ;;  %v8316_v31 = vpop.permute.xlu0 %4658  ;;  %s550_s20 = sadd.s32 %s6313_s11, %s6312_s21 }
 0x65e   : > { %v4446_v43 = vsel %vm1293_vm5, %v4431_v22, %v4433_v42  ;;  %v8733_v42 = vld [vmem:[#allocation25_spill] sm:$0xff]  ;;  %s5750_s27 = sshll.u32 %s550_s20, 3 }
 0x65f   : > { %5529 = vperm.xlu1 %6381, %v5526_v17   ;;  %s552_s26 = scalar_lea.vmem %s8545_s10, %s5750_s27 }
 0x661   : > { %v4547_v35 = vpop.permute.xlu1 %4546  ;;  %v8318_v60 = vpop.permute.xlu0 %4656 }
 0x662   : > { %v4559_v5 = vsel %vm1000_vm2, %v8308_v11, %v4547_v35  ;;  %v4672_v44 = vsel %vm1571_vm6, %v8318_v60, %v8316_v31 }
 0x665   : > { %v4549_v54 = vpop.permute.xlu1 %4548  ;;  %v8322_v6 = vpop.permute.xlu0 %4777 }
 0x666   : > { %v4560_v53 = vsel %vm1000_vm2, %v4547_v35, %v4549_v54 }
 0x669   : > { %v8320_v62 = vpop.permute.xlu1 %4660  ;;  %v8326_v41 = vpop.permute.xlu0 %4779 }
 0x66a   : > { %v4673_v11 = vsel %vm1571_vm6, %v8316_v31, %v8320_v62 }
 0x66d   : > { %v8324_v47 = vpop.permute.xlu1 %4662  ;;  %v8330_v58 = vpop.permute.xlu0 %5063 }
 0x66e   : > { %v4674_v35 = vsel %vm1571_vm6, %v8320_v62, %v8324_v47 }
 0x671   : > { %v8328_v33 = vpop.permute.xlu1 %4775  ;;  %v5062_v32 = vpop.permute.xlu0 %5061 }
 0x672   : > { %v8336_v50 = vsel %vm8731_vm3, %v5062_v32, %v8330_v58  ;;  %v4790_v31 = vsel %vm1724_vm8, %v8328_v33, %v8322_v6 }
 0x675   : > { %v8332_v30 = vpop.permute.xlu1 %4773  ;;  %v8340_v45 = vpop.permute.xlu0 %5182 }
 0x676   : > { %v4789_v47 = vsel %vm1724_vm8, %v8332_v30, %v8328_v33 }
 0x679   : > { %v8338_v9 = vpop.permute.xlu1 %5065  ;;  %v4443_v19 = vpop.permute.xlu0 %4442 }
 0x67d   : > { %v8342_v52 = vpop.permute.xlu1 %5067  ;;  %v4445_v36 = vpop.permute.xlu0 %4444 }
 0x67e   : > { %v4451_v34 = vsel %vm1293_vm5, %v4443_v19, %v4445_v36 }
 0x67f   : > { %6237 = vmatpush3.bf16.msra.mxu0 %v4451_v34 }
 0x680   : > { %6238 = vmatprep.subr.bf16.mxu0 %v6539_v8 }
 0x681   : > { %v8344_v16 = vpop.permute.xlu1 %5180  ;;  %v4555_v13 = vpop.permute.xlu0 %4554 }
 0x683   : > { %6239 = vmatpush3.bf16.msra.mxu0 %v4448_v25  ;;  %v6459_v25 = vld [vmem:[#allocation3 + $0x34] ss:$20 sps:$4 sm:$0xff]  }
 0x684   : > { %6244 = vmatprep.subr.bf16.mxu0 %v6539_v8 }
 0x685   : > { %v4441_v37 = vpop.permute.xlu1 %4440  ;;  %v4551_v1 = vpop.permute.xlu0 %4550 }
 0x686   : > { %v4450_v2 = vsel %vm1293_vm5, %v4441_v37, %v4443_v19  ;;  %6241 = vmatmul.mubr.msk.bf16.vlgmr.msra.gmra.mxu0 %vm1306_vm0, %v8269_v3 }
 0x687   : > { %4473 = vmatprep.subr.bf16.mxu1 %v4450_v2  ;;  %6248 = vmatprep.mubr.msk.bf16.mxu0 %vm6540_vm12, %v6539_v8  ;;  %v6467_v2 = vld [vmem:[%s7960_s24 + $0x4] sm:$0x7] }
 0x689   : > { %v4439_v55 = vpop.permute.xlu1 %4438  ;;  %v4667_v20 = vpop.permute.xlu0 %4666 }
 0x68a   : > { %v4449_v4 = vsel %vm1293_vm5, %v4439_v55, %v4441_v37  ;;  %vm8735_vm5 = vmmov %vm8672_vm1 }
 0x68b   : > { %4474 = vmatpush1.bf16.msra.mxu1 %v4449_v4  ;;  %v5082_v33 = vsel %vm8735_vm5, %v8288_v18, %v8296_v59 }
 0x68c   : > { %4475 = vmatprep.subr.bf16.mxu1 %v4447_v12  ;;  %v5199_v12 = vsel %vm2243_vm15, %v8302_v49, %v8290_v23 }
 0x68d   : > { %v4553_v46 = vpop.permute.xlu1 %4552  ;;  %v4665_v24 = vpop.permute.xlu0 %4664 }
 0x68e   : > { %v4562_v7 = vsel %vm1000_vm2, %v4553_v46, %v4555_v13  ;;  %v4561_v14 = vsel %vm1000_vm2, %v4551_v1, %v4553_v46  ;;  %v4675_v26 = vsel %vm1571_vm6, %v4665_v24, %v4667_v20 }
 0x68f   : > { %4476 = vmatpush1.bf16.msra.mxu1 %v4446_v43 }
 0x690   : > { %4585 = vmatprep.subr.bf16.mxu1 %v4562_v7 }
 0x691   : > { %v4557_v28 = vpop.permute.xlu1 %4556  ;;  %v4784_v39 = vpop.permute.xlu0 %4783 }
 0x692   : > { %v4563_v63 = vsel %vm1000_vm2, %v4555_v13, %v4557_v28  ;;  %5918 = vmatmul.mubr.msk.bf16.vlgmr.msra.gmra.mxu1 %vm1306_vm0, %v8269_v3  ;;  %vm8734_vm2 = vmmov %vm8672_vm1 }
 0x693   : > { %4586 = vmatpush1.bf16.msra.mxu1 %v4561_v14  ;;  %6245 = vmatpush3.bf16.msra.mxu0 %v4563_v63 }
 0x694   : > { %4587 = vmatprep.subr.bf16.mxu1 %v4559_v5  ;;  %6246 = vmatprep.subr.bf16.mxu0 %v6539_v8 }
 0x695   : > { %v4669_v51 = vpop.permute.xlu1 %4668  ;;  %4605 = vmatprep.mubr.bf16.mxu1 %v8732_v61  ;;  %v8372_v3 = vpop.permute.xlu0 %5184 }
 0x696   : > { %v4676_v10 = vsel %vm1571_vm6, %v4667_v20, %v4669_v51 }
 0x697   : > { %4588 = vmatpush1.bf16.msra.mxu1 %v4558_v48  ;;  %6247 = vmatpush3.bf16.msra.mxu0 %v4560_v53 }
 0x698   : > { %4699 = vmatprep.subr.bf16.mxu1 %v4676_v10  ;;  %6252 = vmatprep.subr.bf16.mxu0 %v6539_v8 }
 0x699   : > { %v4671_v40 = vpop.permute.xlu1 %4670  ;;  %v8384_v22 = vpop.permute.xlu0 %5307 }
 0x69a   : > { %v4677_v38 = vsel %vm1571_vm6, %v4669_v51, %v4671_v40  ;;  %5920 = vmatmul.mubr.msk.bf16.vlgmr.msra.gmra.mxu1 %vm1306_vm0, %v8733_v42  ;;  %6249 = vmatmul.mubr.msk.bf16.vlgmr.msra.gmra.mxu0 %vm1306_vm0, %v8733_v42  ;;  %vm8736_vm6 = vmmov %vm8672_vm1  ;;  %v5410_v42 = vld [vmem:[%s7960_s24 + $0x8] sm:$0x7] }
 0x69b   : > { %4700 = vmatpush1.bf16.msra.mxu1 %v4675_v26  ;;  %6253 = vmatpush3.bf16.msra.mxu0 %v4677_v38 }
 0x69c   : > { %4701 = vmatprep.subr.bf16.mxu1 %v4673_v11  ;;  %6254 = vmatprep.subr.bf16.mxu0 %v6539_v8 }
 0x69d   : > { %v4786_v17 = vpop.permute.xlu1 %4785  ;;  %4719 = vmatprep.mubr.bf16.mxu1 %v8732_v61  ;;  %6256 = vmatprep.mubr.msk.bf16.mxu0 %vm6540_vm12, %v6539_v8  ;;  %v4788_v19 = vpop.permute.xlu0 %4787 }
 0x69e   : > { %v4793_v54 = vsel %vm1724_vm8, %v4784_v39, %v4786_v17  ;;  %v4794_v34 = vsel %vm1724_vm8, %v4786_v17, %v4788_v19 }
 0x69f   : > { %4702 = vmatpush1.bf16.msra.mxu1 %v4672_v44  ;;  %6255 = vmatpush3.bf16.msra.mxu0 %v4674_v35 }
 0x6a0   : > { %4816 = vmatprep.subr.bf16.mxu1 %v4793_v54  ;;  %6260 = vmatprep.subr.bf16.mxu0 %v6539_v8 }
 0x6a1   : > { %v4782_v32 = vpop.permute.xlu1 %4781  ;;  %v8409_v62 = vpop.permute.xlu0 %5297 }
 0x6a2   : > { %v4792_v36 = vsel %vm1724_vm8, %v4782_v32, %v4784_v39  ;;  %5922 = vmatmul.mubr.msk.bf16.vlgmr.msra.gmra.mxu1 %vm1306_vm0, %v8271_v15  ;;  %6257 = vmatmul.mubr.msk.bf16.vlgmr.msra.gmra.mxu0 %vm1306_vm0, %v8271_v15  ;;  %v4791_v15 = vsel %vm1724_vm8, %v8322_v6, %v8326_v41  ;;  %v6460_v41 = vld [vmem:[#allocation3 + $0xc] ss:$20 sps:$4 sm:$0xff]   ;;  %vm8737_vm8 = vmmov %vm8672_vm1 }
 0x6a3   : > { %4817 = vmatpush1.bf16.msra.mxu1 %v4792_v36  ;;  %6261 = vmatpush3.bf16.msra.mxu0 %v4794_v34 }
 0x6a4   : > { %4818 = vmatprep.subr.bf16.mxu1 %v4790_v31  ;;  %6262 = vmatprep.subr.bf16.mxu0 %v6539_v8 }
 0x6a5   : > { %v8407_v60 = vpop.permute.xlu1 %5178  ;;  %4836 = vmatprep.mubr.bf16.mxu1 %v8732_v61  ;;  %6264 = vmatprep.mubr.msk.bf16.mxu0 %vm6540_vm12, %v6539_v8  ;;  %v5072_v13 = vpop.permute.xlu0 %5071 }
 0x6a6   : > { %v5194_v23 = vsel %vm2243_vm15, %v8407_v60, %v8344_v16 }
 0x6a7   : > { %4819 = vmatpush1.bf16.msra.mxu1 %v4789_v47  ;;  %6263 = vmatpush3.bf16.msra.mxu0 %v4791_v15 }
 0x6a8   : > { %4944 = vmatprep.subr.bf16.mxu1 %v8191_v57  ;;  %6268 = vmatprep.subr.bf16.mxu0 %v6539_v8 }
 0x6a9   : > { %v8422_v37 = vpop.permute.xlu1 %5176  ;;  %v5070_v6 = vpop.permute.xlu0 %5069 }
 0x6aa   : > { %5924 = vmatmul.mubr.msk.bf16.vlgmr.msra.gmra.mxu1 %vm1306_vm0, %v8280_v0  ;;  %6265 = vmatmul.mubr.msk.bf16.vlgmr.msra.gmra.mxu0 %vm1306_vm0, %v8280_v0  ;;  %v5080_v30 = vsel %vm8736_vm6, %v5070_v6, %v5072_v13 }
 0x6ab   : > { %4945 = vmatpush1.bf16.msra.mxu1 %v8193_v27  ;;  %6269 = vmatpush3.bf16.msra.mxu0 %v6459_v25  ;;  %v5081_v27 = vsel %vm8734_vm2, %v5072_v13, %v8288_v18  ;;  %v5079_v18 = vsel %vm8672_vm1, %v8338_v9, %v8342_v52 }
 0x6ac   : > { %4946 = vmatprep.subr.bf16.mxu1 %v8181_v56  ;;  %6270 = vmatprep.subr.bf16.mxu0 %v6539_v8 }
 0x6ad   : > { %v5310_v57 = vpop.permute.xlu1 %5309  ;;  %4964 = vmatprep.mubr.bf16.mxu1 %v8732_v61  ;;  %6272 = vmatprep.mubr.msk.bf16.mxu0 %vm6540_vm12, %v6539_v8  ;;  %v5296_v0 = vpop.permute.xlu0 %5295 }
 0x6ae   : > { %v5316_v7 = vsel %vm680_vm14, %v8384_v22, %v5310_v57  ;;  %v5311_v14 = vsel %vm680_vm14, %v5296_v0, %v8409_v62 }
 0x6af   : > { %4947 = vmatpush1.bf16.msra.mxu1 %v8184_v21  ;;  %6271 = vmatpush3.bf16.msra.mxu0 %v6460_v41  ;;  %v5078_v21 = vsel %vm8737_vm8, %v8330_v58, %v8338_v9 }
 0x6b0   : > { %5104 = vmatprep.subr.bf16.mxu1 %v5081_v27  ;;  %6276 = vmatprep.subr.bf16.mxu0 %v6539_v8 }
 0x6b1   : > { %v5300_v56 = vpop.permute.xlu1 %5299  ;;  %v5189_v1 = vpop.permute.xlu0 %5188 }
 0x6b2   : > { %5932 = vmatmul.mubr.msk.bf16.vlgmr.msra.gmra.mxu1 %vm1306_vm0, %v6467_v2  ;;  %6273 = vmatmul.mubr.msk.bf16.vlgmr.msra.gmra.mxu0 %vm1306_vm0, %v6467_v2  ;;  %v5198_v59 = vsel %vm2243_vm15, %v5189_v1, %v8302_v49 }
 0x6b3   : > { %5105 = vmatpush1.bf16.msra.mxu1 %v5080_v30  ;;  %6277 = vmatpush3.bf16.msra.mxu0 %v5082_v33 }
 0x6b4   : > { %5106 = vmatprep.subr.bf16.mxu1 %v5078_v21  ;;  %6278 = vmatprep.subr.bf16.mxu0 %v6539_v8 }
 0x6b5   : > { %v5302_v55 = vpop.permute.xlu1 %5301  ;;  %5124 = vmatprep.mubr.bf16.mxu1 %v8732_v61  ;;  %6280 = vmatprep.mubr.msk.bf16.mxu0 %vm6540_vm12, %v6539_v8  ;;  %v5294_v4 = vpop.permute.xlu0 %5293 }
 0x6b6   : > { %v5313_v63 = vsel %vm680_vm14, %v5300_v56, %v5302_v55 }
 0x6b7   : > { %5107 = vmatpush1.bf16.msra.mxu1 %v8336_v50  ;;  %6279 = vmatpush3.bf16.msra.mxu0 %v5079_v18  ;;  %v5195_v50 = vsel %vm2243_vm15, %v8344_v16, %v8340_v45 }
 0x6b8   : > { %5221 = vmatprep.subr.bf16.mxu1 %v5198_v59  ;;  %6284 = vmatprep.subr.bf16.mxu0 %v6539_v8 }
 0x6b9   : > { %v5187_v58 = vpop.permute.xlu1 %5186  ;;  %v5304_v52 = vpop.permute.xlu0 %5303 }
 0x6ba   : > { %v5197_v46 = vsel %vm2243_vm15, %v5187_v58, %v5189_v1  ;;  %5943 = vmatmul.mubr.msk.bf16.vlgmr.msra.gmra.mxu1 %vm1306_vm0, %v8282_v29  ;;  %6281 = vmatmul.mubr.msk.bf16.vlgmr.msra.gmra.mxu0 %vm1306_vm0, %v8282_v29  ;;  %v5196_v29 = vsel %vm2243_vm15, %v8340_v45, %v8372_v3  ;;  %v5312_v45 = vsel %vm680_vm14, %v8409_v62, %v5300_v56 }
 0x6bb   : > { %5222 = vmatpush1.bf16.msra.mxu1 %v5197_v46  ;;  %6285 = vmatpush3.bf16.msra.mxu0 %v5199_v12 }
 0x6bc   : > { %5223 = vmatprep.subr.bf16.mxu1 %v5195_v50  ;;  %6286 = vmatprep.subr.bf16.mxu0 %v6539_v8 }
 0x6bd   : > { %v5306_v9 = vpop.permute.xlu1 %5305  ;;  %5241 = vmatprep.mubr.bf16.mxu1 %v8732_v61  ;;  %6288 = vmatprep.mubr.msk.bf16.mxu0 %vm6540_vm12, %v6539_v8  ;;  %v5426_v43 = vpop.permute.xlu0 %5425 }
 0x6be   : > { %v5315_v49 = vsel %vm680_vm14, %v5306_v9, %v8384_v22  ;;  %v5314_v28 = vsel %vm680_vm14, %v5304_v52, %v5306_v9 }
 0x6bf   : > { %5224 = vmatpush1.bf16.msra.mxu1 %v5194_v23  ;;  %6287 = vmatpush3.bf16.msra.mxu0 %v5196_v29 }
 0x6c0   : > { %5338 = vmatprep.subr.bf16.mxu1 %v5315_v49  ;;  %6292 = vmatprep.subr.bf16.mxu0 %v6539_v8 }
 0x6c1   : > { %v5424_v20 = vpop.permute.xlu1 %5423  ;;  %v5422_v24 = vpop.permute.xlu0 %5421 }
 0x6c2   : > { %5945 = vmatmul.mubr.msk.bf16.vlgmr.msra.gmra.mxu1 %vm1306_vm0, %v8422_v37  ;;  %6289 = vmatmul.mubr.msk.bf16.vlgmr.msra.gmra.mxu0 %vm1306_vm0, %v8422_v37  ;;  %v5431_v5 = vsel %vm712_vm7, %v5422_v24, %v5424_v20  ;;  %v5432_v48 = vsel %vm712_vm7, %v5424_v20, %v5426_v43 }
 0x6c3   : > { %5339 = vmatpush1.bf16.msra.mxu1 %v5314_v28  ;;  %6293 = vmatpush3.bf16.msra.mxu0 %v5316_v7 }
 0x6c4   : > { %5340 = vmatprep.subr.bf16.mxu1 %v5312_v45  ;;  %6294 = vmatprep.subr.bf16.mxu0 %v6539_v8 }
 0x6c5   : > { %v5414_v16 = vpop.permute.xlu1 %5413  ;;  %5358 = vmatprep.mubr.bf16.mxu1 %v8732_v61  ;;  %6296 = vmatprep.mubr.msk.bf16.mxu0 %vm6540_vm12, %v6539_v8  ;;  %v5416_v39 = vpop.permute.xlu0 %5415 }
 0x6c6   : > { %v5428_v10 = vsel %vm712_vm7, %v5414_v16, %v5416_v39 }
 0x6c7   : > { %5341 = vmatpush1.bf16.msra.mxu1 %v5311_v14  ;;  %6295 = vmatpush3.bf16.msra.mxu0 %v5313_v63 }
 0x6c8   : > { %5454 = vmatprep.subr.bf16.mxu1 %v5431_v5  ;;  %6300 = vmatprep.subr.bf16.mxu0 %v6539_v8 }
 0x6c9   : > { %v5420_v51 = vpop.permute.xlu1 %5419  ;;  %v5418_v3 = vpop.permute.xlu0 %5417 }
 0x6ca   : > { %v5430_v53 = vsel %vm712_vm7, %v5420_v51, %v5422_v24  ;;  %5947 = vmatmul.mubr.msk.bf16.vlgmr.msra.gmra.mxu1 %vm1306_vm0, %v5294_v4  ;;  %6297 = vmatmul.mubr.msk.bf16.vlgmr.msra.gmra.mxu0 %vm1306_vm0, %v5294_v4  ;;  %v5429_v38 = vsel %vm712_vm7, %v5416_v39, %v5418_v3 }
 0x6cb   : > { %5455 = vmatpush1.bf16.msra.mxu1 %v5430_v53  ;;  %6301 = vmatpush3.bf16.msra.mxu0 %v5432_v48 }
 0x6cc   : > { %5456 = vmatprep.subr.bf16.mxu1 %v5428_v10  ;;  %6302 = vmatprep.subr.bf16.mxu0 %v6539_v8 }
 0x6cd   : > { %v5412_v40 = vpop.permute.xlu1 %5411  ;;  %5474 = vmatprep.mubr.bf16.mxu1 %v8732_v61  ;;  %6304 = vmatprep.mubr.msk.bf16.mxu0 %vm6540_vm12, %v6539_v8 }
 0x6ce   : > { %v5427_v26 = vsel %vm712_vm7, %v5412_v40, %v5414_v16 }
 0x6cf   : > { %5457 = vmatpush1.bf16.msra.mxu1 %v5427_v26  ;;  %6303 = vmatpush3.bf16.msra.mxu0 %v5429_v38 }
 0x6d2   : > { %5949 = vmatmul.mubr.msk.bf16.vlgmr.msra.gmra.mxu1 %vm1306_vm0, %v5410_v42  ;;  %6305 = vmatmul.mubr.msk.bf16.vlgmr.msra.gmra.mxu0 %vm1306_vm0, %v5410_v42 }
 0x746   : > { %v4536_v11 = vpop.f32.mrf.mxu0 }
 0x748   : > { %v6242_v17 = vpop.f32.mrf.mxu0 }
 0x74a   : > { %v4539_v22 = vpop.f32.mrf.mxu0 }
 0x74c   : > { %v6243_v44 = vpop.f32.mrf.mxu0 }
 0x752   : > { %v4495_v35 = vpop.f32.mrf.mxu1 }
 0x754   : > { %v4497_v61 = vpop.f32.mrf.mxu1 }
 0x756   : > { %v4499_v54 = vpop.f32.mrf.mxu1 }
 0x758   : > { %v4500_v32 = vpop.f32.mrf.mxu1 }
 0x75a   : > { %v4607_v8 = vpop.f32.mrf.mxu1  ;;  %v4648_v19 = vpop.f32.mrf.mxu0 }
 0x75b   : > { %v4608_v63 = vadd.f32 %v4607_v8, %v4495_v35  ;;  %v4649_v5 = vadd.f32 %v4648_v19, %v4536_v11 }
 0x75c   : > { %v4609_v36 = vpop.f32.mrf.mxu1  ;;  %v6250_v34 = vpop.f32.mrf.mxu0 }
 0x75d   : > { %v4610_v48 = vadd.f32 %v4609_v36, %v4497_v61 }
 0x75e   : > { %v4611_v31 = vpop.f32.mrf.mxu1  ;;  %v4651_v60 = vpop.f32.mrf.mxu0 }
 0x760   : > { %v4612_v62 = vpop.f32.mrf.mxu1  ;;  %v6251_v15 = vpop.f32.mrf.mxu0 }
 0x762   : > { %v4721_v47 = vpop.f32.mrf.mxu1  ;;  %v4762_v37 = vpop.f32.mrf.mxu0 }
 0x763   : > { %v4768_v53 = vadd.f32 %v4721_v47, %v4608_v63  ;;  %v4770_v10 = vadd.f32 %v4762_v37, %v4649_v5 }
 0x764   : > { %v4723_v13 = vpop.f32.mrf.mxu1  ;;  %v6258_v25 = vpop.f32.mrf.mxu0 }
 0x765   : > { %v4769_v26 = vadd.f32 %v4723_v13, %v4610_v48 }
 0x766   : > { %v4725_v57 = vpop.f32.mrf.mxu1  ;;  %v4765_v6 = vpop.f32.mrf.mxu0 }
 0x768   : > { %v4726_v41 = vpop.f32.mrf.mxu1  ;;  %v6259_v27 = vpop.f32.mrf.mxu0 }
 0x769   : > { %v5530_v41 = vpop.permute.xlu1 %5529 }
 0x76a   : > { %v4838_v56 = vpop.f32.mrf.mxu1  ;;  %v4879_v0 = vpop.f32.mrf.mxu0 }
 0x76b   : > { %v4885_v38 = vadd.f32 %v4838_v56, %v4768_v53  ;;  %v4887_v42 = vadd.f32 %v4879_v0, %v4770_v10 }
 0x76c   : > { %v4840_v33 = vpop.f32.mrf.mxu1  ;;  %v6266_v30 = vpop.f32.mrf.mxu0 }
 0x76d   : > { %v4886_v44 = vadd.f32 %v4840_v33, %v4769_v26 }
 0x76e   : > { %v4842_v2 = vpop.f32.mrf.mxu1  ;;  %v4882_v21 = vpop.f32.mrf.mxu0 }
 0x770   : > { %v4843_v55 = vpop.f32.mrf.mxu1  ;;  %v6267_v1 = vpop.f32.mrf.mxu0 }
 0x772   : > { %v4966_v18 = vpop.f32.mrf.mxu1  ;;  %v5007_v59 = vpop.f32.mrf.mxu0 }
 0x773   : > { %v5013_v54 = vadd.f32 %v4966_v18, %v4885_v38  ;;  %v5015_v32 = vadd.f32 %v5007_v59, %v4887_v42 }
 0x774   : > { %v4968_v58 = vpop.f32.mrf.mxu1  ;;  %v6274_v4 = vpop.f32.mrf.mxu0 }
 0x775   : > { %v5014_v60 = vadd.f32 %v4968_v58, %v4886_v44 }
 0x776   : > { %v4970_v12 = vpop.f32.mrf.mxu1  ;;  %v5010_v46 = vpop.f32.mrf.mxu0 }
 0x778   : > { %v4971_v50 = vpop.f32.mrf.mxu1  ;;  %v6275_v9 = vpop.f32.mrf.mxu0 }
 0x77a   : > { %v5126_v52 = vpop.f32.mrf.mxu1  ;;  %v5167_v29 = vpop.f32.mrf.mxu0 }
 0x77b   : > { %v5173_v35 = vadd.f32 %v5126_v52, %v5013_v54  ;;  %v5175_v11 = vadd.f32 %v5167_v29, %v5015_v32 }
 0x77c   : > { %v5128_v23 = vpop.f32.mrf.mxu1  ;;  %v6282_v49 = vpop.f32.mrf.mxu0 }
 0x77d   : > { %v5174_v61 = vadd.f32 %v5128_v23, %v5014_v60 }
 0x77e   : > { %v5130_v20 = vpop.f32.mrf.mxu1  ;;  %v5170_v43 = vpop.f32.mrf.mxu0 }
 0x780   : > { %v5131_v7 = vpop.f32.mrf.mxu1  ;;  %v6283_v28 = vpop.f32.mrf.mxu0 }
 0x782   : > { %v5243_v45 = vpop.f32.mrf.mxu1  ;;  %v5284_v16 = vpop.f32.mrf.mxu0 }
 0x783   : > { %v5290_v36 = vadd.f32 %v5243_v45, %v5173_v35  ;;  %v5292_v62 = vadd.f32 %v5284_v16, %v5175_v11 }
 0x784   : > { %v5245_v24 = vpop.f32.mrf.mxu1  ;;  %v6290_v14 = vpop.f32.mrf.mxu0 }
 0x785   : > { %v5291_v37 = vadd.f32 %v5245_v24, %v5174_v61 }
 0x786   : > { %v5247_v51 = vpop.f32.mrf.mxu1  ;;  %v5287_v39 = vpop.f32.mrf.mxu0 }
 0x788   : > { %v5248_v40 = vpop.f32.mrf.mxu1  ;;  %v6291_v3 = vpop.f32.mrf.mxu0 }
 0x78a   : > { %v5360_v17 = vpop.f32.mrf.mxu1  ;;  %v5401_v22 = vpop.f32.mrf.mxu0 }
 0x78b   : > { %v5407_v13 = vadd.f32 %v5360_v17, %v5290_v36  ;;  %v5409_v25 = vadd.f32 %v5401_v22, %v5292_v62 }
 0x78c   : > { %v5362_v34 = vpop.f32.mrf.mxu1  ;;  %v6298_v31 = vpop.f32.mrf.mxu0 }
 0x78d   : > { %v5408_v27 = vadd.f32 %v5362_v34, %v5291_v37 }
 0x78e   : > { %v5364_v8 = vpop.f32.mrf.mxu1  ;;  %v5404_v19 = vpop.f32.mrf.mxu0 }
 0x790   : > { %v5365_v15 = vpop.f32.mrf.mxu1  ;;  %v6299_v47 = vpop.f32.mrf.mxu0 }
 0x792   : > { %v5476_v57 = vpop.f32.mrf.mxu1  ;;  %v5517_v6 = vpop.f32.mrf.mxu0 }
 0x793   : > { %v5523_v56 = vadd.f32 %v5476_v57, %v5407_v13  ;;  %v5525_v0 = vadd.f32 %v5517_v6, %v5409_v25 }
 0x794   : > { %v5478_v33 = vpop.f32.mrf.mxu1  ;;  %v6306_v30 = vpop.f32.mrf.mxu0 }
 0x795   : > { %v5532_v2 = vadd.f32 %v5530_v41, %v5523_v56  ;;  %v5534_v21 = vadd.f32 %v5530_v41, %v5525_v0  ;;  %v5524_v55 = vadd.f32 %v5478_v33, %v5408_v27 }
 0x796   : > { %v5480_v1 = vpop.f32.mrf.mxu1  ;;  %v5520_v18 = vpop.f32.mrf.mxu0 }
 0x797   : > { %6461 = vtanh.f32 %v5532_v2  ;;  %v5533_v59 = vadd.f32 %v5530_v41, %v5524_v55 }
 0x798   : > { %6463 = vtanh.f32 %v5534_v21  ;;  %v5481_v58 = vpop.f32.mrf.mxu1  ;;  %v6307_v4 = vpop.f32.mrf.mxu0 }
 0x799   : > { %6465 = vtanh.f32 %v5533_v59 }
 0x7a4   : > { %v6462_v12 = vpop.eup %6461 }
 0x7a5   : > { %v6464_v46 = vpop.eup %6463  ;;  %5538 = vst [vmem:[%s552_s26] sm:$0x3f] %v6462_v12 }
 0x7a6   : > { %v6466_v50 = vpop.eup %6465  ;;  %5540 = vst [vmem:[%s552_s26 + $0x10] sm:$0x3f] %v6464_v46 }
 0x7a7   : > { %5539 = vst [vmem:[%s552_s26 + $0x8] sm:$0x3f] %v6466_v50 }
 0x7a8 PF: > { %s20_s17 = sadd.s32 1, %s6518_s17   ;;  %s8738_s13 = smov %s6510_s15 }
 0x7a9   : > { %p17_p7 = scmp.ge.s32.totalorder %s20_s17, 6   ;;  %s8739_s14 = smov %s6514_s16 }
 0x7aa   : > { %s8740_s15 = smov %s8743_s18  ;;  %s8741_s16 = smov %s8747_s19 }
 0x7ab   :  { %19 = sbr.rel (!%p17_p7) target bundleno = 3 (0x3), region = 114 }

</bundles_post_ra>
